<compile_context>
chip_gen: v6e
topology: v6e:2x2x1
jax: 0.10.0
libtpu: 0.0.40
codegen_flags: <defaults>
</compile_context>

<pallas_src>
import jax
import jax.numpy as jnp
from jax.experimental import pallas as pl
from jax.experimental.pallas import tpu as pltpu


def _pick_band(hout, wout, max_rows=1024):
    """Largest divisor bh of hout with bh*wout <= max_rows, preferring >=2 bands."""
    divs = [d for d in range(1, hout + 1) if hout % d == 0 and d * wout <= max_rows]
    if not divs:
        return 1
    multi = [d for d in divs if hout // d >= 2]
    return max(multi) if multi else max(divs)


def _make_conv_kernel(*, stride, bh, wout, cins, cout, h, w):
    """Kernel for BN(eval)+ReLU+Conv3x3(stride, pad=1, no bias).

    The conv input is the channel-concatenation of len(cins) streams; each
    stream arrives as its own space-to-depth ref with its own weight slice and
    BN scale/shift, so the concat never materializes.
    Ref order: x_0..x_{k-1}, w_0..w_{k-1}, scale_0.., shift_0.., out.
    """
    k = len(cins)

    def body(*refs):
        x_refs = refs[0:k]
        w_refs = refs[k:2 * k]
        sc_refs = refs[2 * k:3 * k]
        sh_refs = refs[3 * k:4 * k]
        out_ref = refs[4 * k]

        ho0 = pl.program_id(1) * bh              # first output row of this band
        acc = jnp.zeros((bh * wout, cout), jnp.float32)

        for idx in range(k):
            cin = cins[idx]
            scale = sc_refs[idx][...].reshape(1, 1, cin)
            shift = sh_refs[idx][...].reshape(1, 1, cin)

            # Hoisted padded-image coordinates of every element of a tap tile
            # (tap (kh,kw) just adds +kh / +kw).
            ri = jax.lax.broadcasted_iota(jnp.int32, (bh, wout, cin), 0)
            ci = jax.lax.broadcasted_iota(jnp.int32, (bh, wout, cin), 1)
            row0 = stride * ho0 + stride * ri
            col0 = stride * ci

            for kh in range(3):
                rq0 = ho0 + kh // stride
                for kw in range(3):
                    p = (kh % stride) * stride + (kw % stride)   # s2d phase
                    cq0 = kw // stride
                    # Contiguous (bh, wout, cin) slice of the raw padded input.
                    tap = x_refs[idx][p, pl.ds(rq0, bh), pl.ds(cq0, wout), :]
                    # Fused BN(eval) + ReLU in f32.
                    a = jnp.maximum(tap.astype(jnp.float32) * scale + shift, 0.0)
                    # Conv zero-padding acts AFTER BN+ReLU in the reference
                    # module -> zero the border positions explicitly.
                    valid = ((row0 + kh >= 1) & (row0 + kh <= h)
                             & (col0 + kw >= 1) & (col0 + kw <= w))
                    a = jnp.where(valid, a, 0.0).astype(jnp.bfloat16)
                    acc = acc + jnp.dot(a.reshape(bh * wout, cin),
                                        w_refs[idx][kh * 3 + kw],
                                        preferred_element_type=jnp.float32)

        out_ref[...] = acc.reshape(bh, wout, cout).astype(out_ref.dtype)

    return body


def bn_relu_conv_nhwc(xs, bn, w_hwio, stride):
    """BN2d(eval) -> ReLU -> Conv2d(3x3, stride, pad=1, no bias) on the channel
    concatenation of the NHWC arrays in `xs` (concat fused, never materialized).
    Returns bf16 NHWC."""
    gamma, beta, mean, var, eps = bn
    N, H, W = xs[0].shape[:3]
    cins = tuple(int(x.shape[-1]) for x in xs)
    C = sum(cins)
    assert all(x.shape[:3] == (N, H, W) for x in xs)
    assert w_hwio.shape[:3] == (3, 3, C)
    Cout = int(w_hwio.shape[-1])

    s = stride
    Hout = (H + 2 - 3) // s + 1
    Wout = (W + 2 - 3) // s + 1

    # Folded eval-mode BatchNorm -> per-channel scale/shift (f32).
    scale = (gamma.astype(jnp.float32)
             / jnp.sqrt(var.astype(jnp.float32) + eps))
    shift = beta.astype(jnp.float32) - mean.astype(jnp.float32) * scale

    bh = _pick_band(Hout, Wout)
    nb = Hout // bh

    # Zero-pad spatially by 1 and space-to-depth by the stride so every tap
    # access in the kernel is a contiguous (unstrided) slice.
    Hp, Wp = H + 2, W + 2
    Hq, Wq = -(-Hp // s), -(-Wp // s)

    def s2d(x):
        c = x.shape[-1]
        xp = jnp.pad(x, ((0, 0), (1, Hq * s - H - 1), (1, Wq * s - W - 1), (0, 0)))
        return (xp.reshape(N, Hq, s, Wq, s, c)
                .transpose(0, 2, 4, 1, 3, 5)
                .reshape(N * s * s, Hq, Wq, c))

    xrs, w9s, scs, shs = [], [], [], []
    off = 0
    for x, cin in zip(xs, cins):
        xrs.append(s2d(x))
        w9s.append(w_hwio[:, :, off:off + cin, :]
                   .reshape(9, cin, Cout).astype(jnp.bfloat16))
        scs.append(scale[off:off + cin].reshape(1, cin))
        shs.append(shift[off:off + cin].reshape(1, cin))
        off += cin

    x_specs = [pl.BlockSpec((s * s, Hq, Wq, cin), lambda n, b: (n, 0, 0, 0))
               for cin in cins]
    w_specs = [pl.BlockSpec((9, cin, Cout), lambda n, b: (0, 0, 0))
               for cin in cins]
    sc_specs = [pl.BlockSpec((1, cin), lambda n, b: (0, 0)) for cin in cins]
    sh_specs = [pl.BlockSpec((1, cin), lambda n, b: (0, 0)) for cin in cins]
    out_spec = pl.BlockSpec((None, bh, Wout, Cout), lambda n, b: (n, b, 0, 0))

    # VMEM need (double-buffered blocks); cap well under v7x's 64 MiB / TC.
    need = 0
    for xr, w9 in zip(xrs, w9s):
        need += 2 * xr.dtype.itemsize * xr.shape[1] * xr.shape[2] * xr.shape[3] * (s * s)
        need += 2 * 2 * w9.size
    need += sum(2 * 2 * 4 * cin for cin in cins)          # scale + shift (f32)
    need += 2 * 2 * bh * Wout * Cout                      # bf16 output block
    vmem_limit = int(min(max(int(1.5 * need), 8 * 1024 * 1024), 48 * 1024 * 1024))

    kernel = _make_conv_kernel(stride=s, bh=bh, wout=Wout,
                               cins=cins, cout=Cout, h=H, w=W)

    return pl.pallas_call(
        kernel,
        out_shape=jax.ShapeDtypeStruct((N, Hout, Wout, Cout), jnp.bfloat16),
        grid_spec=pltpu.PrefetchScalarGridSpec(
            num_scalar_prefetch=0,
            grid=(N, nb),
            in_specs=x_specs + w_specs + sc_specs + sh_specs,
            out_specs=out_spec),
        compiler_params=pltpu.CompilerParams(
            dimension_semantics=("parallel", "parallel"),
            vmem_limit_bytes=vmem_limit),
    )(*xrs, *w9s, *scs, *shs)


def conv2x_forward(x_nchw, rem_nchw, params):
    # Single NCHW->NHWC transpose on entry; NHWC is kept through both convs.
    x = jnp.transpose(x_nchw, (0, 2, 3, 1)).astype(jnp.float32)
    rem = jnp.transpose(rem_nchw, (0, 2, 3, 1)).astype(jnp.float32)

    # conv1: BN(Cin) -> ReLU -> Conv2d(Cin, Cout, 3, stride=2, pad=1)
    y = bn_relu_conv_nhwc([x], params["bn1"], params["w1"], stride=2)
    assert y.shape == rem.shape          # mirrors torch `assert x.size() == rem.size()`

    # concat=True + is_conv2=True: the channel concat [y, rem] is fused into
    # conv2's kernel (two channel groups), never materialized in HBM.
    y = bn_relu_conv_nhwc([y, rem], params["bn2"], params["w2"], stride=1)

    return jnp.transpose(y, (0, 3, 1, 2)).astype(jnp.float32)   # back to NCHW


def init_params(key, in_ch, out_ch):
    ks = jax.random.split(key, 4)

    def bn_params(k, c):
        k1, k2, k3, k4 = jax.random.split(k, 4)
        gamma = jax.random.uniform(k1, (c,), minval=0.5, maxval=1.5)
        beta = 0.1 * jax.random.normal(k2, (c,))
        mean = 0.1 * jax.random.normal(k3, (c,))
        var = jax.random.uniform(k4, (c,), minval=0.5, maxval=1.5)
        return (gamma, beta, mean, var, 1e-5)

    # conv weights stored directly in HWIO: (3, 3, Cin, Cout)
    w1 = 0.1 * jax.random.normal(ks[0], (3, 3, in_ch, out_ch), jnp.float32)
    w2 = 0.1 * jax.random.normal(ks[1], (3, 3, 2 * out_ch, out_ch), jnp.float32)
    return {"bn1": bn_params(ks[2], in_ch), "w1": w1,
            "bn2": bn_params(ks[3], 2 * out_ch), "w2": w2}


def _ref_forward(x_nchw, rem_nchw, params):
    """Pure-JAX reference mirroring the kernel's mixed precision:
    f32 BN/ReLU, bf16 conv operands, f32 accumulation, bf16 conv outputs."""

    def bn_relu(a, bn):
        gamma, beta, mean, var, eps = bn
        sc = gamma / jnp.sqrt(var + eps)
        sh = beta - mean * sc
        return jnp.maximum(a * sc + sh, 0.0)

    def conv(a_f32, w_hwio, stride):
        return jax.lax.conv_general_dilated(
            a_f32.astype(jnp.bfloat16), w_hwio.astype(jnp.bfloat16),
            (stride, stride), [(1, 1), (1, 1)],
            dimension_numbers=("NHWC", "HWIO", "NHWC"),
            preferred_element_type=jnp.float32)

    x = jnp.transpose(x_nchw, (0, 2, 3, 1)).astype(jnp.float32)
    rem = jnp.transpose(rem_nchw, (0, 2, 3, 1)).astype(jnp.float32)
    y = conv(bn_relu(x, params["bn1"]), params["w1"], 2)
    # conv1's kernel output is bf16; rem stays f32 into BN2 (as in the kernel path)
    y = jnp.concatenate([y.astype(jnp.bfloat16).astype(jnp.float32), rem], axis=-1)
    y = conv(bn_relu(y, params["bn2"]), params["w2"], 1)
    y = y.astype(jnp.bfloat16).astype(jnp.float32)
    return jnp.transpose(y, (0, 3, 1, 2))


if __name__ == "__main__":
    key = jax.random.PRNGKey(0)
    kx, kr, kp = jax.random.split(key, 3)

    N, Cin, H, W = 2, 4, 16, 16
    Cout = 8

    x = jax.random.normal(kx, (N, Cin, H, W), jnp.float32)
    rem = jax.random.normal(kr, (N, Cout, H // 2, W // 2), jnp.float32)
    params = init_params(kp, Cin, Cout)

    fwd = jax.jit(conv2x_forward)
    out = jax.block_until_ready(fwd(x, rem, params))
    ref = jax.block_until_ready(_ref_forward(x, rem, params))

    assert out.shape == (N, Cout, H // 2, W // 2)
    assert out.dtype == jnp.float32
    assert jnp.allclose(out, ref, atol=1e-2, rtol=1e-2), \
        float(jnp.max(jnp.abs(out - ref)))
    print("KERNEL_OK")
</pallas_src>

<mosaic_0001>
module attributes {stable_mosaic.version = 11 : i64} {
  func.func @body(%arg0: i32, %arg1: i32, %arg2: memref<4x9x9x4xf32, #tpu.memory_space<vmem>>, %arg3: memref<9x4x8xbf16, #tpu.memory_space<vmem>>, %arg4: memref<1x4xf32, #tpu.memory_space<vmem>>, %arg5: memref<1x4xf32, #tpu.memory_space<vmem>>, %arg6: memref<1x4x8x8xbf16, #tpu.memory_space<vmem>>) attributes {dimension_semantics = [#tpu.dimension_semantics<parallel>, #tpu.dimension_semantics<parallel>], iteration_bounds = array<i64: 2, 2>, scalar_prefetch = 0 : i64, scratch_operands = 0 : i64, tpu.core_type = #tpu.core_type<tc>, window_params = [{transform_indices = @transform_0, window_bounds = array<i64: 4, 9, 9, 4>}, {pipeline_mode = #tpu.pipeline_mode<synchronous>, transform_indices = @transform_1, window_bounds = array<i64: 9, 4, 8>}, {pipeline_mode = #tpu.pipeline_mode<synchronous>, transform_indices = @transform_2, window_bounds = array<i64: 1, 4>}, {pipeline_mode = #tpu.pipeline_mode<synchronous>, transform_indices = @transform_3, window_bounds = array<i64: 1, 4>}, {transform_indices = @transform_4, window_bounds = array<i64: 1, 4, 8, 8>}]} {
    %c4_i32 = arith.constant 4 : i32
    %0 = arith.muli %arg1, %c4_i32 : i32
    %cst = arith.constant 0.000000e+00 : f32
    %1 = vector.broadcast %cst : f32 to vector<32x8xf32>
    %c0 = arith.constant 0 : index
    %c0_0 = arith.constant 0 : index
    %2 = vector.load %arg4[%c0, %c0_0] : memref<1x4xf32, #tpu.memory_space<vmem>>, vector<1x4xf32>
    %3 = vector.shape_cast %2 : vector<1x4xf32> to vector<1x1x4xf32>
    %c0_1 = arith.constant 0 : index
    %c0_2 = arith.constant 0 : index
    %4 = vector.load %arg5[%c0_1, %c0_2] : memref<1x4xf32, #tpu.memory_space<vmem>>, vector<1x4xf32>
    %5 = vector.shape_cast %4 : vector<1x4xf32> to vector<1x1x4xf32>
    %6 = tpu.iota {dimensions = array<i32: 0>} : vector<4x8x4xi32>
    %7 = tpu.iota {dimensions = array<i32: 1>} : vector<4x8x4xi32>
    %c2_i32 = arith.constant 2 : i32
    %8 = arith.muli %c2_i32, %0 : i32
    %c2_i32_3 = arith.constant 2 : i32
    %9 = vector.broadcast %c2_i32_3 : i32 to vector<4x8x4xi32>
    %10 = arith.muli %9, %6 : vector<4x8x4xi32>
    %11 = vector.broadcast %8 : i32 to vector<4x8x4xi32>
    %12 = arith.addi %11, %10 : vector<4x8x4xi32>
    %c2_i32_4 = arith.constant 2 : i32
    %13 = vector.broadcast %c2_i32_4 : i32 to vector<4x8x4xi32>
    %14 = arith.muli %13, %7 : vector<4x8x4xi32>
    %c0_i32 = arith.constant 0 : i32
    %15 = arith.addi %0, %c0_i32 : i32
    %c0_5 = arith.constant 0 : index
    %16 = arith.index_cast %15 : i32 to index
    %c0_6 = arith.constant 0 : index
    %c0_7 = arith.constant 0 : index
    %17 = vector.load %arg2[%c0_5, %16, %c0_6, %c0_7] : memref<4x9x9x4xf32, #tpu.memory_space<vmem>>, vector<1x4x8x4xf32>
    %18 = vector.shape_cast %17 : vector<1x4x8x4xf32> to vector<4x8x4xf32>
    %19 = vector.broadcast %3 : vector<1x1x4xf32> to vector<4x8x4xf32>
    %20 = arith.mulf %18, %19 : vector<4x8x4xf32>
    %21 = vector.broadcast %5 : vector<1x1x4xf32> to vector<4x8x4xf32>
    %22 = arith.addf %20, %21 : vector<4x8x4xf32>
    %cst_8 = arith.constant 0.000000e+00 : f32
    %23 = vector.broadcast %cst_8 : f32 to vector<4x8x4xf32>
    %24 = arith.maximumf %22, %23 : vector<4x8x4xf32>
    %c0_i32_9 = arith.constant 0 : i32
    %25 = vector.broadcast %c0_i32_9 : i32 to vector<4x8x4xi32>
    %26 = arith.addi %12, %25 : vector<4x8x4xi32>
    %c1_i32 = arith.constant 1 : i32
    %27 = vector.broadcast %c1_i32 : i32 to vector<4x8x4xi32>
    %28 = arith.cmpi sge, %26, %27 : vector<4x8x4xi32>
    %c0_i32_10 = arith.constant 0 : i32
    %29 = vector.broadcast %c0_i32_10 : i32 to vector<4x8x4xi32>
    %30 = arith.addi %12, %29 : vector<4x8x4xi32>
    %c16_i32 = arith.constant 16 : i32
    %31 = vector.broadcast %c16_i32 : i32 to vector<4x8x4xi32>
    %32 = arith.cmpi sle, %30, %31 : vector<4x8x4xi32>
    %33 = arith.andi %28, %32 : vector<4x8x4xi1>
    %c0_i32_11 = arith.constant 0 : i32
    %34 = vector.broadcast %c0_i32_11 : i32 to vector<4x8x4xi32>
    %35 = arith.addi %14, %34 : vector<4x8x4xi32>
    %c1_i32_12 = arith.constant 1 : i32
    %36 = vector.broadcast %c1_i32_12 : i32 to vector<4x8x4xi32>
    %37 = arith.cmpi sge, %35, %36 : vector<4x8x4xi32>
    %38 = arith.andi %33, %37 : vector<4x8x4xi1>
    %c0_i32_13 = arith.constant 0 : i32
    %39 = vector.broadcast %c0_i32_13 : i32 to vector<4x8x4xi32>
    %40 = arith.addi %14, %39 : vector<4x8x4xi32>
    %c16_i32_14 = arith.constant 16 : i32
    %41 = vector.broadcast %c16_i32_14 : i32 to vector<4x8x4xi32>
    %42 = arith.cmpi sle, %40, %41 : vector<4x8x4xi32>
    %43 = arith.andi %38, %42 : vector<4x8x4xi1>
    %cst_15 = arith.constant 0.000000e+00 : f32
    %44 = vector.broadcast %cst_15 : f32 to vector<4x8x4xf32>
    %45 = arith.select %43, %24, %44 : vector<4x8x4xi1>, vector<4x8x4xf32>
    %46 = arith.truncf %45 : vector<4x8x4xf32> to vector<4x8x4xbf16>
    %47 = vector.shape_cast %46 : vector<4x8x4xbf16> to vector<32x4xbf16>
    %c0_16 = arith.constant 0 : index
    %c0_17 = arith.constant 0 : index
    %c0_18 = arith.constant 0 : index
    %48 = vector.load %arg3[%c0_16, %c0_17, %c0_18] : memref<9x4x8xbf16, #tpu.memory_space<vmem>>, vector<1x4x8xbf16>
    %49 = vector.shape_cast %48 : vector<1x4x8xbf16> to vector<4x8xbf16>
    %cst_19 = arith.constant dense<0.000000e+00> : vector<32x8xf32>
    %50 = tpu.matmul %47, %49, %cst_19 {dimension_numbers = #tpu.dot_dimension_numbers<[1], [0], [0], [1], [0, 0, 1, 1], [], []>} : vector<32x4xbf16>, vector<4x8xbf16>, vector<32x8xf32> -> vector<32x8xf32>
    %51 = arith.addf %1, %50 : vector<32x8xf32>
    %c1 = arith.constant 1 : index
    %52 = arith.index_cast %15 : i32 to index
    %c0_20 = arith.constant 0 : index
    %c0_21 = arith.constant 0 : index
    %53 = vector.load %arg2[%c1, %52, %c0_20, %c0_21] : memref<4x9x9x4xf32, #tpu.memory_space<vmem>>, vector<1x4x8x4xf32>
    %54 = vector.shape_cast %53 : vector<1x4x8x4xf32> to vector<4x8x4xf32>
    %55 = vector.broadcast %3 : vector<1x1x4xf32> to vector<4x8x4xf32>
    %56 = arith.mulf %54, %55 : vector<4x8x4xf32>
    %57 = vector.broadcast %5 : vector<1x1x4xf32> to vector<4x8x4xf32>
    %58 = arith.addf %56, %57 : vector<4x8x4xf32>
    %cst_22 = arith.constant 0.000000e+00 : f32
    %59 = vector.broadcast %cst_22 : f32 to vector<4x8x4xf32>
    %60 = arith.maximumf %58, %59 : vector<4x8x4xf32>
    %c0_i32_23 = arith.constant 0 : i32
    %61 = vector.broadcast %c0_i32_23 : i32 to vector<4x8x4xi32>
    %62 = arith.addi %12, %61 : vector<4x8x4xi32>
    %c1_i32_24 = arith.constant 1 : i32
    %63 = vector.broadcast %c1_i32_24 : i32 to vector<4x8x4xi32>
    %64 = arith.cmpi sge, %62, %63 : vector<4x8x4xi32>
    %c0_i32_25 = arith.constant 0 : i32
    %65 = vector.broadcast %c0_i32_25 : i32 to vector<4x8x4xi32>
    %66 = arith.addi %12, %65 : vector<4x8x4xi32>
    %c16_i32_26 = arith.constant 16 : i32
    %67 = vector.broadcast %c16_i32_26 : i32 to vector<4x8x4xi32>
    %68 = arith.cmpi sle, %66, %67 : vector<4x8x4xi32>
    %69 = arith.andi %64, %68 : vector<4x8x4xi1>
    %c1_i32_27 = arith.constant 1 : i32
    %70 = vector.broadcast %c1_i32_27 : i32 to vector<4x8x4xi32>
    %71 = arith.addi %14, %70 : vector<4x8x4xi32>
    %c1_i32_28 = arith.constant 1 : i32
    %72 = vector.broadcast %c1_i32_28 : i32 to vector<4x8x4xi32>
    %73 = arith.cmpi sge, %71, %72 : vector<4x8x4xi32>
    %74 = arith.andi %69, %73 : vector<4x8x4xi1>
    %c1_i32_29 = arith.constant 1 : i32
    %75 = vector.broadcast %c1_i32_29 : i32 to vector<4x8x4xi32>
    %76 = arith.addi %14, %75 : vector<4x8x4xi32>
    %c16_i32_30 = arith.constant 16 : i32
    %77 = vector.broadcast %c16_i32_30 : i32 to vector<4x8x4xi32>
    %78 = arith.cmpi sle, %76, %77 : vector<4x8x4xi32>
    %79 = arith.andi %74, %78 : vector<4x8x4xi1>
    %cst_31 = arith.constant 0.000000e+00 : f32
    %80 = vector.broadcast %cst_31 : f32 to vector<4x8x4xf32>
    %81 = arith.select %79, %60, %80 : vector<4x8x4xi1>, vector<4x8x4xf32>
    %82 = arith.truncf %81 : vector<4x8x4xf32> to vector<4x8x4xbf16>
    %83 = vector.shape_cast %82 : vector<4x8x4xbf16> to vector<32x4xbf16>
    %c1_32 = arith.constant 1 : index
    %c0_33 = arith.constant 0 : index
    %c0_34 = arith.constant 0 : index
    %84 = vector.load %arg3[%c1_32, %c0_33, %c0_34] : memref<9x4x8xbf16, #tpu.memory_space<vmem>>, vector<1x4x8xbf16>
    %85 = vector.shape_cast %84 : vector<1x4x8xbf16> to vector<4x8xbf16>
    %cst_35 = arith.constant dense<0.000000e+00> : vector<32x8xf32>
    %86 = tpu.matmul %83, %85, %cst_35 {dimension_numbers = #tpu.dot_dimension_numbers<[1], [0], [0], [1], [0, 0, 1, 1], [], []>} : vector<32x4xbf16>, vector<4x8xbf16>, vector<32x8xf32> -> vector<32x8xf32>
    %87 = arith.addf %51, %86 : vector<32x8xf32>
    %c0_36 = arith.constant 0 : index
    %88 = arith.index_cast %15 : i32 to index
    %c1_37 = arith.constant 1 : index
    %c0_38 = arith.constant 0 : index
    %89 = vector.load %arg2[%c0_36, %88, %c1_37, %c0_38] : memref<4x9x9x4xf32, #tpu.memory_space<vmem>>, vector<1x4x8x4xf32>
    %90 = vector.shape_cast %89 : vector<1x4x8x4xf32> to vector<4x8x4xf32>
    %91 = vector.broadcast %3 : vector<1x1x4xf32> to vector<4x8x4xf32>
    %92 = arith.mulf %90, %91 : vector<4x8x4xf32>
    %93 = vector.broadcast %5 : vector<1x1x4xf32> to vector<4x8x4xf32>
    %94 = arith.addf %92, %93 : vector<4x8x4xf32>
    %cst_39 = arith.constant 0.000000e+00 : f32
    %95 = vector.broadcast %cst_39 : f32 to vector<4x8x4xf32>
    %96 = arith.maximumf %94, %95 : vector<4x8x4xf32>
    %c0_i32_40 = arith.constant 0 : i32
    %97 = vector.broadcast %c0_i32_40 : i32 to vector<4x8x4xi32>
    %98 = arith.addi %12, %97 : vector<4x8x4xi32>
    %c1_i32_41 = arith.constant 1 : i32
    %99 = vector.broadcast %c1_i32_41 : i32 to vector<4x8x4xi32>
    %100 = arith.cmpi sge, %98, %99 : vector<4x8x4xi32>
    %c0_i32_42 = arith.constant 0 : i32
    %101 = vector.broadcast %c0_i32_42 : i32 to vector<4x8x4xi32>
    %102 = arith.addi %12, %101 : vector<4x8x4xi32>
    %c16_i32_43 = arith.constant 16 : i32
    %103 = vector.broadcast %c16_i32_43 : i32 to vector<4x8x4xi32>
    %104 = arith.cmpi sle, %102, %103 : vector<4x8x4xi32>
    %105 = arith.andi %100, %104 : vector<4x8x4xi1>
    %c2_i32_44 = arith.constant 2 : i32
    %106 = vector.broadcast %c2_i32_44 : i32 to vector<4x8x4xi32>
    %107 = arith.addi %14, %106 : vector<4x8x4xi32>
    %c1_i32_45 = arith.constant 1 : i32
    %108 = vector.broadcast %c1_i32_45 : i32 to vector<4x8x4xi32>
    %109 = arith.cmpi sge, %107, %108 : vector<4x8x4xi32>
    %110 = arith.andi %105, %109 : vector<4x8x4xi1>
    %c2_i32_46 = arith.constant 2 : i32
    %111 = vector.broadcast %c2_i32_46 : i32 to vector<4x8x4xi32>
    %112 = arith.addi %14, %111 : vector<4x8x4xi32>
    %c16_i32_47 = arith.constant 16 : i32
    %113 = vector.broadcast %c16_i32_47 : i32 to vector<4x8x4xi32>
    %114 = arith.cmpi sle, %112, %113 : vector<4x8x4xi32>
    %115 = arith.andi %110, %114 : vector<4x8x4xi1>
    %cst_48 = arith.constant 0.000000e+00 : f32
    %116 = vector.broadcast %cst_48 : f32 to vector<4x8x4xf32>
    %117 = arith.select %115, %96, %116 : vector<4x8x4xi1>, vector<4x8x4xf32>
    %118 = arith.truncf %117 : vector<4x8x4xf32> to vector<4x8x4xbf16>
    %119 = vector.shape_cast %118 : vector<4x8x4xbf16> to vector<32x4xbf16>
    %c2 = arith.constant 2 : index
    %c0_49 = arith.constant 0 : index
    %c0_50 = arith.constant 0 : index
    %120 = vector.load %arg3[%c2, %c0_49, %c0_50] : memref<9x4x8xbf16, #tpu.memory_space<vmem>>, vector<1x4x8xbf16>
    %121 = vector.shape_cast %120 : vector<1x4x8xbf16> to vector<4x8xbf16>
    %cst_51 = arith.constant dense<0.000000e+00> : vector<32x8xf32>
    %122 = tpu.matmul %119, %121, %cst_51 {dimension_numbers = #tpu.dot_dimension_numbers<[1], [0], [0], [1], [0, 0, 1, 1], [], []>} : vector<32x4xbf16>, vector<4x8xbf16>, vector<32x8xf32> -> vector<32x8xf32>
    %123 = arith.addf %87, %122 : vector<32x8xf32>
    %c0_i32_52 = arith.constant 0 : i32
    %124 = arith.addi %0, %c0_i32_52 : i32
    %c2_53 = arith.constant 2 : index
    %125 = arith.index_cast %124 : i32 to index
    %c0_54 = arith.constant 0 : index
    %c0_55 = arith.constant 0 : index
    %126 = vector.load %arg2[%c2_53, %125, %c0_54, %c0_55] : memref<4x9x9x4xf32, #tpu.memory_space<vmem>>, vector<1x4x8x4xf32>
    %127 = vector.shape_cast %126 : vector<1x4x8x4xf32> to vector<4x8x4xf32>
    %128 = vector.broadcast %3 : vector<1x1x4xf32> to vector<4x8x4xf32>
    %129 = arith.mulf %127, %128 : vector<4x8x4xf32>
    %130 = vector.broadcast %5 : vector<1x1x4xf32> to vector<4x8x4xf32>
    %131 = arith.addf %129, %130 : vector<4x8x4xf32>
    %cst_56 = arith.constant 0.000000e+00 : f32
    %132 = vector.broadcast %cst_56 : f32 to vector<4x8x4xf32>
    %133 = arith.maximumf %131, %132 : vector<4x8x4xf32>
    %c1_i32_57 = arith.constant 1 : i32
    %134 = vector.broadcast %c1_i32_57 : i32 to vector<4x8x4xi32>
    %135 = arith.addi %12, %134 : vector<4x8x4xi32>
    %c1_i32_58 = arith.constant 1 : i32
    %136 = vector.broadcast %c1_i32_58 : i32 to vector<4x8x4xi32>
    %137 = arith.cmpi sge, %135, %136 : vector<4x8x4xi32>
    %c1_i32_59 = arith.constant 1 : i32
    %138 = vector.broadcast %c1_i32_59 : i32 to vector<4x8x4xi32>
    %139 = arith.addi %12, %138 : vector<4x8x4xi32>
    %c16_i32_60 = arith.constant 16 : i32
    %140 = vector.broadcast %c16_i32_60 : i32 to vector<4x8x4xi32>
    %141 = arith.cmpi sle, %139, %140 : vector<4x8x4xi32>
    %142 = arith.andi %137, %141 : vector<4x8x4xi1>
    %c0_i32_61 = arith.constant 0 : i32
    %143 = vector.broadcast %c0_i32_61 : i32 to vector<4x8x4xi32>
    %144 = arith.addi %14, %143 : vector<4x8x4xi32>
    %c1_i32_62 = arith.constant 1 : i32
    %145 = vector.broadcast %c1_i32_62 : i32 to vector<4x8x4xi32>
    %146 = arith.cmpi sge, %144, %145 : vector<4x8x4xi32>
    %147 = arith.andi %142, %146 : vector<4x8x4xi1>
    %c0_i32_63 = arith.constant 0 : i32
    %148 = vector.broadcast %c0_i32_63 : i32 to vector<4x8x4xi32>
    %149 = arith.addi %14, %148 : vector<4x8x4xi32>
    %c16_i32_64 = arith.constant 16 : i32
    %150 = vector.broadcast %c16_i32_64 : i32 to vector<4x8x4xi32>
    %151 = arith.cmpi sle, %149, %150 : vector<4x8x4xi32>
    %152 = arith.andi %147, %151 : vector<4x8x4xi1>
    %cst_65 = arith.constant 0.000000e+00 : f32
    %153 = vector.broadcast %cst_65 : f32 to vector<4x8x4xf32>
    %154 = arith.select %152, %133, %153 : vector<4x8x4xi1>, vector<4x8x4xf32>
    %155 = arith.truncf %154 : vector<4x8x4xf32> to vector<4x8x4xbf16>
    %156 = vector.shape_cast %155 : vector<4x8x4xbf16> to vector<32x4xbf16>
    %c3 = arith.constant 3 : index
    %c0_66 = arith.constant 0 : index
    %c0_67 = arith.constant 0 : index
    %157 = vector.load %arg3[%c3, %c0_66, %c0_67] : memref<9x4x8xbf16, #tpu.memory_space<vmem>>, vector<1x4x8xbf16>
    %158 = vector.shape_cast %157 : vector<1x4x8xbf16> to vector<4x8xbf16>
    %cst_68 = arith.constant dense<0.000000e+00> : vector<32x8xf32>
    %159 = tpu.matmul %156, %158, %cst_68 {dimension_numbers = #tpu.dot_dimension_numbers<[1], [0], [0], [1], [0, 0, 1, 1], [], []>} : vector<32x4xbf16>, vector<4x8xbf16>, vector<32x8xf32> -> vector<32x8xf32>
    %160 = arith.addf %123, %159 : vector<32x8xf32>
    %c3_69 = arith.constant 3 : index
    %161 = arith.index_cast %124 : i32 to index
    %c0_70 = arith.constant 0 : index
    %c0_71 = arith.constant 0 : index
    %162 = vector.load %arg2[%c3_69, %161, %c0_70, %c0_71] : memref<4x9x9x4xf32, #tpu.memory_space<vmem>>, vector<1x4x8x4xf32>
    %163 = vector.shape_cast %162 : vector<1x4x8x4xf32> to vector<4x8x4xf32>
    %164 = vector.broadcast %3 : vector<1x1x4xf32> to vector<4x8x4xf32>
    %165 = arith.mulf %163, %164 : vector<4x8x4xf32>
    %166 = vector.broadcast %5 : vector<1x1x4xf32> to vector<4x8x4xf32>
    %167 = arith.addf %165, %166 : vector<4x8x4xf32>
    %cst_72 = arith.constant 0.000000e+00 : f32
    %168 = vector.broadcast %cst_72 : f32 to vector<4x8x4xf32>
    %169 = arith.maximumf %167, %168 : vector<4x8x4xf32>
    %c1_i32_73 = arith.constant 1 : i32
    %170 = vector.broadcast %c1_i32_73 : i32 to vector<4x8x4xi32>
    %171 = arith.addi %12, %170 : vector<4x8x4xi32>
    %c1_i32_74 = arith.constant 1 : i32
    %172 = vector.broadcast %c1_i32_74 : i32 to vector<4x8x4xi32>
    %173 = arith.cmpi sge, %171, %172 : vector<4x8x4xi32>
    %c1_i32_75 = arith.constant 1 : i32
    %174 = vector.broadcast %c1_i32_75 : i32 to vector<4x8x4xi32>
    %175 = arith.addi %12, %174 : vector<4x8x4xi32>
    %c16_i32_76 = arith.constant 16 : i32
    %176 = vector.broadcast %c16_i32_76 : i32 to vector<4x8x4xi32>
    %177 = arith.cmpi sle, %175, %176 : vector<4x8x4xi32>
    %178 = arith.andi %173, %177 : vector<4x8x4xi1>
    %c1_i32_77 = arith.constant 1 : i32
    %179 = vector.broadcast %c1_i32_77 : i32 to vector<4x8x4xi32>
    %180 = arith.addi %14, %179 : vector<4x8x4xi32>
    %c1_i32_78 = arith.constant 1 : i32
    %181 = vector.broadcast %c1_i32_78 : i32 to vector<4x8x4xi32>
    %182 = arith.cmpi sge, %180, %181 : vector<4x8x4xi32>
    %183 = arith.andi %178, %182 : vector<4x8x4xi1>
    %c1_i32_79 = arith.constant 1 : i32
    %184 = vector.broadcast %c1_i32_79 : i32 to vector<4x8x4xi32>
    %185 = arith.addi %14, %184 : vector<4x8x4xi32>
    %c16_i32_80 = arith.constant 16 : i32
    %186 = vector.broadcast %c16_i32_80 : i32 to vector<4x8x4xi32>
    %187 = arith.cmpi sle, %185, %186 : vector<4x8x4xi32>
    %188 = arith.andi %183, %187 : vector<4x8x4xi1>
    %cst_81 = arith.constant 0.000000e+00 : f32
    %189 = vector.broadcast %cst_81 : f32 to vector<4x8x4xf32>
    %190 = arith.select %188, %169, %189 : vector<4x8x4xi1>, vector<4x8x4xf32>
    %191 = arith.truncf %190 : vector<4x8x4xf32> to vector<4x8x4xbf16>
    %192 = vector.shape_cast %191 : vector<4x8x4xbf16> to vector<32x4xbf16>
    %c4 = arith.constant 4 : index
    %c0_82 = arith.constant 0 : index
    %c0_83 = arith.constant 0 : index
    %193 = vector.load %arg3[%c4, %c0_82, %c0_83] : memref<9x4x8xbf16, #tpu.memory_space<vmem>>, vector<1x4x8xbf16>
    %194 = vector.shape_cast %193 : vector<1x4x8xbf16> to vector<4x8xbf16>
    %cst_84 = arith.constant dense<0.000000e+00> : vector<32x8xf32>
    %195 = tpu.matmul %192, %194, %cst_84 {dimension_numbers = #tpu.dot_dimension_numbers<[1], [0], [0], [1], [0, 0, 1, 1], [], []>} : vector<32x4xbf16>, vector<4x8xbf16>, vector<32x8xf32> -> vector<32x8xf32>
    %196 = arith.addf %160, %195 : vector<32x8xf32>
    %c2_85 = arith.constant 2 : index
    %197 = arith.index_cast %124 : i32 to index
    %c1_86 = arith.constant 1 : index
    %c0_87 = arith.constant 0 : index
    %198 = vector.load %arg2[%c2_85, %197, %c1_86, %c0_87] : memref<4x9x9x4xf32, #tpu.memory_space<vmem>>, vector<1x4x8x4xf32>
    %199 = vector.shape_cast %198 : vector<1x4x8x4xf32> to vector<4x8x4xf32>
    %200 = vector.broadcast %3 : vector<1x1x4xf32> to vector<4x8x4xf32>
    %201 = arith.mulf %199, %200 : vector<4x8x4xf32>
    %202 = vector.broadcast %5 : vector<1x1x4xf32> to vector<4x8x4xf32>
    %203 = arith.addf %201, %202 : vector<4x8x4xf32>
    %cst_88 = arith.constant 0.000000e+00 : f32
    %204 = vector.broadcast %cst_88 : f32 to vector<4x8x4xf32>
    %205 = arith.maximumf %203, %204 : vector<4x8x4xf32>
    %c1_i32_89 = arith.constant 1 : i32
    %206 = vector.broadcast %c1_i32_89 : i32 to vector<4x8x4xi32>
    %207 = arith.addi %12, %206 : vector<4x8x4xi32>
    %c1_i32_90 = arith.constant 1 : i32
    %208 = vector.broadcast %c1_i32_90 : i32 to vector<4x8x4xi32>
    %209 = arith.cmpi sge, %207, %208 : vector<4x8x4xi32>
    %c1_i32_91 = arith.constant 1 : i32
    %210 = vector.broadcast %c1_i32_91 : i32 to vector<4x8x4xi32>
    %211 = arith.addi %12, %210 : vector<4x8x4xi32>
    %c16_i32_92 = arith.constant 16 : i32
    %212 = vector.broadcast %c16_i32_92 : i32 to vector<4x8x4xi32>
    %213 = arith.cmpi sle, %211, %212 : vector<4x8x4xi32>
    %214 = arith.andi %209, %213 : vector<4x8x4xi1>
    %c2_i32_93 = arith.constant 2 : i32
    %215 = vector.broadcast %c2_i32_93 : i32 to vector<4x8x4xi32>
    %216 = arith.addi %14, %215 : vector<4x8x4xi32>
    %c1_i32_94 = arith.constant 1 : i32
    %217 = vector.broadcast %c1_i32_94 : i32 to vector<4x8x4xi32>
    %218 = arith.cmpi sge, %216, %217 : vector<4x8x4xi32>
    %219 = arith.andi %214, %218 : vector<4x8x4xi1>
    %c2_i32_95 = arith.constant 2 : i32
    %220 = vector.broadcast %c2_i32_95 : i32 to vector<4x8x4xi32>
    %221 = arith.addi %14, %220 : vector<4x8x4xi32>
    %c16_i32_96 = arith.constant 16 : i32
    %222 = vector.broadcast %c16_i32_96 : i32 to vector<4x8x4xi32>
    %223 = arith.cmpi sle, %221, %222 : vector<4x8x4xi32>
    %224 = arith.andi %219, %223 : vector<4x8x4xi1>
    %cst_97 = arith.constant 0.000000e+00 : f32
    %225 = vector.broadcast %cst_97 : f32 to vector<4x8x4xf32>
    %226 = arith.select %224, %205, %225 : vector<4x8x4xi1>, vector<4x8x4xf32>
    %227 = arith.truncf %226 : vector<4x8x4xf32> to vector<4x8x4xbf16>
    %228 = vector.shape_cast %227 : vector<4x8x4xbf16> to vector<32x4xbf16>
    %c5 = arith.constant 5 : index
    %c0_98 = arith.constant 0 : index
    %c0_99 = arith.constant 0 : index
    %229 = vector.load %arg3[%c5, %c0_98, %c0_99] : memref<9x4x8xbf16, #tpu.memory_space<vmem>>, vector<1x4x8xbf16>
    %230 = vector.shape_cast %229 : vector<1x4x8xbf16> to vector<4x8xbf16>
    %cst_100 = arith.constant dense<0.000000e+00> : vector<32x8xf32>
    %231 = tpu.matmul %228, %230, %cst_100 {dimension_numbers = #tpu.dot_dimension_numbers<[1], [0], [0], [1], [0, 0, 1, 1], [], []>} : vector<32x4xbf16>, vector<4x8xbf16>, vector<32x8xf32> -> vector<32x8xf32>
    %232 = arith.addf %196, %231 : vector<32x8xf32>
    %c1_i32_101 = arith.constant 1 : i32
    %233 = arith.addi %0, %c1_i32_101 : i32
    %c0_102 = arith.constant 0 : index
    %234 = arith.index_cast %233 : i32 to index
    %c0_103 = arith.constant 0 : index
    %c0_104 = arith.constant 0 : index
    %235 = vector.load %arg2[%c0_102, %234, %c0_103, %c0_104] : memref<4x9x9x4xf32, #tpu.memory_space<vmem>>, vector<1x4x8x4xf32>
    %236 = vector.shape_cast %235 : vector<1x4x8x4xf32> to vector<4x8x4xf32>
    %237 = vector.broadcast %3 : vector<1x1x4xf32> to vector<4x8x4xf32>
    %238 = arith.mulf %236, %237 : vector<4x8x4xf32>
    %239 = vector.broadcast %5 : vector<1x1x4xf32> to vector<4x8x4xf32>
    %240 = arith.addf %238, %239 : vector<4x8x4xf32>
    %cst_105 = arith.constant 0.000000e+00 : f32
    %241 = vector.broadcast %cst_105 : f32 to vector<4x8x4xf32>
    %242 = arith.maximumf %240, %241 : vector<4x8x4xf32>
    %c2_i32_106 = arith.constant 2 : i32
    %243 = vector.broadcast %c2_i32_106 : i32 to vector<4x8x4xi32>
    %244 = arith.addi %12, %243 : vector<4x8x4xi32>
    %c1_i32_107 = arith.constant 1 : i32
    %245 = vector.broadcast %c1_i32_107 : i32 to vector<4x8x4xi32>
    %246 = arith.cmpi sge, %244, %245 : vector<4x8x4xi32>
    %c2_i32_108 = arith.constant 2 : i32
    %247 = vector.broadcast %c2_i32_108 : i32 to vector<4x8x4xi32>
    %248 = arith.addi %12, %247 : vector<4x8x4xi32>
    %c16_i32_109 = arith.constant 16 : i32
    %249 = vector.broadcast %c16_i32_109 : i32 to vector<4x8x4xi32>
    %250 = arith.cmpi sle, %248, %249 : vector<4x8x4xi32>
    %251 = arith.andi %246, %250 : vector<4x8x4xi1>
    %c0_i32_110 = arith.constant 0 : i32
    %252 = vector.broadcast %c0_i32_110 : i32 to vector<4x8x4xi32>
    %253 = arith.addi %14, %252 : vector<4x8x4xi32>
    %c1_i32_111 = arith.constant 1 : i32
    %254 = vector.broadcast %c1_i32_111 : i32 to vector<4x8x4xi32>
    %255 = arith.cmpi sge, %253, %254 : vector<4x8x4xi32>
    %256 = arith.andi %251, %255 : vector<4x8x4xi1>
    %c0_i32_112 = arith.constant 0 : i32
    %257 = vector.broadcast %c0_i32_112 : i32 to vector<4x8x4xi32>
    %258 = arith.addi %14, %257 : vector<4x8x4xi32>
    %c16_i32_113 = arith.constant 16 : i32
    %259 = vector.broadcast %c16_i32_113 : i32 to vector<4x8x4xi32>
    %260 = arith.cmpi sle, %258, %259 : vector<4x8x4xi32>
    %261 = arith.andi %256, %260 : vector<4x8x4xi1>
    %cst_114 = arith.constant 0.000000e+00 : f32
    %262 = vector.broadcast %cst_114 : f32 to vector<4x8x4xf32>
    %263 = arith.select %261, %242, %262 : vector<4x8x4xi1>, vector<4x8x4xf32>
    %264 = arith.truncf %263 : vector<4x8x4xf32> to vector<4x8x4xbf16>
    %265 = vector.shape_cast %264 : vector<4x8x4xbf16> to vector<32x4xbf16>
    %c6 = arith.constant 6 : index
    %c0_115 = arith.constant 0 : index
    %c0_116 = arith.constant 0 : index
    %266 = vector.load %arg3[%c6, %c0_115, %c0_116] : memref<9x4x8xbf16, #tpu.memory_space<vmem>>, vector<1x4x8xbf16>
    %267 = vector.shape_cast %266 : vector<1x4x8xbf16> to vector<4x8xbf16>
    %cst_117 = arith.constant dense<0.000000e+00> : vector<32x8xf32>
    %268 = tpu.matmul %265, %267, %cst_117 {dimension_numbers = #tpu.dot_dimension_numbers<[1], [0], [0], [1], [0, 0, 1, 1], [], []>} : vector<32x4xbf16>, vector<4x8xbf16>, vector<32x8xf32> -> vector<32x8xf32>
    %269 = arith.addf %232, %268 : vector<32x8xf32>
    %c1_118 = arith.constant 1 : index
    %270 = arith.index_cast %233 : i32 to index
    %c0_119 = arith.constant 0 : index
    %c0_120 = arith.constant 0 : index
    %271 = vector.load %arg2[%c1_118, %270, %c0_119, %c0_120] : memref<4x9x9x4xf32, #tpu.memory_space<vmem>>, vector<1x4x8x4xf32>
    %272 = vector.shape_cast %271 : vector<1x4x8x4xf32> to vector<4x8x4xf32>
    %273 = vector.broadcast %3 : vector<1x1x4xf32> to vector<4x8x4xf32>
    %274 = arith.mulf %272, %273 : vector<4x8x4xf32>
    %275 = vector.broadcast %5 : vector<1x1x4xf32> to vector<4x8x4xf32>
    %276 = arith.addf %274, %275 : vector<4x8x4xf32>
    %cst_121 = arith.constant 0.000000e+00 : f32
    %277 = vector.broadcast %cst_121 : f32 to vector<4x8x4xf32>
    %278 = arith.maximumf %276, %277 : vector<4x8x4xf32>
    %c2_i32_122 = arith.constant 2 : i32
    %279 = vector.broadcast %c2_i32_122 : i32 to vector<4x8x4xi32>
    %280 = arith.addi %12, %279 : vector<4x8x4xi32>
    %c1_i32_123 = arith.constant 1 : i32
    %281 = vector.broadcast %c1_i32_123 : i32 to vector<4x8x4xi32>
    %282 = arith.cmpi sge, %280, %281 : vector<4x8x4xi32>
    %c2_i32_124 = arith.constant 2 : i32
    %283 = vector.broadcast %c2_i32_124 : i32 to vector<4x8x4xi32>
    %284 = arith.addi %12, %283 : vector<4x8x4xi32>
    %c16_i32_125 = arith.constant 16 : i32
    %285 = vector.broadcast %c16_i32_125 : i32 to vector<4x8x4xi32>
    %286 = arith.cmpi sle, %284, %285 : vector<4x8x4xi32>
    %287 = arith.andi %282, %286 : vector<4x8x4xi1>
    %c1_i32_126 = arith.constant 1 : i32
    %288 = vector.broadcast %c1_i32_126 : i32 to vector<4x8x4xi32>
    %289 = arith.addi %14, %288 : vector<4x8x4xi32>
    %c1_i32_127 = arith.constant 1 : i32
    %290 = vector.broadcast %c1_i32_127 : i32 to vector<4x8x4xi32>
    %291 = arith.cmpi sge, %289, %290 : vector<4x8x4xi32>
    %292 = arith.andi %287, %291 : vector<4x8x4xi1>
    %c1_i32_128 = arith.constant 1 : i32
    %293 = vector.broadcast %c1_i32_128 : i32 to vector<4x8x4xi32>
    %294 = arith.addi %14, %293 : vector<4x8x4xi32>
    %c16_i32_129 = arith.constant 16 : i32
    %295 = vector.broadcast %c16_i32_129 : i32 to vector<4x8x4xi32>
    %296 = arith.cmpi sle, %294, %295 : vector<4x8x4xi32>
    %297 = arith.andi %292, %296 : vector<4x8x4xi1>
    %cst_130 = arith.constant 0.000000e+00 : f32
    %298 = vector.broadcast %cst_130 : f32 to vector<4x8x4xf32>
    %299 = arith.select %297, %278, %298 : vector<4x8x4xi1>, vector<4x8x4xf32>
    %300 = arith.truncf %299 : vector<4x8x4xf32> to vector<4x8x4xbf16>
    %301 = vector.shape_cast %300 : vector<4x8x4xbf16> to vector<32x4xbf16>
    %c7 = arith.constant 7 : index
    %c0_131 = arith.constant 0 : index
    %c0_132 = arith.constant 0 : index
    %302 = vector.load %arg3[%c7, %c0_131, %c0_132] : memref<9x4x8xbf16, #tpu.memory_space<vmem>>, vector<1x4x8xbf16>
    %303 = vector.shape_cast %302 : vector<1x4x8xbf16> to vector<4x8xbf16>
    %cst_133 = arith.constant dense<0.000000e+00> : vector<32x8xf32>
    %304 = tpu.matmul %301, %303, %cst_133 {dimension_numbers = #tpu.dot_dimension_numbers<[1], [0], [0], [1], [0, 0, 1, 1], [], []>} : vector<32x4xbf16>, vector<4x8xbf16>, vector<32x8xf32> -> vector<32x8xf32>
    %305 = arith.addf %269, %304 : vector<32x8xf32>
    %c0_134 = arith.constant 0 : index
    %306 = arith.index_cast %233 : i32 to index
    %c1_135 = arith.constant 1 : index
    %c0_136 = arith.constant 0 : index
    %307 = vector.load %arg2[%c0_134, %306, %c1_135, %c0_136] : memref<4x9x9x4xf32, #tpu.memory_space<vmem>>, vector<1x4x8x4xf32>
    %308 = vector.shape_cast %307 : vector<1x4x8x4xf32> to vector<4x8x4xf32>
    %309 = vector.broadcast %3 : vector<1x1x4xf32> to vector<4x8x4xf32>
    %310 = arith.mulf %308, %309 : vector<4x8x4xf32>
    %311 = vector.broadcast %5 : vector<1x1x4xf32> to vector<4x8x4xf32>
    %312 = arith.addf %310, %311 : vector<4x8x4xf32>
    %cst_137 = arith.constant 0.000000e+00 : f32
    %313 = vector.broadcast %cst_137 : f32 to vector<4x8x4xf32>
    %314 = arith.maximumf %312, %313 : vector<4x8x4xf32>
    %c2_i32_138 = arith.constant 2 : i32
    %315 = vector.broadcast %c2_i32_138 : i32 to vector<4x8x4xi32>
    %316 = arith.addi %12, %315 : vector<4x8x4xi32>
    %c1_i32_139 = arith.constant 1 : i32
    %317 = vector.broadcast %c1_i32_139 : i32 to vector<4x8x4xi32>
    %318 = arith.cmpi sge, %316, %317 : vector<4x8x4xi32>
    %c2_i32_140 = arith.constant 2 : i32
    %319 = vector.broadcast %c2_i32_140 : i32 to vector<4x8x4xi32>
    %320 = arith.addi %12, %319 : vector<4x8x4xi32>
    %c16_i32_141 = arith.constant 16 : i32
    %321 = vector.broadcast %c16_i32_141 : i32 to vector<4x8x4xi32>
    %322 = arith.cmpi sle, %320, %321 : vector<4x8x4xi32>
    %323 = arith.andi %318, %322 : vector<4x8x4xi1>
    %c2_i32_142 = arith.constant 2 : i32
    %324 = vector.broadcast %c2_i32_142 : i32 to vector<4x8x4xi32>
    %325 = arith.addi %14, %324 : vector<4x8x4xi32>
    %c1_i32_143 = arith.constant 1 : i32
    %326 = vector.broadcast %c1_i32_143 : i32 to vector<4x8x4xi32>
    %327 = arith.cmpi sge, %325, %326 : vector<4x8x4xi32>
    %328 = arith.andi %323, %327 : vector<4x8x4xi1>
    %c2_i32_144 = arith.constant 2 : i32
    %329 = vector.broadcast %c2_i32_144 : i32 to vector<4x8x4xi32>
    %330 = arith.addi %14, %329 : vector<4x8x4xi32>
    %c16_i32_145 = arith.constant 16 : i32
    %331 = vector.broadcast %c16_i32_145 : i32 to vector<4x8x4xi32>
    %332 = arith.cmpi sle, %330, %331 : vector<4x8x4xi32>
    %333 = arith.andi %328, %332 : vector<4x8x4xi1>
    %cst_146 = arith.constant 0.000000e+00 : f32
    %334 = vector.broadcast %cst_146 : f32 to vector<4x8x4xf32>
    %335 = arith.select %333, %314, %334 : vector<4x8x4xi1>, vector<4x8x4xf32>
    %336 = arith.truncf %335 : vector<4x8x4xf32> to vector<4x8x4xbf16>
    %337 = vector.shape_cast %336 : vector<4x8x4xbf16> to vector<32x4xbf16>
    %c8 = arith.constant 8 : index
    %c0_147 = arith.constant 0 : index
    %c0_148 = arith.constant 0 : index
    %338 = vector.load %arg3[%c8, %c0_147, %c0_148] : memref<9x4x8xbf16, #tpu.memory_space<vmem>>, vector<1x4x8xbf16>
    %339 = vector.shape_cast %338 : vector<1x4x8xbf16> to vector<4x8xbf16>
    %cst_149 = arith.constant dense<0.000000e+00> : vector<32x8xf32>
    %340 = tpu.matmul %337, %339, %cst_149 {dimension_numbers = #tpu.dot_dimension_numbers<[1], [0], [0], [1], [0, 0, 1, 1], [], []>} : vector<32x4xbf16>, vector<4x8xbf16>, vector<32x8xf32> -> vector<32x8xf32>
    %341 = arith.addf %305, %340 : vector<32x8xf32>
    %342 = vector.shape_cast %341 : vector<32x8xf32> to vector<4x8x8xf32>
    %343 = arith.truncf %342 : vector<4x8x8xf32> to vector<4x8x8xbf16>
    %c0_150 = arith.constant 0 : index
    %c0_151 = arith.constant 0 : index
    %c0_152 = arith.constant 0 : index
    %c0_153 = arith.constant 0 : index
    %344 = vector.load %arg6[%c0_150, %c0_151, %c0_152, %c0_153] : memref<1x4x8x8xbf16, #tpu.memory_space<vmem>>, vector<1x4x8x8xbf16>
    %345 = vector.shape_cast %344 : vector<1x4x8x8xbf16> to vector<4x8x8xbf16>
    %346 = vector.shape_cast %343 : vector<4x8x8xbf16> to vector<1x4x8x8xbf16>
    tpu.vector_store %arg6[%c0_150, %c0_151, %c0_152, %c0_153], %346 {strides = array<i32>} : memref<1x4x8x8xbf16, #tpu.memory_space<vmem>>, vector<1x4x8x8xbf16>,
    return
  }
  func.func @transform_0(%arg0: i32, %arg1: i32) -> (i32, i32, i32, i32) {
    %c0_i32 = arith.constant 0 : i32
    %c0_i32_0 = arith.constant 0 : i32
    %c0_i32_1 = arith.constant 0 : i32
    %c0_i32_2 = arith.constant 0 : i32
    return %arg0, %c0_i32, %c0_i32_0, %c0_i32_1 : i32, i32, i32, i32
  }
  func.func @transform_1(%arg0: i32, %arg1: i32) -> (i32, i32, i32) {
    %c0_i32 = arith.constant 0 : i32
    %c0_i32_0 = arith.constant 0 : i32
    %c0_i32_1 = arith.constant 0 : i32
    %c0_i32_2 = arith.constant 0 : i32
    return %c0_i32, %c0_i32_0, %c0_i32_1 : i32, i32, i32
  }
  func.func @transform_2(%arg0: i32, %arg1: i32) -> (i32, i32) {
    %c0_i32 = arith.constant 0 : i32
    %c0_i32_0 = arith.constant 0 : i32
    %c0_i32_1 = arith.constant 0 : i32
    return %c0_i32, %c0_i32_0 : i32, i32
  }
  func.func @transform_3(%arg0: i32, %arg1: i32) -> (i32, i32) {
    %c0_i32 = arith.constant 0 : i32
    %c0_i32_0 = arith.constant 0 : i32
    %c0_i32_1 = arith.constant 0 : i32
    return %c0_i32, %c0_i32_0 : i32, i32
  }
  func.func @transform_4(%arg0: i32, %arg1: i32) -> (i32, i32, i32, i32) {
    %c0_i32 = arith.constant 0 : i32
    %c0_i32_0 = arith.constant 0 : i32
    %c0_i32_1 = arith.constant 0 : i32
    return %arg0, %arg1, %c0_i32, %c0_i32_0 : i32, i32, i32, i32
  }
}

module attributes {stable_mosaic.version = 11 : i64} {
  func.func @body(%arg0: i32, %arg1: i32, %arg2: memref<1x10x10x8xbf16, #tpu.memory_space<vmem>>, %arg3: memref<1x10x10x8xf32, #tpu.memory_space<vmem>>, %arg4: memref<9x8x8xbf16, #tpu.memory_space<vmem>>, %arg5: memref<9x8x8xbf16, #tpu.memory_space<vmem>>, %arg6: memref<1x8xf32, #tpu.memory_space<vmem>>, %arg7: memref<1x8xf32, #tpu.memory_space<vmem>>, %arg8: memref<1x8xf32, #tpu.memory_space<vmem>>, %arg9: memref<1x8xf32, #tpu.memory_space<vmem>>, %arg10: memref<1x4x8x8xbf16, #tpu.memory_space<vmem>>) attributes {dimension_semantics = [#tpu.dimension_semantics<parallel>, #tpu.dimension_semantics<parallel>], iteration_bounds = array<i64: 2, 2>, scalar_prefetch = 0 : i64, scratch_operands = 0 : i64, tpu.core_type = #tpu.core_type<tc>, window_params = [{transform_indices = @transform_0, window_bounds = array<i64: 1, 10, 10, 8>}, {transform_indices = @transform_1, window_bounds = array<i64: 1, 10, 10, 8>}, {pipeline_mode = #tpu.pipeline_mode<synchronous>, transform_indices = @transform_2, window_bounds = array<i64: 9, 8, 8>}, {pipeline_mode = #tpu.pipeline_mode<synchronous>, transform_indices = @transform_3, window_bounds = array<i64: 9, 8, 8>}, {pipeline_mode = #tpu.pipeline_mode<synchronous>, transform_indices = @transform_4, window_bounds = array<i64: 1, 8>}, {pipeline_mode = #tpu.pipeline_mode<synchronous>, transform_indices = @transform_5, window_bounds = array<i64: 1, 8>}, {pipeline_mode = #tpu.pipeline_mode<synchronous>, transform_indices = @transform_6, window_bounds = array<i64: 1, 8>}, {pipeline_mode = #tpu.pipeline_mode<synchronous>, transform_indices = @transform_7, window_bounds = array<i64: 1, 8>}, {transform_indices = @transform_8, window_bounds = array<i64: 1, 4, 8, 8>}]} {
    %c4_i32 = arith.constant 4 : i32
    %0 = arith.muli %arg1, %c4_i32 : i32
    %cst = arith.constant 0.000000e+00 : f32
    %1 = vector.broadcast %cst : f32 to vector<32x8xf32>
    %c0 = arith.constant 0 : index
    %c0_0 = arith.constant 0 : index
    %2 = vector.load %arg6[%c0, %c0_0] : memref<1x8xf32, #tpu.memory_space<vmem>>, vector<1x8xf32>
    %3 = vector.shape_cast %2 : vector<1x8xf32> to vector<1x1x8xf32>
    %c0_1 = arith.constant 0 : index
    %c0_2 = arith.constant 0 : index
    %4 = vector.load %arg8[%c0_1, %c0_2] : memref<1x8xf32, #tpu.memory_space<vmem>>, vector<1x8xf32>
    %5 = vector.shape_cast %4 : vector<1x8xf32> to vector<1x1x8xf32>
    %6 = tpu.iota {dimensions = array<i32: 0>} : vector<4x8x8xi32>
    %7 = tpu.iota {dimensions = array<i32: 1>} : vector<4x8x8xi32>
    %c1_i32 = arith.constant 1 : i32
    %8 = arith.muli %c1_i32, %0 : i32
    %c1_i32_3 = arith.constant 1 : i32
    %9 = vector.broadcast %c1_i32_3 : i32 to vector<4x8x8xi32>
    %10 = arith.muli %9, %6 : vector<4x8x8xi32>
    %11 = vector.broadcast %8 : i32 to vector<4x8x8xi32>
    %12 = arith.addi %11, %10 : vector<4x8x8xi32>
    %c1_i32_4 = arith.constant 1 : i32
    %13 = vector.broadcast %c1_i32_4 : i32 to vector<4x8x8xi32>
    %14 = arith.muli %13, %7 : vector<4x8x8xi32>
    %c0_i32 = arith.constant 0 : i32
    %15 = arith.addi %0, %c0_i32 : i32
    %c0_5 = arith.constant 0 : index
    %16 = arith.index_cast %15 : i32 to index
    %c0_6 = arith.constant 0 : index
    %c0_7 = arith.constant 0 : index
    %17 = vector.load %arg2[%c0_5, %16, %c0_6, %c0_7] : memref<1x10x10x8xbf16, #tpu.memory_space<vmem>>, vector<1x4x8x8xbf16>
    %18 = vector.shape_cast %17 : vector<1x4x8x8xbf16> to vector<4x8x8xbf16>
    %19 = arith.extf %18 : vector<4x8x8xbf16> to vector<4x8x8xf32>
    %20 = vector.broadcast %3 : vector<1x1x8xf32> to vector<4x8x8xf32>
    %21 = arith.mulf %19, %20 : vector<4x8x8xf32>
    %22 = vector.broadcast %5 : vector<1x1x8xf32> to vector<4x8x8xf32>
    %23 = arith.addf %21, %22 : vector<4x8x8xf32>
    %cst_8 = arith.constant 0.000000e+00 : f32
    %24 = vector.broadcast %cst_8 : f32 to vector<4x8x8xf32>
    %25 = arith.maximumf %23, %24 : vector<4x8x8xf32>
    %c0_i32_9 = arith.constant 0 : i32
    %26 = vector.broadcast %c0_i32_9 : i32 to vector<4x8x8xi32>
    %27 = arith.addi %12, %26 : vector<4x8x8xi32>
    %c1_i32_10 = arith.constant 1 : i32
    %28 = vector.broadcast %c1_i32_10 : i32 to vector<4x8x8xi32>
    %29 = arith.cmpi sge, %27, %28 : vector<4x8x8xi32>
    %c0_i32_11 = arith.constant 0 : i32
    %30 = vector.broadcast %c0_i32_11 : i32 to vector<4x8x8xi32>
    %31 = arith.addi %12, %30 : vector<4x8x8xi32>
    %c8_i32 = arith.constant 8 : i32
    %32 = vector.broadcast %c8_i32 : i32 to vector<4x8x8xi32>
    %33 = arith.cmpi sle, %31, %32 : vector<4x8x8xi32>
    %34 = arith.andi %29, %33 : vector<4x8x8xi1>
    %c0_i32_12 = arith.constant 0 : i32
    %35 = vector.broadcast %c0_i32_12 : i32 to vector<4x8x8xi32>
    %36 = arith.addi %14, %35 : vector<4x8x8xi32>
    %c1_i32_13 = arith.constant 1 : i32
    %37 = vector.broadcast %c1_i32_13 : i32 to vector<4x8x8xi32>
    %38 = arith.cmpi sge, %36, %37 : vector<4x8x8xi32>
    %39 = arith.andi %34, %38 : vector<4x8x8xi1>
    %c0_i32_14 = arith.constant 0 : i32
    %40 = vector.broadcast %c0_i32_14 : i32 to vector<4x8x8xi32>
    %41 = arith.addi %14, %40 : vector<4x8x8xi32>
    %c8_i32_15 = arith.constant 8 : i32
    %42 = vector.broadcast %c8_i32_15 : i32 to vector<4x8x8xi32>
    %43 = arith.cmpi sle, %41, %42 : vector<4x8x8xi32>
    %44 = arith.andi %39, %43 : vector<4x8x8xi1>
    %cst_16 = arith.constant 0.000000e+00 : f32
    %45 = vector.broadcast %cst_16 : f32 to vector<4x8x8xf32>
    %46 = arith.select %44, %25, %45 : vector<4x8x8xi1>, vector<4x8x8xf32>
    %47 = arith.truncf %46 : vector<4x8x8xf32> to vector<4x8x8xbf16>
    %48 = vector.shape_cast %47 : vector<4x8x8xbf16> to vector<32x8xbf16>
    %c0_17 = arith.constant 0 : index
    %c0_18 = arith.constant 0 : index
    %c0_19 = arith.constant 0 : index
    %49 = vector.load %arg4[%c0_17, %c0_18, %c0_19] : memref<9x8x8xbf16, #tpu.memory_space<vmem>>, vector<1x8x8xbf16>
    %50 = vector.shape_cast %49 : vector<1x8x8xbf16> to vector<8x8xbf16>
    %cst_20 = arith.constant dense<0.000000e+00> : vector<32x8xf32>
    %51 = tpu.matmul %48, %50, %cst_20 {dimension_numbers = #tpu.dot_dimension_numbers<[1], [0], [0], [1], [0, 0, 1, 1], [], []>} : vector<32x8xbf16>, vector<8x8xbf16>, vector<32x8xf32> -> vector<32x8xf32>
    %52 = arith.addf %1, %51 : vector<32x8xf32>
    %c0_21 = arith.constant 0 : index
    %53 = arith.index_cast %15 : i32 to index
    %c1 = arith.constant 1 : index
    %c0_22 = arith.constant 0 : index
    %54 = vector.load %arg2[%c0_21, %53, %c1, %c0_22] : memref<1x10x10x8xbf16, #tpu.memory_space<vmem>>, vector<1x4x8x8xbf16>
    %55 = vector.shape_cast %54 : vector<1x4x8x8xbf16> to vector<4x8x8xbf16>
    %56 = arith.extf %55 : vector<4x8x8xbf16> to vector<4x8x8xf32>
    %57 = vector.broadcast %3 : vector<1x1x8xf32> to vector<4x8x8xf32>
    %58 = arith.mulf %56, %57 : vector<4x8x8xf32>
    %59 = vector.broadcast %5 : vector<1x1x8xf32> to vector<4x8x8xf32>
    %60 = arith.addf %58, %59 : vector<4x8x8xf32>
    %cst_23 = arith.constant 0.000000e+00 : f32
    %61 = vector.broadcast %cst_23 : f32 to vector<4x8x8xf32>
    %62 = arith.maximumf %60, %61 : vector<4x8x8xf32>
    %c0_i32_24 = arith.constant 0 : i32
    %63 = vector.broadcast %c0_i32_24 : i32 to vector<4x8x8xi32>
    %64 = arith.addi %12, %63 : vector<4x8x8xi32>
    %c1_i32_25 = arith.constant 1 : i32
    %65 = vector.broadcast %c1_i32_25 : i32 to vector<4x8x8xi32>
    %66 = arith.cmpi sge, %64, %65 : vector<4x8x8xi32>
    %c0_i32_26 = arith.constant 0 : i32
    %67 = vector.broadcast %c0_i32_26 : i32 to vector<4x8x8xi32>
    %68 = arith.addi %12, %67 : vector<4x8x8xi32>
    %c8_i32_27 = arith.constant 8 : i32
    %69 = vector.broadcast %c8_i32_27 : i32 to vector<4x8x8xi32>
    %70 = arith.cmpi sle, %68, %69 : vector<4x8x8xi32>
    %71 = arith.andi %66, %70 : vector<4x8x8xi1>
    %c1_i32_28 = arith.constant 1 : i32
    %72 = vector.broadcast %c1_i32_28 : i32 to vector<4x8x8xi32>
    %73 = arith.addi %14, %72 : vector<4x8x8xi32>
    %c1_i32_29 = arith.constant 1 : i32
    %74 = vector.broadcast %c1_i32_29 : i32 to vector<4x8x8xi32>
    %75 = arith.cmpi sge, %73, %74 : vector<4x8x8xi32>
    %76 = arith.andi %71, %75 : vector<4x8x8xi1>
    %c1_i32_30 = arith.constant 1 : i32
    %77 = vector.broadcast %c1_i32_30 : i32 to vector<4x8x8xi32>
    %78 = arith.addi %14, %77 : vector<4x8x8xi32>
    %c8_i32_31 = arith.constant 8 : i32
    %79 = vector.broadcast %c8_i32_31 : i32 to vector<4x8x8xi32>
    %80 = arith.cmpi sle, %78, %79 : vector<4x8x8xi32>
    %81 = arith.andi %76, %80 : vector<4x8x8xi1>
    %cst_32 = arith.constant 0.000000e+00 : f32
    %82 = vector.broadcast %cst_32 : f32 to vector<4x8x8xf32>
    %83 = arith.select %81, %62, %82 : vector<4x8x8xi1>, vector<4x8x8xf32>
    %84 = arith.truncf %83 : vector<4x8x8xf32> to vector<4x8x8xbf16>
    %85 = vector.shape_cast %84 : vector<4x8x8xbf16> to vector<32x8xbf16>
    %c1_33 = arith.constant 1 : index
    %c0_34 = arith.constant 0 : index
    %c0_35 = arith.constant 0 : index
    %86 = vector.load %arg4[%c1_33, %c0_34, %c0_35] : memref<9x8x8xbf16, #tpu.memory_space<vmem>>, vector<1x8x8xbf16>
    %87 = vector.shape_cast %86 : vector<1x8x8xbf16> to vector<8x8xbf16>
    %cst_36 = arith.constant dense<0.000000e+00> : vector<32x8xf32>
    %88 = tpu.matmul %85, %87, %cst_36 {dimension_numbers = #tpu.dot_dimension_numbers<[1], [0], [0], [1], [0, 0, 1, 1], [], []>} : vector<32x8xbf16>, vector<8x8xbf16>, vector<32x8xf32> -> vector<32x8xf32>
    %89 = arith.addf %52, %88 : vector<32x8xf32>
    %c0_37 = arith.constant 0 : index
    %90 = arith.index_cast %15 : i32 to index
    %c2 = arith.constant 2 : index
    %c0_38 = arith.constant 0 : index
    %91 = vector.load %arg2[%c0_37, %90, %c2, %c0_38] : memref<1x10x10x8xbf16, #tpu.memory_space<vmem>>, vector<1x4x8x8xbf16>
    %92 = vector.shape_cast %91 : vector<1x4x8x8xbf16> to vector<4x8x8xbf16>
    %93 = arith.extf %92 : vector<4x8x8xbf16> to vector<4x8x8xf32>
    %94 = vector.broadcast %3 : vector<1x1x8xf32> to vector<4x8x8xf32>
    %95 = arith.mulf %93, %94 : vector<4x8x8xf32>
    %96 = vector.broadcast %5 : vector<1x1x8xf32> to vector<4x8x8xf32>
    %97 = arith.addf %95, %96 : vector<4x8x8xf32>
    %cst_39 = arith.constant 0.000000e+00 : f32
    %98 = vector.broadcast %cst_39 : f32 to vector<4x8x8xf32>
    %99 = arith.maximumf %97, %98 : vector<4x8x8xf32>
    %c0_i32_40 = arith.constant 0 : i32
    %100 = vector.broadcast %c0_i32_40 : i32 to vector<4x8x8xi32>
    %101 = arith.addi %12, %100 : vector<4x8x8xi32>
    %c1_i32_41 = arith.constant 1 : i32
    %102 = vector.broadcast %c1_i32_41 : i32 to vector<4x8x8xi32>
    %103 = arith.cmpi sge, %101, %102 : vector<4x8x8xi32>
    %c0_i32_42 = arith.constant 0 : i32
    %104 = vector.broadcast %c0_i32_42 : i32 to vector<4x8x8xi32>
    %105 = arith.addi %12, %104 : vector<4x8x8xi32>
    %c8_i32_43 = arith.constant 8 : i32
    %106 = vector.broadcast %c8_i32_43 : i32 to vector<4x8x8xi32>
    %107 = arith.cmpi sle, %105, %106 : vector<4x8x8xi32>
    %108 = arith.andi %103, %107 : vector<4x8x8xi1>
    %c2_i32 = arith.constant 2 : i32
    %109 = vector.broadcast %c2_i32 : i32 to vector<4x8x8xi32>
    %110 = arith.addi %14, %109 : vector<4x8x8xi32>
    %c1_i32_44 = arith.constant 1 : i32
    %111 = vector.broadcast %c1_i32_44 : i32 to vector<4x8x8xi32>
    %112 = arith.cmpi sge, %110, %111 : vector<4x8x8xi32>
    %113 = arith.andi %108, %112 : vector<4x8x8xi1>
    %c2_i32_45 = arith.constant 2 : i32
    %114 = vector.broadcast %c2_i32_45 : i32 to vector<4x8x8xi32>
    %115 = arith.addi %14, %114 : vector<4x8x8xi32>
    %c8_i32_46 = arith.constant 8 : i32
    %116 = vector.broadcast %c8_i32_46 : i32 to vector<4x8x8xi32>
    %117 = arith.cmpi sle, %115, %116 : vector<4x8x8xi32>
    %118 = arith.andi %113, %117 : vector<4x8x8xi1>
    %cst_47 = arith.constant 0.000000e+00 : f32
    %119 = vector.broadcast %cst_47 : f32 to vector<4x8x8xf32>
    %120 = arith.select %118, %99, %119 : vector<4x8x8xi1>, vector<4x8x8xf32>
    %121 = arith.truncf %120 : vector<4x8x8xf32> to vector<4x8x8xbf16>
    %122 = vector.shape_cast %121 : vector<4x8x8xbf16> to vector<32x8xbf16>
    %c2_48 = arith.constant 2 : index
    %c0_49 = arith.constant 0 : index
    %c0_50 = arith.constant 0 : index
    %123 = vector.load %arg4[%c2_48, %c0_49, %c0_50] : memref<9x8x8xbf16, #tpu.memory_space<vmem>>, vector<1x8x8xbf16>
    %124 = vector.shape_cast %123 : vector<1x8x8xbf16> to vector<8x8xbf16>
    %cst_51 = arith.constant dense<0.000000e+00> : vector<32x8xf32>
    %125 = tpu.matmul %122, %124, %cst_51 {dimension_numbers = #tpu.dot_dimension_numbers<[1], [0], [0], [1], [0, 0, 1, 1], [], []>} : vector<32x8xbf16>, vector<8x8xbf16>, vector<32x8xf32> -> vector<32x8xf32>
    %126 = arith.addf %89, %125 : vector<32x8xf32>
    %c1_i32_52 = arith.constant 1 : i32
    %127 = arith.addi %0, %c1_i32_52 : i32
    %c0_53 = arith.constant 0 : index
    %128 = arith.index_cast %127 : i32 to index
    %c0_54 = arith.constant 0 : index
    %c0_55 = arith.constant 0 : index
    %129 = vector.load %arg2[%c0_53, %128, %c0_54, %c0_55] : memref<1x10x10x8xbf16, #tpu.memory_space<vmem>>, vector<1x4x8x8xbf16>
    %130 = vector.shape_cast %129 : vector<1x4x8x8xbf16> to vector<4x8x8xbf16>
    %131 = arith.extf %130 : vector<4x8x8xbf16> to vector<4x8x8xf32>
    %132 = vector.broadcast %3 : vector<1x1x8xf32> to vector<4x8x8xf32>
    %133 = arith.mulf %131, %132 : vector<4x8x8xf32>
    %134 = vector.broadcast %5 : vector<1x1x8xf32> to vector<4x8x8xf32>
    %135 = arith.addf %133, %134 : vector<4x8x8xf32>
    %cst_56 = arith.constant 0.000000e+00 : f32
    %136 = vector.broadcast %cst_56 : f32 to vector<4x8x8xf32>
    %137 = arith.maximumf %135, %136 : vector<4x8x8xf32>
    %c1_i32_57 = arith.constant 1 : i32
    %138 = vector.broadcast %c1_i32_57 : i32 to vector<4x8x8xi32>
    %139 = arith.addi %12, %138 : vector<4x8x8xi32>
    %c1_i32_58 = arith.constant 1 : i32
    %140 = vector.broadcast %c1_i32_58 : i32 to vector<4x8x8xi32>
    %141 = arith.cmpi sge, %139, %140 : vector<4x8x8xi32>
    %c1_i32_59 = arith.constant 1 : i32
    %142 = vector.broadcast %c1_i32_59 : i32 to vector<4x8x8xi32>
    %143 = arith.addi %12, %142 : vector<4x8x8xi32>
    %c8_i32_60 = arith.constant 8 : i32
    %144 = vector.broadcast %c8_i32_60 : i32 to vector<4x8x8xi32>
    %145 = arith.cmpi sle, %143, %144 : vector<4x8x8xi32>
    %146 = arith.andi %141, %145 : vector<4x8x8xi1>
    %c0_i32_61 = arith.constant 0 : i32
    %147 = vector.broadcast %c0_i32_61 : i32 to vector<4x8x8xi32>
    %148 = arith.addi %14, %147 : vector<4x8x8xi32>
    %c1_i32_62 = arith.constant 1 : i32
    %149 = vector.broadcast %c1_i32_62 : i32 to vector<4x8x8xi32>
    %150 = arith.cmpi sge, %148, %149 : vector<4x8x8xi32>
    %151 = arith.andi %146, %150 : vector<4x8x8xi1>
    %c0_i32_63 = arith.constant 0 : i32
    %152 = vector.broadcast %c0_i32_63 : i32 to vector<4x8x8xi32>
    %153 = arith.addi %14, %152 : vector<4x8x8xi32>
    %c8_i32_64 = arith.constant 8 : i32
    %154 = vector.broadcast %c8_i32_64 : i32 to vector<4x8x8xi32>
    %155 = arith.cmpi sle, %153, %154 : vector<4x8x8xi32>
    %156 = arith.andi %151, %155 : vector<4x8x8xi1>
    %cst_65 = arith.constant 0.000000e+00 : f32
    %157 = vector.broadcast %cst_65 : f32 to vector<4x8x8xf32>
    %158 = arith.select %156, %137, %157 : vector<4x8x8xi1>, vector<4x8x8xf32>
    %159 = arith.truncf %158 : vector<4x8x8xf32> to vector<4x8x8xbf16>
    %160 = vector.shape_cast %159 : vector<4x8x8xbf16> to vector<32x8xbf16>
    %c3 = arith.constant 3 : index
    %c0_66 = arith.constant 0 : index
    %c0_67 = arith.constant 0 : index
    %161 = vector.load %arg4[%c3, %c0_66, %c0_67] : memref<9x8x8xbf16, #tpu.memory_space<vmem>>, vector<1x8x8xbf16>
    %162 = vector.shape_cast %161 : vector<1x8x8xbf16> to vector<8x8xbf16>
    %cst_68 = arith.constant dense<0.000000e+00> : vector<32x8xf32>
    %163 = tpu.matmul %160, %162, %cst_68 {dimension_numbers = #tpu.dot_dimension_numbers<[1], [0], [0], [1], [0, 0, 1, 1], [], []>} : vector<32x8xbf16>, vector<8x8xbf16>, vector<32x8xf32> -> vector<32x8xf32>
    %164 = arith.addf %126, %163 : vector<32x8xf32>
    %c0_69 = arith.constant 0 : index
    %165 = arith.index_cast %127 : i32 to index
    %c1_70 = arith.constant 1 : index
    %c0_71 = arith.constant 0 : index
    %166 = vector.load %arg2[%c0_69, %165, %c1_70, %c0_71] : memref<1x10x10x8xbf16, #tpu.memory_space<vmem>>, vector<1x4x8x8xbf16>
    %167 = vector.shape_cast %166 : vector<1x4x8x8xbf16> to vector<4x8x8xbf16>
    %168 = arith.extf %167 : vector<4x8x8xbf16> to vector<4x8x8xf32>
    %169 = vector.broadcast %3 : vector<1x1x8xf32> to vector<4x8x8xf32>
    %170 = arith.mulf %168, %169 : vector<4x8x8xf32>
    %171 = vector.broadcast %5 : vector<1x1x8xf32> to vector<4x8x8xf32>
    %172 = arith.addf %170, %171 : vector<4x8x8xf32>
    %cst_72 = arith.constant 0.000000e+00 : f32
    %173 = vector.broadcast %cst_72 : f32 to vector<4x8x8xf32>
    %174 = arith.maximumf %172, %173 : vector<4x8x8xf32>
    %c1_i32_73 = arith.constant 1 : i32
    %175 = vector.broadcast %c1_i32_73 : i32 to vector<4x8x8xi32>
    %176 = arith.addi %12, %175 : vector<4x8x8xi32>
    %c1_i32_74 = arith.constant 1 : i32
    %177 = vector.broadcast %c1_i32_74 : i32 to vector<4x8x8xi32>
    %178 = arith.cmpi sge, %176, %177 : vector<4x8x8xi32>
    %c1_i32_75 = arith.constant 1 : i32
    %179 = vector.broadcast %c1_i32_75 : i32 to vector<4x8x8xi32>
    %180 = arith.addi %12, %179 : vector<4x8x8xi32>
    %c8_i32_76 = arith.constant 8 : i32
    %181 = vector.broadcast %c8_i32_76 : i32 to vector<4x8x8xi32>
    %182 = arith.cmpi sle, %180, %181 : vector<4x8x8xi32>
    %183 = arith.andi %178, %182 : vector<4x8x8xi1>
    %c1_i32_77 = arith.constant 1 : i32
    %184 = vector.broadcast %c1_i32_77 : i32 to vector<4x8x8xi32>
    %185 = arith.addi %14, %184 : vector<4x8x8xi32>
    %c1_i32_78 = arith.constant 1 : i32
    %186 = vector.broadcast %c1_i32_78 : i32 to vector<4x8x8xi32>
    %187 = arith.cmpi sge, %185, %186 : vector<4x8x8xi32>
    %188 = arith.andi %183, %187 : vector<4x8x8xi1>
    %c1_i32_79 = arith.constant 1 : i32
    %189 = vector.broadcast %c1_i32_79 : i32 to vector<4x8x8xi32>
    %190 = arith.addi %14, %189 : vector<4x8x8xi32>
    %c8_i32_80 = arith.constant 8 : i32
    %191 = vector.broadcast %c8_i32_80 : i32 to vector<4x8x8xi32>
    %192 = arith.cmpi sle, %190, %191 : vector<4x8x8xi32>
    %193 = arith.andi %188, %192 : vector<4x8x8xi1>
    %cst_81 = arith.constant 0.000000e+00 : f32
    %194 = vector.broadcast %cst_81 : f32 to vector<4x8x8xf32>
    %195 = arith.select %193, %174, %194 : vector<4x8x8xi1>, vector<4x8x8xf32>
    %196 = arith.truncf %195 : vector<4x8x8xf32> to vector<4x8x8xbf16>
    %197 = vector.shape_cast %196 : vector<4x8x8xbf16> to vector<32x8xbf16>
    %c4 = arith.constant 4 : index
    %c0_82 = arith.constant 0 : index
    %c0_83 = arith.constant 0 : index
    %198 = vector.load %arg4[%c4, %c0_82, %c0_83] : memref<9x8x8xbf16, #tpu.memory_space<vmem>>, vector<1x8x8xbf16>
    %199 = vector.shape_cast %198 : vector<1x8x8xbf16> to vector<8x8xbf16>
    %cst_84 = arith.constant dense<0.000000e+00> : vector<32x8xf32>
    %200 = tpu.matmul %197, %199, %cst_84 {dimension_numbers = #tpu.dot_dimension_numbers<[1], [0], [0], [1], [0, 0, 1, 1], [], []>} : vector<32x8xbf16>, vector<8x8xbf16>, vector<32x8xf32> -> vector<32x8xf32>
    %201 = arith.addf %164, %200 : vector<32x8xf32>
    %c0_85 = arith.constant 0 : index
    %202 = arith.index_cast %127 : i32 to index
    %c2_86 = arith.constant 2 : index
    %c0_87 = arith.constant 0 : index
    %203 = vector.load %arg2[%c0_85, %202, %c2_86, %c0_87] : memref<1x10x10x8xbf16, #tpu.memory_space<vmem>>, vector<1x4x8x8xbf16>
    %204 = vector.shape_cast %203 : vector<1x4x8x8xbf16> to vector<4x8x8xbf16>
    %205 = arith.extf %204 : vector<4x8x8xbf16> to vector<4x8x8xf32>
    %206 = vector.broadcast %3 : vector<1x1x8xf32> to vector<4x8x8xf32>
    %207 = arith.mulf %205, %206 : vector<4x8x8xf32>
    %208 = vector.broadcast %5 : vector<1x1x8xf32> to vector<4x8x8xf32>
    %209 = arith.addf %207, %208 : vector<4x8x8xf32>
    %cst_88 = arith.constant 0.000000e+00 : f32
    %210 = vector.broadcast %cst_88 : f32 to vector<4x8x8xf32>
    %211 = arith.maximumf %209, %210 : vector<4x8x8xf32>
    %c1_i32_89 = arith.constant 1 : i32
    %212 = vector.broadcast %c1_i32_89 : i32 to vector<4x8x8xi32>
    %213 = arith.addi %12, %212 : vector<4x8x8xi32>
    %c1_i32_90 = arith.constant 1 : i32
    %214 = vector.broadcast %c1_i32_90 : i32 to vector<4x8x8xi32>
    %215 = arith.cmpi sge, %213, %214 : vector<4x8x8xi32>
    %c1_i32_91 = arith.constant 1 : i32
    %216 = vector.broadcast %c1_i32_91 : i32 to vector<4x8x8xi32>
    %217 = arith.addi %12, %216 : vector<4x8x8xi32>
    %c8_i32_92 = arith.constant 8 : i32
    %218 = vector.broadcast %c8_i32_92 : i32 to vector<4x8x8xi32>
    %219 = arith.cmpi sle, %217, %218 : vector<4x8x8xi32>
    %220 = arith.andi %215, %219 : vector<4x8x8xi1>
    %c2_i32_93 = arith.constant 2 : i32
    %221 = vector.broadcast %c2_i32_93 : i32 to vector<4x8x8xi32>
    %222 = arith.addi %14, %221 : vector<4x8x8xi32>
    %c1_i32_94 = arith.constant 1 : i32
    %223 = vector.broadcast %c1_i32_94 : i32 to vector<4x8x8xi32>
    %224 = arith.cmpi sge, %222, %223 : vector<4x8x8xi32>
    %225 = arith.andi %220, %224 : vector<4x8x8xi1>
    %c2_i32_95 = arith.constant 2 : i32
    %226 = vector.broadcast %c2_i32_95 : i32 to vector<4x8x8xi32>
    %227 = arith.addi %14, %226 : vector<4x8x8xi32>
    %c8_i32_96 = arith.constant 8 : i32
    %228 = vector.broadcast %c8_i32_96 : i32 to vector<4x8x8xi32>
    %229 = arith.cmpi sle, %227, %228 : vector<4x8x8xi32>
    %230 = arith.andi %225, %229 : vector<4x8x8xi1>
    %cst_97 = arith.constant 0.000000e+00 : f32
    %231 = vector.broadcast %cst_97 : f32 to vector<4x8x8xf32>
    %232 = arith.select %230, %211, %231 : vector<4x8x8xi1>, vector<4x8x8xf32>
    %233 = arith.truncf %232 : vector<4x8x8xf32> to vector<4x8x8xbf16>
    %234 = vector.shape_cast %233 : vector<4x8x8xbf16> to vector<32x8xbf16>
    %c5 = arith.constant 5 : index
    %c0_98 = arith.constant 0 : index
    %c0_99 = arith.constant 0 : index
    %235 = vector.load %arg4[%c5, %c0_98, %c0_99] : memref<9x8x8xbf16, #tpu.memory_space<vmem>>, vector<1x8x8xbf16>
    %236 = vector.shape_cast %235 : vector<1x8x8xbf16> to vector<8x8xbf16>
    %cst_100 = arith.constant dense<0.000000e+00> : vector<32x8xf32>
    %237 = tpu.matmul %234, %236, %cst_100 {dimension_numbers = #tpu.dot_dimension_numbers<[1], [0], [0], [1], [0, 0, 1, 1], [], []>} : vector<32x8xbf16>, vector<8x8xbf16>, vector<32x8xf32> -> vector<32x8xf32>
    %238 = arith.addf %201, %237 : vector<32x8xf32>
    %c2_i32_101 = arith.constant 2 : i32
    %239 = arith.addi %0, %c2_i32_101 : i32
    %c0_102 = arith.constant 0 : index
    %240 = arith.index_cast %239 : i32 to index
    %c0_103 = arith.constant 0 : index
    %c0_104 = arith.constant 0 : index
    %241 = vector.load %arg2[%c0_102, %240, %c0_103, %c0_104] : memref<1x10x10x8xbf16, #tpu.memory_space<vmem>>, vector<1x4x8x8xbf16>
    %242 = vector.shape_cast %241 : vector<1x4x8x8xbf16> to vector<4x8x8xbf16>
    %243 = arith.extf %242 : vector<4x8x8xbf16> to vector<4x8x8xf32>
    %244 = vector.broadcast %3 : vector<1x1x8xf32> to vector<4x8x8xf32>
    %245 = arith.mulf %243, %244 : vector<4x8x8xf32>
    %246 = vector.broadcast %5 : vector<1x1x8xf32> to vector<4x8x8xf32>
    %247 = arith.addf %245, %246 : vector<4x8x8xf32>
    %cst_105 = arith.constant 0.000000e+00 : f32
    %248 = vector.broadcast %cst_105 : f32 to vector<4x8x8xf32>
    %249 = arith.maximumf %247, %248 : vector<4x8x8xf32>
    %c2_i32_106 = arith.constant 2 : i32
    %250 = vector.broadcast %c2_i32_106 : i32 to vector<4x8x8xi32>
    %251 = arith.addi %12, %250 : vector<4x8x8xi32>
    %c1_i32_107 = arith.constant 1 : i32
    %252 = vector.broadcast %c1_i32_107 : i32 to vector<4x8x8xi32>
    %253 = arith.cmpi sge, %251, %252 : vector<4x8x8xi32>
    %c2_i32_108 = arith.constant 2 : i32
    %254 = vector.broadcast %c2_i32_108 : i32 to vector<4x8x8xi32>
    %255 = arith.addi %12, %254 : vector<4x8x8xi32>
    %c8_i32_109 = arith.constant 8 : i32
    %256 = vector.broadcast %c8_i32_109 : i32 to vector<4x8x8xi32>
    %257 = arith.cmpi sle, %255, %256 : vector<4x8x8xi32>
    %258 = arith.andi %253, %257 : vector<4x8x8xi1>
    %c0_i32_110 = arith.constant 0 : i32
    %259 = vector.broadcast %c0_i32_110 : i32 to vector<4x8x8xi32>
    %260 = arith.addi %14, %259 : vector<4x8x8xi32>
    %c1_i32_111 = arith.constant 1 : i32
    %261 = vector.broadcast %c1_i32_111 : i32 to vector<4x8x8xi32>
    %262 = arith.cmpi sge, %260, %261 : vector<4x8x8xi32>
    %263 = arith.andi %258, %262 : vector<4x8x8xi1>
    %c0_i32_112 = arith.constant 0 : i32
    %264 = vector.broadcast %c0_i32_112 : i32 to vector<4x8x8xi32>
    %265 = arith.addi %14, %264 : vector<4x8x8xi32>
    %c8_i32_113 = arith.constant 8 : i32
    %266 = vector.broadcast %c8_i32_113 : i32 to vector<4x8x8xi32>
    %267 = arith.cmpi sle, %265, %266 : vector<4x8x8xi32>
    %268 = arith.andi %263, %267 : vector<4x8x8xi1>
    %cst_114 = arith.constant 0.000000e+00 : f32
    %269 = vector.broadcast %cst_114 : f32 to vector<4x8x8xf32>
    %270 = arith.select %268, %249, %269 : vector<4x8x8xi1>, vector<4x8x8xf32>
    %271 = arith.truncf %270 : vector<4x8x8xf32> to vector<4x8x8xbf16>
    %272 = vector.shape_cast %271 : vector<4x8x8xbf16> to vector<32x8xbf16>
    %c6 = arith.constant 6 : index
    %c0_115 = arith.constant 0 : index
    %c0_116 = arith.constant 0 : index
    %273 = vector.load %arg4[%c6, %c0_115, %c0_116] : memref<9x8x8xbf16, #tpu.memory_space<vmem>>, vector<1x8x8xbf16>
    %274 = vector.shape_cast %273 : vector<1x8x8xbf16> to vector<8x8xbf16>
    %cst_117 = arith.constant dense<0.000000e+00> : vector<32x8xf32>
    %275 = tpu.matmul %272, %274, %cst_117 {dimension_numbers = #tpu.dot_dimension_numbers<[1], [0], [0], [1], [0, 0, 1, 1], [], []>} : vector<32x8xbf16>, vector<8x8xbf16>, vector<32x8xf32> -> vector<32x8xf32>
    %276 = arith.addf %238, %275 : vector<32x8xf32>
    %c0_118 = arith.constant 0 : index
    %277 = arith.index_cast %239 : i32 to index
    %c1_119 = arith.constant 1 : index
    %c0_120 = arith.constant 0 : index
    %278 = vector.load %arg2[%c0_118, %277, %c1_119, %c0_120] : memref<1x10x10x8xbf16, #tpu.memory_space<vmem>>, vector<1x4x8x8xbf16>
    %279 = vector.shape_cast %278 : vector<1x4x8x8xbf16> to vector<4x8x8xbf16>
    %280 = arith.extf %279 : vector<4x8x8xbf16> to vector<4x8x8xf32>
    %281 = vector.broadcast %3 : vector<1x1x8xf32> to vector<4x8x8xf32>
    %282 = arith.mulf %280, %281 : vector<4x8x8xf32>
    %283 = vector.broadcast %5 : vector<1x1x8xf32> to vector<4x8x8xf32>
    %284 = arith.addf %282, %283 : vector<4x8x8xf32>
    %cst_121 = arith.constant 0.000000e+00 : f32
    %285 = vector.broadcast %cst_121 : f32 to vector<4x8x8xf32>
    %286 = arith.maximumf %284, %285 : vector<4x8x8xf32>
    %c2_i32_122 = arith.constant 2 : i32
    %287 = vector.broadcast %c2_i32_122 : i32 to vector<4x8x8xi32>
    %288 = arith.addi %12, %287 : vector<4x8x8xi32>
    %c1_i32_123 = arith.constant 1 : i32
    %289 = vector.broadcast %c1_i32_123 : i32 to vector<4x8x8xi32>
    %290 = arith.cmpi sge, %288, %289 : vector<4x8x8xi32>
    %c2_i32_124 = arith.constant 2 : i32
    %291 = vector.broadcast %c2_i32_124 : i32 to vector<4x8x8xi32>
    %292 = arith.addi %12, %291 : vector<4x8x8xi32>
    %c8_i32_125 = arith.constant 8 : i32
    %293 = vector.broadcast %c8_i32_125 : i32 to vector<4x8x8xi32>
    %294 = arith.cmpi sle, %292, %293 : vector<4x8x8xi32>
    %295 = arith.andi %290, %294 : vector<4x8x8xi1>
    %c1_i32_126 = arith.constant 1 : i32
    %296 = vector.broadcast %c1_i32_126 : i32 to vector<4x8x8xi32>
    %297 = arith.addi %14, %296 : vector<4x8x8xi32>
    %c1_i32_127 = arith.constant 1 : i32
    %298 = vector.broadcast %c1_i32_127 : i32 to vector<4x8x8xi32>
    %299 = arith.cmpi sge, %297, %298 : vector<4x8x8xi32>
    %300 = arith.andi %295, %299 : vector<4x8x8xi1>
    %c1_i32_128 = arith.constant 1 : i32
    %301 = vector.broadcast %c1_i32_128 : i32 to vector<4x8x8xi32>
    %302 = arith.addi %14, %301 : vector<4x8x8xi32>
    %c8_i32_129 = arith.constant 8 : i32
    %303 = vector.broadcast %c8_i32_129 : i32 to vector<4x8x8xi32>
    %304 = arith.cmpi sle, %302, %303 : vector<4x8x8xi32>
    %305 = arith.andi %300, %304 : vector<4x8x8xi1>
    %cst_130 = arith.constant 0.000000e+00 : f32
    %306 = vector.broadcast %cst_130 : f32 to vector<4x8x8xf32>
    %307 = arith.select %305, %286, %306 : vector<4x8x8xi1>, vector<4x8x8xf32>
    %308 = arith.truncf %307 : vector<4x8x8xf32> to vector<4x8x8xbf16>
    %309 = vector.shape_cast %308 : vector<4x8x8xbf16> to vector<32x8xbf16>
    %c7 = arith.constant 7 : index
    %c0_131 = arith.constant 0 : index
    %c0_132 = arith.constant 0 : index
    %310 = vector.load %arg4[%c7, %c0_131, %c0_132] : memref<9x8x8xbf16, #tpu.memory_space<vmem>>, vector<1x8x8xbf16>
    %311 = vector.shape_cast %310 : vector<1x8x8xbf16> to vector<8x8xbf16>
    %cst_133 = arith.constant dense<0.000000e+00> : vector<32x8xf32>
    %312 = tpu.matmul %309, %311, %cst_133 {dimension_numbers = #tpu.dot_dimension_numbers<[1], [0], [0], [1], [0, 0, 1, 1], [], []>} : vector<32x8xbf16>, vector<8x8xbf16>, vector<32x8xf32> -> vector<32x8xf32>
    %313 = arith.addf %276, %312 : vector<32x8xf32>
    %c0_134 = arith.constant 0 : index
    %314 = arith.index_cast %239 : i32 to index
    %c2_135 = arith.constant 2 : index
    %c0_136 = arith.constant 0 : index
    %315 = vector.load %arg2[%c0_134, %314, %c2_135, %c0_136] : memref<1x10x10x8xbf16, #tpu.memory_space<vmem>>, vector<1x4x8x8xbf16>
    %316 = vector.shape_cast %315 : vector<1x4x8x8xbf16> to vector<4x8x8xbf16>
    %317 = arith.extf %316 : vector<4x8x8xbf16> to vector<4x8x8xf32>
    %318 = vector.broadcast %3 : vector<1x1x8xf32> to vector<4x8x8xf32>
    %319 = arith.mulf %317, %318 : vector<4x8x8xf32>
    %320 = vector.broadcast %5 : vector<1x1x8xf32> to vector<4x8x8xf32>
    %321 = arith.addf %319, %320 : vector<4x8x8xf32>
    %cst_137 = arith.constant 0.000000e+00 : f32
    %322 = vector.broadcast %cst_137 : f32 to vector<4x8x8xf32>
    %323 = arith.maximumf %321, %322 : vector<4x8x8xf32>
    %c2_i32_138 = arith.constant 2 : i32
    %324 = vector.broadcast %c2_i32_138 : i32 to vector<4x8x8xi32>
    %325 = arith.addi %12, %324 : vector<4x8x8xi32>
    %c1_i32_139 = arith.constant 1 : i32
    %326 = vector.broadcast %c1_i32_139 : i32 to vector<4x8x8xi32>
    %327 = arith.cmpi sge, %325, %326 : vector<4x8x8xi32>
    %c2_i32_140 = arith.constant 2 : i32
    %328 = vector.broadcast %c2_i32_140 : i32 to vector<4x8x8xi32>
    %329 = arith.addi %12, %328 : vector<4x8x8xi32>
    %c8_i32_141 = arith.constant 8 : i32
    %330 = vector.broadcast %c8_i32_141 : i32 to vector<4x8x8xi32>
    %331 = arith.cmpi sle, %329, %330 : vector<4x8x8xi32>
    %332 = arith.andi %327, %331 : vector<4x8x8xi1>
    %c2_i32_142 = arith.constant 2 : i32
    %333 = vector.broadcast %c2_i32_142 : i32 to vector<4x8x8xi32>
    %334 = arith.addi %14, %333 : vector<4x8x8xi32>
    %c1_i32_143 = arith.constant 1 : i32
    %335 = vector.broadcast %c1_i32_143 : i32 to vector<4x8x8xi32>
    %336 = arith.cmpi sge, %334, %335 : vector<4x8x8xi32>
    %337 = arith.andi %332, %336 : vector<4x8x8xi1>
    %c2_i32_144 = arith.constant 2 : i32
    %338 = vector.broadcast %c2_i32_144 : i32 to vector<4x8x8xi32>
    %339 = arith.addi %14, %338 : vector<4x8x8xi32>
    %c8_i32_145 = arith.constant 8 : i32
    %340 = vector.broadcast %c8_i32_145 : i32 to vector<4x8x8xi32>
    %341 = arith.cmpi sle, %339, %340 : vector<4x8x8xi32>
    %342 = arith.andi %337, %341 : vector<4x8x8xi1>
    %cst_146 = arith.constant 0.000000e+00 : f32
    %343 = vector.broadcast %cst_146 : f32 to vector<4x8x8xf32>
    %344 = arith.select %342, %323, %343 : vector<4x8x8xi1>, vector<4x8x8xf32>
    %345 = arith.truncf %344 : vector<4x8x8xf32> to vector<4x8x8xbf16>
    %346 = vector.shape_cast %345 : vector<4x8x8xbf16> to vector<32x8xbf16>
    %c8 = arith.constant 8 : index
    %c0_147 = arith.constant 0 : index
    %c0_148 = arith.constant 0 : index
    %347 = vector.load %arg4[%c8, %c0_147, %c0_148] : memref<9x8x8xbf16, #tpu.memory_space<vmem>>, vector<1x8x8xbf16>
    %348 = vector.shape_cast %347 : vector<1x8x8xbf16> to vector<8x8xbf16>
    %cst_149 = arith.constant dense<0.000000e+00> : vector<32x8xf32>
    %349 = tpu.matmul %346, %348, %cst_149 {dimension_numbers = #tpu.dot_dimension_numbers<[1], [0], [0], [1], [0, 0, 1, 1], [], []>} : vector<32x8xbf16>, vector<8x8xbf16>, vector<32x8xf32> -> vector<32x8xf32>
    %350 = arith.addf %313, %349 : vector<32x8xf32>
    %c0_150 = arith.constant 0 : index
    %c0_151 = arith.constant 0 : index
    %351 = vector.load %arg7[%c0_150, %c0_151] : memref<1x8xf32, #tpu.memory_space<vmem>>, vector<1x8xf32>
    %352 = vector.shape_cast %351 : vector<1x8xf32> to vector<1x1x8xf32>
    %c0_152 = arith.constant 0 : index
    %c0_153 = arith.constant 0 : index
    %353 = vector.load %arg9[%c0_152, %c0_153] : memref<1x8xf32, #tpu.memory_space<vmem>>, vector<1x8xf32>
    %354 = vector.shape_cast %353 : vector<1x8xf32> to vector<1x1x8xf32>
    %355 = tpu.iota {dimensions = array<i32: 0>} : vector<4x8x8xi32>
    %356 = tpu.iota {dimensions = array<i32: 1>} : vector<4x8x8xi32>
    %c1_i32_154 = arith.constant 1 : i32
    %357 = arith.muli %c1_i32_154, %0 : i32
    %c1_i32_155 = arith.constant 1 : i32
    %358 = vector.broadcast %c1_i32_155 : i32 to vector<4x8x8xi32>
    %359 = arith.muli %358, %355 : vector<4x8x8xi32>
    %360 = vector.broadcast %357 : i32 to vector<4x8x8xi32>
    %361 = arith.addi %360, %359 : vector<4x8x8xi32>
    %c1_i32_156 = arith.constant 1 : i32
    %362 = vector.broadcast %c1_i32_156 : i32 to vector<4x8x8xi32>
    %363 = arith.muli %362, %356 : vector<4x8x8xi32>
    %c0_i32_157 = arith.constant 0 : i32
    %364 = arith.addi %0, %c0_i32_157 : i32
    %c0_158 = arith.constant 0 : index
    %365 = arith.index_cast %364 : i32 to index
    %c0_159 = arith.constant 0 : index
    %c0_160 = arith.constant 0 : index
    %366 = vector.load %arg3[%c0_158, %365, %c0_159, %c0_160] : memref<1x10x10x8xf32, #tpu.memory_space<vmem>>, vector<1x4x8x8xf32>
    %367 = vector.shape_cast %366 : vector<1x4x8x8xf32> to vector<4x8x8xf32>
    %368 = vector.broadcast %352 : vector<1x1x8xf32> to vector<4x8x8xf32>
    %369 = arith.mulf %367, %368 : vector<4x8x8xf32>
    %370 = vector.broadcast %354 : vector<1x1x8xf32> to vector<4x8x8xf32>
    %371 = arith.addf %369, %370 : vector<4x8x8xf32>
    %cst_161 = arith.constant 0.000000e+00 : f32
    %372 = vector.broadcast %cst_161 : f32 to vector<4x8x8xf32>
    %373 = arith.maximumf %371, %372 : vector<4x8x8xf32>
    %c0_i32_162 = arith.constant 0 : i32
    %374 = vector.broadcast %c0_i32_162 : i32 to vector<4x8x8xi32>
    %375 = arith.addi %361, %374 : vector<4x8x8xi32>
    %c1_i32_163 = arith.constant 1 : i32
    %376 = vector.broadcast %c1_i32_163 : i32 to vector<4x8x8xi32>
    %377 = arith.cmpi sge, %375, %376 : vector<4x8x8xi32>
    %c0_i32_164 = arith.constant 0 : i32
    %378 = vector.broadcast %c0_i32_164 : i32 to vector<4x8x8xi32>
    %379 = arith.addi %361, %378 : vector<4x8x8xi32>
    %c8_i32_165 = arith.constant 8 : i32
    %380 = vector.broadcast %c8_i32_165 : i32 to vector<4x8x8xi32>
    %381 = arith.cmpi sle, %379, %380 : vector<4x8x8xi32>
    %382 = arith.andi %377, %381 : vector<4x8x8xi1>
    %c0_i32_166 = arith.constant 0 : i32
    %383 = vector.broadcast %c0_i32_166 : i32 to vector<4x8x8xi32>
    %384 = arith.addi %363, %383 : vector<4x8x8xi32>
    %c1_i32_167 = arith.constant 1 : i32
    %385 = vector.broadcast %c1_i32_167 : i32 to vector<4x8x8xi32>
    %386 = arith.cmpi sge, %384, %385 : vector<4x8x8xi32>
    %387 = arith.andi %382, %386 : vector<4x8x8xi1>
    %c0_i32_168 = arith.constant 0 : i32
    %388 = vector.broadcast %c0_i32_168 : i32 to vector<4x8x8xi32>
    %389 = arith.addi %363, %388 : vector<4x8x8xi32>
    %c8_i32_169 = arith.constant 8 : i32
    %390 = vector.broadcast %c8_i32_169 : i32 to vector<4x8x8xi32>
    %391 = arith.cmpi sle, %389, %390 : vector<4x8x8xi32>
    %392 = arith.andi %387, %391 : vector<4x8x8xi1>
    %cst_170 = arith.constant 0.000000e+00 : f32
    %393 = vector.broadcast %cst_170 : f32 to vector<4x8x8xf32>
    %394 = arith.select %392, %373, %393 : vector<4x8x8xi1>, vector<4x8x8xf32>
    %395 = arith.truncf %394 : vector<4x8x8xf32> to vector<4x8x8xbf16>
    %396 = vector.shape_cast %395 : vector<4x8x8xbf16> to vector<32x8xbf16>
    %c0_171 = arith.constant 0 : index
    %c0_172 = arith.constant 0 : index
    %c0_173 = arith.constant 0 : index
    %397 = vector.load %arg5[%c0_171, %c0_172, %c0_173] : memref<9x8x8xbf16, #tpu.memory_space<vmem>>, vector<1x8x8xbf16>
    %398 = vector.shape_cast %397 : vector<1x8x8xbf16> to vector<8x8xbf16>
    %cst_174 = arith.constant dense<0.000000e+00> : vector<32x8xf32>
    %399 = tpu.matmul %396, %398, %cst_174 {dimension_numbers = #tpu.dot_dimension_numbers<[1], [0], [0], [1], [0, 0, 1, 1], [], []>} : vector<32x8xbf16>, vector<8x8xbf16>, vector<32x8xf32> -> vector<32x8xf32>
    %400 = arith.addf %350, %399 : vector<32x8xf32>
    %c0_175 = arith.constant 0 : index
    %401 = arith.index_cast %364 : i32 to index
    %c1_176 = arith.constant 1 : index
    %c0_177 = arith.constant 0 : index
    %402 = vector.load %arg3[%c0_175, %401, %c1_176, %c0_177] : memref<1x10x10x8xf32, #tpu.memory_space<vmem>>, vector<1x4x8x8xf32>
    %403 = vector.shape_cast %402 : vector<1x4x8x8xf32> to vector<4x8x8xf32>
    %404 = vector.broadcast %352 : vector<1x1x8xf32> to vector<4x8x8xf32>
    %405 = arith.mulf %403, %404 : vector<4x8x8xf32>
    %406 = vector.broadcast %354 : vector<1x1x8xf32> to vector<4x8x8xf32>
    %407 = arith.addf %405, %406 : vector<4x8x8xf32>
    %cst_178 = arith.constant 0.000000e+00 : f32
    %408 = vector.broadcast %cst_178 : f32 to vector<4x8x8xf32>
    %409 = arith.maximumf %407, %408 : vector<4x8x8xf32>
    %c0_i32_179 = arith.constant 0 : i32
    %410 = vector.broadcast %c0_i32_179 : i32 to vector<4x8x8xi32>
    %411 = arith.addi %361, %410 : vector<4x8x8xi32>
    %c1_i32_180 = arith.constant 1 : i32
    %412 = vector.broadcast %c1_i32_180 : i32 to vector<4x8x8xi32>
    %413 = arith.cmpi sge, %411, %412 : vector<4x8x8xi32>
    %c0_i32_181 = arith.constant 0 : i32
    %414 = vector.broadcast %c0_i32_181 : i32 to vector<4x8x8xi32>
    %415 = arith.addi %361, %414 : vector<4x8x8xi32>
    %c8_i32_182 = arith.constant 8 : i32
    %416 = vector.broadcast %c8_i32_182 : i32 to vector<4x8x8xi32>
    %417 = arith.cmpi sle, %415, %416 : vector<4x8x8xi32>
    %418 = arith.andi %413, %417 : vector<4x8x8xi1>
    %c1_i32_183 = arith.constant 1 : i32
    %419 = vector.broadcast %c1_i32_183 : i32 to vector<4x8x8xi32>
    %420 = arith.addi %363, %419 : vector<4x8x8xi32>
    %c1_i32_184 = arith.constant 1 : i32
    %421 = vector.broadcast %c1_i32_184 : i32 to vector<4x8x8xi32>
    %422 = arith.cmpi sge, %420, %421 : vector<4x8x8xi32>
    %423 = arith.andi %418, %422 : vector<4x8x8xi1>
    %c1_i32_185 = arith.constant 1 : i32
    %424 = vector.broadcast %c1_i32_185 : i32 to vector<4x8x8xi32>
    %425 = arith.addi %363, %424 : vector<4x8x8xi32>
    %c8_i32_186 = arith.constant 8 : i32
    %426 = vector.broadcast %c8_i32_186 : i32 to vector<4x8x8xi32>
    %427 = arith.cmpi sle, %425, %426 : vector<4x8x8xi32>
    %428 = arith.andi %423, %427 : vector<4x8x8xi1>
    %cst_187 = arith.constant 0.000000e+00 : f32
    %429 = vector.broadcast %cst_187 : f32 to vector<4x8x8xf32>
    %430 = arith.select %428, %409, %429 : vector<4x8x8xi1>, vector<4x8x8xf32>
    %431 = arith.truncf %430 : vector<4x8x8xf32> to vector<4x8x8xbf16>
    %432 = vector.shape_cast %431 : vector<4x8x8xbf16> to vector<32x8xbf16>
    %c1_188 = arith.constant 1 : index
    %c0_189 = arith.constant 0 : index
    %c0_190 = arith.constant 0 : index
    %433 = vector.load %arg5[%c1_188, %c0_189, %c0_190] : memref<9x8x8xbf16, #tpu.memory_space<vmem>>, vector<1x8x8xbf16>
    %434 = vector.shape_cast %433 : vector<1x8x8xbf16> to vector<8x8xbf16>
    %cst_191 = arith.constant dense<0.000000e+00> : vector<32x8xf32>
    %435 = tpu.matmul %432, %434, %cst_191 {dimension_numbers = #tpu.dot_dimension_numbers<[1], [0], [0], [1], [0, 0, 1, 1], [], []>} : vector<32x8xbf16>, vector<8x8xbf16>, vector<32x8xf32> -> vector<32x8xf32>
    %436 = arith.addf %400, %435 : vector<32x8xf32>
    %c0_192 = arith.constant 0 : index
    %437 = arith.index_cast %364 : i32 to index
    %c2_193 = arith.constant 2 : index
    %c0_194 = arith.constant 0 : index
    %438 = vector.load %arg3[%c0_192, %437, %c2_193, %c0_194] : memref<1x10x10x8xf32, #tpu.memory_space<vmem>>, vector<1x4x8x8xf32>
    %439 = vector.shape_cast %438 : vector<1x4x8x8xf32> to vector<4x8x8xf32>
    %440 = vector.broadcast %352 : vector<1x1x8xf32> to vector<4x8x8xf32>
    %441 = arith.mulf %439, %440 : vector<4x8x8xf32>
    %442 = vector.broadcast %354 : vector<1x1x8xf32> to vector<4x8x8xf32>
    %443 = arith.addf %441, %442 : vector<4x8x8xf32>
    %cst_195 = arith.constant 0.000000e+00 : f32
    %444 = vector.broadcast %cst_195 : f32 to vector<4x8x8xf32>
    %445 = arith.maximumf %443, %444 : vector<4x8x8xf32>
    %c0_i32_196 = arith.constant 0 : i32
    %446 = vector.broadcast %c0_i32_196 : i32 to vector<4x8x8xi32>
    %447 = arith.addi %361, %446 : vector<4x8x8xi32>
    %c1_i32_197 = arith.constant 1 : i32
    %448 = vector.broadcast %c1_i32_197 : i32 to vector<4x8x8xi32>
    %449 = arith.cmpi sge, %447, %448 : vector<4x8x8xi32>
    %c0_i32_198 = arith.constant 0 : i32
    %450 = vector.broadcast %c0_i32_198 : i32 to vector<4x8x8xi32>
    %451 = arith.addi %361, %450 : vector<4x8x8xi32>
    %c8_i32_199 = arith.constant 8 : i32
    %452 = vector.broadcast %c8_i32_199 : i32 to vector<4x8x8xi32>
    %453 = arith.cmpi sle, %451, %452 : vector<4x8x8xi32>
    %454 = arith.andi %449, %453 : vector<4x8x8xi1>
    %c2_i32_200 = arith.constant 2 : i32
    %455 = vector.broadcast %c2_i32_200 : i32 to vector<4x8x8xi32>
    %456 = arith.addi %363, %455 : vector<4x8x8xi32>
    %c1_i32_201 = arith.constant 1 : i32
    %457 = vector.broadcast %c1_i32_201 : i32 to vector<4x8x8xi32>
    %458 = arith.cmpi sge, %456, %457 : vector<4x8x8xi32>
    %459 = arith.andi %454, %458 : vector<4x8x8xi1>
    %c2_i32_202 = arith.constant 2 : i32
    %460 = vector.broadcast %c2_i32_202 : i32 to vector<4x8x8xi32>
    %461 = arith.addi %363, %460 : vector<4x8x8xi32>
    %c8_i32_203 = arith.constant 8 : i32
    %462 = vector.broadcast %c8_i32_203 : i32 to vector<4x8x8xi32>
    %463 = arith.cmpi sle, %461, %462 : vector<4x8x8xi32>
    %464 = arith.andi %459, %463 : vector<4x8x8xi1>
    %cst_204 = arith.constant 0.000000e+00 : f32
    %465 = vector.broadcast %cst_204 : f32 to vector<4x8x8xf32>
    %466 = arith.select %464, %445, %465 : vector<4x8x8xi1>, vector<4x8x8xf32>
    %467 = arith.truncf %466 : vector<4x8x8xf32> to vector<4x8x8xbf16>
    %468 = vector.shape_cast %467 : vector<4x8x8xbf16> to vector<32x8xbf16>
    %c2_205 = arith.constant 2 : index
    %c0_206 = arith.constant 0 : index
    %c0_207 = arith.constant 0 : index
    %469 = vector.load %arg5[%c2_205, %c0_206, %c0_207] : memref<9x8x8xbf16, #tpu.memory_space<vmem>>, vector<1x8x8xbf16>
    %470 = vector.shape_cast %469 : vector<1x8x8xbf16> to vector<8x8xbf16>
    %cst_208 = arith.constant dense<0.000000e+00> : vector<32x8xf32>
    %471 = tpu.matmul %468, %470, %cst_208 {dimension_numbers = #tpu.dot_dimension_numbers<[1], [0], [0], [1], [0, 0, 1, 1], [], []>} : vector<32x8xbf16>, vector<8x8xbf16>, vector<32x8xf32> -> vector<32x8xf32>
    %472 = arith.addf %436, %471 : vector<32x8xf32>
    %c1_i32_209 = arith.constant 1 : i32
    %473 = arith.addi %0, %c1_i32_209 : i32
    %c0_210 = arith.constant 0 : index
    %474 = arith.index_cast %473 : i32 to index
    %c0_211 = arith.constant 0 : index
    %c0_212 = arith.constant 0 : index
    %475 = vector.load %arg3[%c0_210, %474, %c0_211, %c0_212] : memref<1x10x10x8xf32, #tpu.memory_space<vmem>>, vector<1x4x8x8xf32>
    %476 = vector.shape_cast %475 : vector<1x4x8x8xf32> to vector<4x8x8xf32>
    %477 = vector.broadcast %352 : vector<1x1x8xf32> to vector<4x8x8xf32>
    %478 = arith.mulf %476, %477 : vector<4x8x8xf32>
    %479 = vector.broadcast %354 : vector<1x1x8xf32> to vector<4x8x8xf32>
    %480 = arith.addf %478, %479 : vector<4x8x8xf32>
    %cst_213 = arith.constant 0.000000e+00 : f32
    %481 = vector.broadcast %cst_213 : f32 to vector<4x8x8xf32>
    %482 = arith.maximumf %480, %481 : vector<4x8x8xf32>
    %c1_i32_214 = arith.constant 1 : i32
    %483 = vector.broadcast %c1_i32_214 : i32 to vector<4x8x8xi32>
    %484 = arith.addi %361, %483 : vector<4x8x8xi32>
    %c1_i32_215 = arith.constant 1 : i32
    %485 = vector.broadcast %c1_i32_215 : i32 to vector<4x8x8xi32>
    %486 = arith.cmpi sge, %484, %485 : vector<4x8x8xi32>
    %c1_i32_216 = arith.constant 1 : i32
    %487 = vector.broadcast %c1_i32_216 : i32 to vector<4x8x8xi32>
    %488 = arith.addi %361, %487 : vector<4x8x8xi32>
    %c8_i32_217 = arith.constant 8 : i32
    %489 = vector.broadcast %c8_i32_217 : i32 to vector<4x8x8xi32>
    %490 = arith.cmpi sle, %488, %489 : vector<4x8x8xi32>
    %491 = arith.andi %486, %490 : vector<4x8x8xi1>
    %c0_i32_218 = arith.constant 0 : i32
    %492 = vector.broadcast %c0_i32_218 : i32 to vector<4x8x8xi32>
    %493 = arith.addi %363, %492 : vector<4x8x8xi32>
    %c1_i32_219 = arith.constant 1 : i32
    %494 = vector.broadcast %c1_i32_219 : i32 to vector<4x8x8xi32>
    %495 = arith.cmpi sge, %493, %494 : vector<4x8x8xi32>
    %496 = arith.andi %491, %495 : vector<4x8x8xi1>
    %c0_i32_220 = arith.constant 0 : i32
    %497 = vector.broadcast %c0_i32_220 : i32 to vector<4x8x8xi32>
    %498 = arith.addi %363, %497 : vector<4x8x8xi32>
    %c8_i32_221 = arith.constant 8 : i32
    %499 = vector.broadcast %c8_i32_221 : i32 to vector<4x8x8xi32>
    %500 = arith.cmpi sle, %498, %499 : vector<4x8x8xi32>
    %501 = arith.andi %496, %500 : vector<4x8x8xi1>
    %cst_222 = arith.constant 0.000000e+00 : f32
    %502 = vector.broadcast %cst_222 : f32 to vector<4x8x8xf32>
    %503 = arith.select %501, %482, %502 : vector<4x8x8xi1>, vector<4x8x8xf32>
    %504 = arith.truncf %503 : vector<4x8x8xf32> to vector<4x8x8xbf16>
    %505 = vector.shape_cast %504 : vector<4x8x8xbf16> to vector<32x8xbf16>
    %c3_223 = arith.constant 3 : index
    %c0_224 = arith.constant 0 : index
    %c0_225 = arith.constant 0 : index
    %506 = vector.load %arg5[%c3_223, %c0_224, %c0_225] : memref<9x8x8xbf16, #tpu.memory_space<vmem>>, vector<1x8x8xbf16>
    %507 = vector.shape_cast %506 : vector<1x8x8xbf16> to vector<8x8xbf16>
    %cst_226 = arith.constant dense<0.000000e+00> : vector<32x8xf32>
    %508 = tpu.matmul %505, %507, %cst_226 {dimension_numbers = #tpu.dot_dimension_numbers<[1], [0], [0], [1], [0, 0, 1, 1], [], []>} : vector<32x8xbf16>, vector<8x8xbf16>, vector<32x8xf32> -> vector<32x8xf32>
    %509 = arith.addf %472, %508 : vector<32x8xf32>
    %c0_227 = arith.constant 0 : index
    %510 = arith.index_cast %473 : i32 to index
    %c1_228 = arith.constant 1 : index
    %c0_229 = arith.constant 0 : index
    %511 = vector.load %arg3[%c0_227, %510, %c1_228, %c0_229] : memref<1x10x10x8xf32, #tpu.memory_space<vmem>>, vector<1x4x8x8xf32>
    %512 = vector.shape_cast %511 : vector<1x4x8x8xf32> to vector<4x8x8xf32>
    %513 = vector.broadcast %352 : vector<1x1x8xf32> to vector<4x8x8xf32>
    %514 = arith.mulf %512, %513 : vector<4x8x8xf32>
    %515 = vector.broadcast %354 : vector<1x1x8xf32> to vector<4x8x8xf32>
    %516 = arith.addf %514, %515 : vector<4x8x8xf32>
    %cst_230 = arith.constant 0.000000e+00 : f32
    %517 = vector.broadcast %cst_230 : f32 to vector<4x8x8xf32>
    %518 = arith.maximumf %516, %517 : vector<4x8x8xf32>
    %c1_i32_231 = arith.constant 1 : i32
    %519 = vector.broadcast %c1_i32_231 : i32 to vector<4x8x8xi32>
    %520 = arith.addi %361, %519 : vector<4x8x8xi32>
    %c1_i32_232 = arith.constant 1 : i32
    %521 = vector.broadcast %c1_i32_232 : i32 to vector<4x8x8xi32>
    %522 = arith.cmpi sge, %520, %521 : vector<4x8x8xi32>
    %c1_i32_233 = arith.constant 1 : i32
    %523 = vector.broadcast %c1_i32_233 : i32 to vector<4x8x8xi32>
    %524 = arith.addi %361, %523 : vector<4x8x8xi32>
    %c8_i32_234 = arith.constant 8 : i32
    %525 = vector.broadcast %c8_i32_234 : i32 to vector<4x8x8xi32>
    %526 = arith.cmpi sle, %524, %525 : vector<4x8x8xi32>
    %527 = arith.andi %522, %526 : vector<4x8x8xi1>
    %c1_i32_235 = arith.constant 1 : i32
    %528 = vector.broadcast %c1_i32_235 : i32 to vector<4x8x8xi32>
    %529 = arith.addi %363, %528 : vector<4x8x8xi32>
    %c1_i32_236 = arith.constant 1 : i32
    %530 = vector.broadcast %c1_i32_236 : i32 to vector<4x8x8xi32>
    %531 = arith.cmpi sge, %529, %530 : vector<4x8x8xi32>
    %532 = arith.andi %527, %531 : vector<4x8x8xi1>
    %c1_i32_237 = arith.constant 1 : i32
    %533 = vector.broadcast %c1_i32_237 : i32 to vector<4x8x8xi32>
    %534 = arith.addi %363, %533 : vector<4x8x8xi32>
    %c8_i32_238 = arith.constant 8 : i32
    %535 = vector.broadcast %c8_i32_238 : i32 to vector<4x8x8xi32>
    %536 = arith.cmpi sle, %534, %535 : vector<4x8x8xi32>
    %537 = arith.andi %532, %536 : vector<4x8x8xi1>
    %cst_239 = arith.constant 0.000000e+00 : f32
    %538 = vector.broadcast %cst_239 : f32 to vector<4x8x8xf32>
    %539 = arith.select %537, %518, %538 : vector<4x8x8xi1>, vector<4x8x8xf32>
    %540 = arith.truncf %539 : vector<4x8x8xf32> to vector<4x8x8xbf16>
    %541 = vector.shape_cast %540 : vector<4x8x8xbf16> to vector<32x8xbf16>
    %c4_240 = arith.constant 4 : index
    %c0_241 = arith.constant 0 : index
    %c0_242 = arith.constant 0 : index
    %542 = vector.load %arg5[%c4_240, %c0_241, %c0_242] : memref<9x8x8xbf16, #tpu.memory_space<vmem>>, vector<1x8x8xbf16>
    %543 = vector.shape_cast %542 : vector<1x8x8xbf16> to vector<8x8xbf16>
    %cst_243 = arith.constant dense<0.000000e+00> : vector<32x8xf32>
    %544 = tpu.matmul %541, %543, %cst_243 {dimension_numbers = #tpu.dot_dimension_numbers<[1], [0], [0], [1], [0, 0, 1, 1], [], []>} : vector<32x8xbf16>, vector<8x8xbf16>, vector<32x8xf32> -> vector<32x8xf32>
    %545 = arith.addf %509, %544 : vector<32x8xf32>
    %c0_244 = arith.constant 0 : index
    %546 = arith.index_cast %473 : i32 to index
    %c2_245 = arith.constant 2 : index
    %c0_246 = arith.constant 0 : index
    %547 = vector.load %arg3[%c0_244, %546, %c2_245, %c0_246] : memref<1x10x10x8xf32, #tpu.memory_space<vmem>>, vector<1x4x8x8xf32>
    %548 = vector.shape_cast %547 : vector<1x4x8x8xf32> to vector<4x8x8xf32>
    %549 = vector.broadcast %352 : vector<1x1x8xf32> to vector<4x8x8xf32>
    %550 = arith.mulf %548, %549 : vector<4x8x8xf32>
    %551 = vector.broadcast %354 : vector<1x1x8xf32> to vector<4x8x8xf32>
    %552 = arith.addf %550, %551 : vector<4x8x8xf32>
    %cst_247 = arith.constant 0.000000e+00 : f32
    %553 = vector.broadcast %cst_247 : f32 to vector<4x8x8xf32>
    %554 = arith.maximumf %552, %553 : vector<4x8x8xf32>
    %c1_i32_248 = arith.constant 1 : i32
    %555 = vector.broadcast %c1_i32_248 : i32 to vector<4x8x8xi32>
    %556 = arith.addi %361, %555 : vector<4x8x8xi32>
    %c1_i32_249 = arith.constant 1 : i32
    %557 = vector.broadcast %c1_i32_249 : i32 to vector<4x8x8xi32>
    %558 = arith.cmpi sge, %556, %557 : vector<4x8x8xi32>
    %c1_i32_250 = arith.constant 1 : i32
    %559 = vector.broadcast %c1_i32_250 : i32 to vector<4x8x8xi32>
    %560 = arith.addi %361, %559 : vector<4x8x8xi32>
    %c8_i32_251 = arith.constant 8 : i32
    %561 = vector.broadcast %c8_i32_251 : i32 to vector<4x8x8xi32>
    %562 = arith.cmpi sle, %560, %561 : vector<4x8x8xi32>
    %563 = arith.andi %558, %562 : vector<4x8x8xi1>
    %c2_i32_252 = arith.constant 2 : i32
    %564 = vector.broadcast %c2_i32_252 : i32 to vector<4x8x8xi32>
    %565 = arith.addi %363, %564 : vector<4x8x8xi32>
    %c1_i32_253 = arith.constant 1 : i32
    %566 = vector.broadcast %c1_i32_253 : i32 to vector<4x8x8xi32>
    %567 = arith.cmpi sge, %565, %566 : vector<4x8x8xi32>
    %568 = arith.andi %563, %567 : vector<4x8x8xi1>
    %c2_i32_254 = arith.constant 2 : i32
    %569 = vector.broadcast %c2_i32_254 : i32 to vector<4x8x8xi32>
    %570 = arith.addi %363, %569 : vector<4x8x8xi32>
    %c8_i32_255 = arith.constant 8 : i32
    %571 = vector.broadcast %c8_i32_255 : i32 to vector<4x8x8xi32>
    %572 = arith.cmpi sle, %570, %571 : vector<4x8x8xi32>
    %573 = arith.andi %568, %572 : vector<4x8x8xi1>
    %cst_256 = arith.constant 0.000000e+00 : f32
    %574 = vector.broadcast %cst_256 : f32 to vector<4x8x8xf32>
    %575 = arith.select %573, %554, %574 : vector<4x8x8xi1>, vector<4x8x8xf32>
    %576 = arith.truncf %575 : vector<4x8x8xf32> to vector<4x8x8xbf16>
    %577 = vector.shape_cast %576 : vector<4x8x8xbf16> to vector<32x8xbf16>
    %c5_257 = arith.constant 5 : index
    %c0_258 = arith.constant 0 : index
    %c0_259 = arith.constant 0 : index
    %578 = vector.load %arg5[%c5_257, %c0_258, %c0_259] : memref<9x8x8xbf16, #tpu.memory_space<vmem>>, vector<1x8x8xbf16>
    %579 = vector.shape_cast %578 : vector<1x8x8xbf16> to vector<8x8xbf16>
    %cst_260 = arith.constant dense<0.000000e+00> : vector<32x8xf32>
    %580 = tpu.matmul %577, %579, %cst_260 {dimension_numbers = #tpu.dot_dimension_numbers<[1], [0], [0], [1], [0, 0, 1, 1], [], []>} : vector<32x8xbf16>, vector<8x8xbf16>, vector<32x8xf32> -> vector<32x8xf32>
    %581 = arith.addf %545, %580 : vector<32x8xf32>
    %c2_i32_261 = arith.constant 2 : i32
    %582 = arith.addi %0, %c2_i32_261 : i32
    %c0_262 = arith.constant 0 : index
    %583 = arith.index_cast %582 : i32 to index
    %c0_263 = arith.constant 0 : index
    %c0_264 = arith.constant 0 : index
    %584 = vector.load %arg3[%c0_262, %583, %c0_263, %c0_264] : memref<1x10x10x8xf32, #tpu.memory_space<vmem>>, vector<1x4x8x8xf32>
    %585 = vector.shape_cast %584 : vector<1x4x8x8xf32> to vector<4x8x8xf32>
    %586 = vector.broadcast %352 : vector<1x1x8xf32> to vector<4x8x8xf32>
    %587 = arith.mulf %585, %586 : vector<4x8x8xf32>
    %588 = vector.broadcast %354 : vector<1x1x8xf32> to vector<4x8x8xf32>
    %589 = arith.addf %587, %588 : vector<4x8x8xf32>
    %cst_265 = arith.constant 0.000000e+00 : f32
    %590 = vector.broadcast %cst_265 : f32 to vector<4x8x8xf32>
    %591 = arith.maximumf %589, %590 : vector<4x8x8xf32>
    %c2_i32_266 = arith.constant 2 : i32
    %592 = vector.broadcast %c2_i32_266 : i32 to vector<4x8x8xi32>
    %593 = arith.addi %361, %592 : vector<4x8x8xi32>
    %c1_i32_267 = arith.constant 1 : i32
    %594 = vector.broadcast %c1_i32_267 : i32 to vector<4x8x8xi32>
    %595 = arith.cmpi sge, %593, %594 : vector<4x8x8xi32>
    %c2_i32_268 = arith.constant 2 : i32
    %596 = vector.broadcast %c2_i32_268 : i32 to vector<4x8x8xi32>
    %597 = arith.addi %361, %596 : vector<4x8x8xi32>
    %c8_i32_269 = arith.constant 8 : i32
    %598 = vector.broadcast %c8_i32_269 : i32 to vector<4x8x8xi32>
    %599 = arith.cmpi sle, %597, %598 : vector<4x8x8xi32>
    %600 = arith.andi %595, %599 : vector<4x8x8xi1>
    %c0_i32_270 = arith.constant 0 : i32
    %601 = vector.broadcast %c0_i32_270 : i32 to vector<4x8x8xi32>
    %602 = arith.addi %363, %601 : vector<4x8x8xi32>
    %c1_i32_271 = arith.constant 1 : i32
    %603 = vector.broadcast %c1_i32_271 : i32 to vector<4x8x8xi32>
    %604 = arith.cmpi sge, %602, %603 : vector<4x8x8xi32>
    %605 = arith.andi %600, %604 : vector<4x8x8xi1>
    %c0_i32_272 = arith.constant 0 : i32
    %606 = vector.broadcast %c0_i32_272 : i32 to vector<4x8x8xi32>
    %607 = arith.addi %363, %606 : vector<4x8x8xi32>
    %c8_i32_273 = arith.constant 8 : i32
    %608 = vector.broadcast %c8_i32_273 : i32 to vector<4x8x8xi32>
    %609 = arith.cmpi sle, %607, %608 : vector<4x8x8xi32>
    %610 = arith.andi %605, %609 : vector<4x8x8xi1>
    %cst_274 = arith.constant 0.000000e+00 : f32
    %611 = vector.broadcast %cst_274 : f32 to vector<4x8x8xf32>
    %612 = arith.select %610, %591, %611 : vector<4x8x8xi1>, vector<4x8x8xf32>
    %613 = arith.truncf %612 : vector<4x8x8xf32> to vector<4x8x8xbf16>
    %614 = vector.shape_cast %613 : vector<4x8x8xbf16> to vector<32x8xbf16>
    %c6_275 = arith.constant 6 : index
    %c0_276 = arith.constant 0 : index
    %c0_277 = arith.constant 0 : index
    %615 = vector.load %arg5[%c6_275, %c0_276, %c0_277] : memref<9x8x8xbf16, #tpu.memory_space<vmem>>, vector<1x8x8xbf16>
    %616 = vector.shape_cast %615 : vector<1x8x8xbf16> to vector<8x8xbf16>
    %cst_278 = arith.constant dense<0.000000e+00> : vector<32x8xf32>
    %617 = tpu.matmul %614, %616, %cst_278 {dimension_numbers = #tpu.dot_dimension_numbers<[1], [0], [0], [1], [0, 0, 1, 1], [], []>} : vector<32x8xbf16>, vector<8x8xbf16>, vector<32x8xf32> -> vector<32x8xf32>
    %618 = arith.addf %581, %617 : vector<32x8xf32>
    %c0_279 = arith.constant 0 : index
    %619 = arith.index_cast %582 : i32 to index
    %c1_280 = arith.constant 1 : index
    %c0_281 = arith.constant 0 : index
    %620 = vector.load %arg3[%c0_279, %619, %c1_280, %c0_281] : memref<1x10x10x8xf32, #tpu.memory_space<vmem>>, vector<1x4x8x8xf32>
    %621 = vector.shape_cast %620 : vector<1x4x8x8xf32> to vector<4x8x8xf32>
    %622 = vector.broadcast %352 : vector<1x1x8xf32> to vector<4x8x8xf32>
    %623 = arith.mulf %621, %622 : vector<4x8x8xf32>
    %624 = vector.broadcast %354 : vector<1x1x8xf32> to vector<4x8x8xf32>
    %625 = arith.addf %623, %624 : vector<4x8x8xf32>
    %cst_282 = arith.constant 0.000000e+00 : f32
    %626 = vector.broadcast %cst_282 : f32 to vector<4x8x8xf32>
    %627 = arith.maximumf %625, %626 : vector<4x8x8xf32>
    %c2_i32_283 = arith.constant 2 : i32
    %628 = vector.broadcast %c2_i32_283 : i32 to vector<4x8x8xi32>
    %629 = arith.addi %361, %628 : vector<4x8x8xi32>
    %c1_i32_284 = arith.constant 1 : i32
    %630 = vector.broadcast %c1_i32_284 : i32 to vector<4x8x8xi32>
    %631 = arith.cmpi sge, %629, %630 : vector<4x8x8xi32>
    %c2_i32_285 = arith.constant 2 : i32
    %632 = vector.broadcast %c2_i32_285 : i32 to vector<4x8x8xi32>
    %633 = arith.addi %361, %632 : vector<4x8x8xi32>
    %c8_i32_286 = arith.constant 8 : i32
    %634 = vector.broadcast %c8_i32_286 : i32 to vector<4x8x8xi32>
    %635 = arith.cmpi sle, %633, %634 : vector<4x8x8xi32>
    %636 = arith.andi %631, %635 : vector<4x8x8xi1>
    %c1_i32_287 = arith.constant 1 : i32
    %637 = vector.broadcast %c1_i32_287 : i32 to vector<4x8x8xi32>
    %638 = arith.addi %363, %637 : vector<4x8x8xi32>
    %c1_i32_288 = arith.constant 1 : i32
    %639 = vector.broadcast %c1_i32_288 : i32 to vector<4x8x8xi32>
    %640 = arith.cmpi sge, %638, %639 : vector<4x8x8xi32>
    %641 = arith.andi %636, %640 : vector<4x8x8xi1>
    %c1_i32_289 = arith.constant 1 : i32
    %642 = vector.broadcast %c1_i32_289 : i32 to vector<4x8x8xi32>
    %643 = arith.addi %363, %642 : vector<4x8x8xi32>
    %c8_i32_290 = arith.constant 8 : i32
    %644 = vector.broadcast %c8_i32_290 : i32 to vector<4x8x8xi32>
    %645 = arith.cmpi sle, %643, %644 : vector<4x8x8xi32>
    %646 = arith.andi %641, %645 : vector<4x8x8xi1>
    %cst_291 = arith.constant 0.000000e+00 : f32
    %647 = vector.broadcast %cst_291 : f32 to vector<4x8x8xf32>
    %648 = arith.select %646, %627, %647 : vector<4x8x8xi1>, vector<4x8x8xf32>
    %649 = arith.truncf %648 : vector<4x8x8xf32> to vector<4x8x8xbf16>
    %650 = vector.shape_cast %649 : vector<4x8x8xbf16> to vector<32x8xbf16>
    %c7_292 = arith.constant 7 : index
    %c0_293 = arith.constant 0 : index
    %c0_294 = arith.constant 0 : index
    %651 = vector.load %arg5[%c7_292, %c0_293, %c0_294] : memref<9x8x8xbf16, #tpu.memory_space<vmem>>, vector<1x8x8xbf16>
    %652 = vector.shape_cast %651 : vector<1x8x8xbf16> to vector<8x8xbf16>
    %cst_295 = arith.constant dense<0.000000e+00> : vector<32x8xf32>
    %653 = tpu.matmul %650, %652, %cst_295 {dimension_numbers = #tpu.dot_dimension_numbers<[1], [0], [0], [1], [0, 0, 1, 1], [], []>} : vector<32x8xbf16>, vector<8x8xbf16>, vector<32x8xf32> -> vector<32x8xf32>
    %654 = arith.addf %618, %653 : vector<32x8xf32>
    %c0_296 = arith.constant 0 : index
    %655 = arith.index_cast %582 : i32 to index
    %c2_297 = arith.constant 2 : index
    %c0_298 = arith.constant 0 : index
    %656 = vector.load %arg3[%c0_296, %655, %c2_297, %c0_298] : memref<1x10x10x8xf32, #tpu.memory_space<vmem>>, vector<1x4x8x8xf32>
    %657 = vector.shape_cast %656 : vector<1x4x8x8xf32> to vector<4x8x8xf32>
    %658 = vector.broadcast %352 : vector<1x1x8xf32> to vector<4x8x8xf32>
    %659 = arith.mulf %657, %658 : vector<4x8x8xf32>
    %660 = vector.broadcast %354 : vector<1x1x8xf32> to vector<4x8x8xf32>
    %661 = arith.addf %659, %660 : vector<4x8x8xf32>
    %cst_299 = arith.constant 0.000000e+00 : f32
    %662 = vector.broadcast %cst_299 : f32 to vector<4x8x8xf32>
    %663 = arith.maximumf %661, %662 : vector<4x8x8xf32>
    %c2_i32_300 = arith.constant 2 : i32
    %664 = vector.broadcast %c2_i32_300 : i32 to vector<4x8x8xi32>
    %665 = arith.addi %361, %664 : vector<4x8x8xi32>
    %c1_i32_301 = arith.constant 1 : i32
    %666 = vector.broadcast %c1_i32_301 : i32 to vector<4x8x8xi32>
    %667 = arith.cmpi sge, %665, %666 : vector<4x8x8xi32>
    %c2_i32_302 = arith.constant 2 : i32
    %668 = vector.broadcast %c2_i32_302 : i32 to vector<4x8x8xi32>
    %669 = arith.addi %361, %668 : vector<4x8x8xi32>
    %c8_i32_303 = arith.constant 8 : i32
    %670 = vector.broadcast %c8_i32_303 : i32 to vector<4x8x8xi32>
    %671 = arith.cmpi sle, %669, %670 : vector<4x8x8xi32>
    %672 = arith.andi %667, %671 : vector<4x8x8xi1>
    %c2_i32_304 = arith.constant 2 : i32
    %673 = vector.broadcast %c2_i32_304 : i32 to vector<4x8x8xi32>
    %674 = arith.addi %363, %673 : vector<4x8x8xi32>
    %c1_i32_305 = arith.constant 1 : i32
    %675 = vector.broadcast %c1_i32_305 : i32 to vector<4x8x8xi32>
    %676 = arith.cmpi sge, %674, %675 : vector<4x8x8xi32>
    %677 = arith.andi %672, %676 : vector<4x8x8xi1>
    %c2_i32_306 = arith.constant 2 : i32
    %678 = vector.broadcast %c2_i32_306 : i32 to vector<4x8x8xi32>
    %679 = arith.addi %363, %678 : vector<4x8x8xi32>
    %c8_i32_307 = arith.constant 8 : i32
    %680 = vector.broadcast %c8_i32_307 : i32 to vector<4x8x8xi32>
    %681 = arith.cmpi sle, %679, %680 : vector<4x8x8xi32>
    %682 = arith.andi %677, %681 : vector<4x8x8xi1>
    %cst_308 = arith.constant 0.000000e+00 : f32
    %683 = vector.broadcast %cst_308 : f32 to vector<4x8x8xf32>
    %684 = arith.select %682, %663, %683 : vector<4x8x8xi1>, vector<4x8x8xf32>
    %685 = arith.truncf %684 : vector<4x8x8xf32> to vector<4x8x8xbf16>
    %686 = vector.shape_cast %685 : vector<4x8x8xbf16> to vector<32x8xbf16>
    %c8_309 = arith.constant 8 : index
    %c0_310 = arith.constant 0 : index
    %c0_311 = arith.constant 0 : index
    %687 = vector.load %arg5[%c8_309, %c0_310, %c0_311] : memref<9x8x8xbf16, #tpu.memory_space<vmem>>, vector<1x8x8xbf16>
    %688 = vector.shape_cast %687 : vector<1x8x8xbf16> to vector<8x8xbf16>
    %cst_312 = arith.constant dense<0.000000e+00> : vector<32x8xf32>
    %689 = tpu.matmul %686, %688, %cst_312 {dimension_numbers = #tpu.dot_dimension_numbers<[1], [0], [0], [1], [0, 0, 1, 1], [], []>} : vector<32x8xbf16>, vector<8x8xbf16>, vector<32x8xf32> -> vector<32x8xf32>
    %690 = arith.addf %654, %689 : vector<32x8xf32>
    %691 = vector.shape_cast %690 : vector<32x8xf32> to vector<4x8x8xf32>
    %692 = arith.truncf %691 : vector<4x8x8xf32> to vector<4x8x8xbf16>
    %c0_313 = arith.constant 0 : index
    %c0_314 = arith.constant 0 : index
    %c0_315 = arith.constant 0 : index
    %c0_316 = arith.constant 0 : index
    %693 = vector.load %arg10[%c0_313, %c0_314, %c0_315, %c0_316] : memref<1x4x8x8xbf16, #tpu.memory_space<vmem>>, vector<1x4x8x8xbf16>
    %694 = vector.shape_cast %693 : vector<1x4x8x8xbf16> to vector<4x8x8xbf16>
    %695 = vector.shape_cast %692 : vector<4x8x8xbf16> to vector<1x4x8x8xbf16>
    tpu.vector_store %arg10[%c0_313, %c0_314, %c0_315, %c0_316], %695 {strides = array<i32>} : memref<1x4x8x8xbf16, #tpu.memory_space<vmem>>, vector<1x4x8x8xbf16>,
    return
  }
  func.func @transform_0(%arg0: i32, %arg1: i32) -> (i32, i32, i32, i32) {
    %c0_i32 = arith.constant 0 : i32
    %c0_i32_0 = arith.constant 0 : i32
    %c0_i32_1 = arith.constant 0 : i32
    %c0_i32_2 = arith.constant 0 : i32
    return %arg0, %c0_i32, %c0_i32_0, %c0_i32_1 : i32, i32, i32, i32
  }
  func.func @transform_1(%arg0: i32, %arg1: i32) -> (i32, i32, i32, i32) {
    %c0_i32 = arith.constant 0 : i32
    %c0_i32_0 = arith.constant 0 : i32
    %c0_i32_1 = arith.constant 0 : i32
    %c0_i32_2 = arith.constant 0 : i32
    return %arg0, %c0_i32, %c0_i32_0, %c0_i32_1 : i32, i32, i32, i32
  }
  func.func @transform_2(%arg0: i32, %arg1: i32) -> (i32, i32, i32) {
    %c0_i32 = arith.constant 0 : i32
    %c0_i32_0 = arith.constant 0 : i32
    %c0_i32_1 = arith.constant 0 : i32
    %c0_i32_2 = arith.constant 0 : i32
    return %c0_i32, %c0_i32_0, %c0_i32_1 : i32, i32, i32
  }
  func.func @transform_3(%arg0: i32, %arg1: i32) -> (i32, i32, i32) {
    %c0_i32 = arith.constant 0 : i32
    %c0_i32_0 = arith.constant 0 : i32
    %c0_i32_1 = arith.constant 0 : i32
    %c0_i32_2 = arith.constant 0 : i32
    return %c0_i32, %c0_i32_0, %c0_i32_1 : i32, i32, i32
  }
  func.func @transform_4(%arg0: i32, %arg1: i32) -> (i32, i32) {
    %c0_i32 = arith.constant 0 : i32
    %c0_i32_0 = arith.constant 0 : i32
    %c0_i32_1 = arith.constant 0 : i32
    return %c0_i32, %c0_i32_0 : i32, i32
  }
  func.func @transform_5(%arg0: i32, %arg1: i32) -> (i32, i32) {
    %c0_i32 = arith.constant 0 : i32
    %c0_i32_0 = arith.constant 0 : i32
    %c0_i32_1 = arith.constant 0 : i32
    return %c0_i32, %c0_i32_0 : i32, i32
  }
  func.func @transform_6(%arg0: i32, %arg1: i32) -> (i32, i32) {
    %c0_i32 = arith.constant 0 : i32
    %c0_i32_0 = arith.constant 0 : i32
    %c0_i32_1 = arith.constant 0 : i32
    return %c0_i32, %c0_i32_0 : i32, i32
  }
  func.func @transform_7(%arg0: i32, %arg1: i32) -> (i32, i32) {
    %c0_i32 = arith.constant 0 : i32
    %c0_i32_0 = arith.constant 0 : i32
    %c0_i32_1 = arith.constant 0 : i32
    return %c0_i32, %c0_i32_0 : i32, i32
  }
  func.func @transform_8(%arg0: i32, %arg1: i32) -> (i32, i32, i32, i32) {
    %c0_i32 = arith.constant 0 : i32
    %c0_i32_0 = arith.constant 0 : i32
    %c0_i32_1 = arith.constant 0 : i32
    return %arg0, %arg1, %c0_i32, %c0_i32_0 : i32, i32, i32, i32
  }
}

</mosaic_0001>

<bundles_post_ra>
// kernel: conv2x_forward.2
= control target key start
LH: loop header
LB: loop body
LE: loop exit
PB: predicated region body
PF: predicated region fallthrough
CT: control target
= control target key end

     0   :  { %s1677_s15 = smov 0   ;;  %s1679_s16 = smov 0   ;;  %s2312_s0 = inlined_call_operand.vmem [shape: f32[8,9,9,4], index: 0, kind: input, shape index: {}]   ;;  %s2313_s1 = inlined_call_operand.vmem [shape: bf16[9,4,8], index: 1, kind: input, shape index: {}]   ;;  %s2314_s2 = inlined_call_operand.vmem [shape: f32[1,4], index: 2, kind: input, shape index: {}]   ;;  %s2315_s3 = inlined_call_operand.vmem [shape: f32[1,4], index: 3, kind: input, shape index: {}]   ;;  %s2316_s4 = inlined_call_operand.vmem [shape: bf16[2,8,8,8], index: 4, kind: output, shape index: {}]  }
   0x1   :  { %s1681_s17 = smov 0   ;;  %s1683_s18 = smov 0  }
   0x2   :  { %s1685_s19 = smov 0  }
   0x3 LB: > { %s23_s20 = sadd.s32 1, %s1642_s17  ;;  %s26_s21 = sadd.s32 1, %s1646_s18  ;;  %s1650_s19 = sphi %s1685_s19, %s14_s19   ;;  %s1646_s18 = sphi %s1683_s18, %s2418_s18   ;;  %s1642_s17 = sphi %s1681_s17, %s2417_s17   ;;  %s1638_s16 = sphi %s1679_s16, %s2416_s16   ;;  %s1634_s15 = sphi %s1677_s15, %s2415_s15  }
   0x4   : > { %p24_p0 = scmp.ge.s32.totalorder %s23_s20, 2  ;;  %p1368_p1 = scmp.ge.s32.totalorder %s1650_s19, 1 }
   0x5   : > { %p178_p2 = scmp.lt.s32.totalorder %s1650_s19, 5 }
   0x6   : > { %s2420_s20 = smov (%p24_p0, %s23_s20), 0  ;;  %s2422_s21 = smov (!%p24_p0, %s26_s21), %s1646_s18 }
   0x7   : > { %p179_p3 = pnand %p1368_p1, %p178_p2  ;;  %p28_p4 = scmp.ge.s32.totalorder %s2422_s21, 2 }
   0x8   : > { %s1369_s26 = sshll.u32 (!%p179_p3), %s1638_s16, 2  ;;  %s1375_s27 = sshll.u32 (!%p179_p3), %s1634_s15, 3 }
   0x9   : > { %s2424_s21 = smov (%p28_p4, %s2422_s21), 0  ;;  %182 = sbr.rel (%p179_p3) target bundleno = 331 (0x14b), region = 36 }
   0xa   : > { %p210_p5 = scmp.lt.s32.totalorder (!%p179_p3), %s1369_s26, 7  ;;  %s1460_s7 = sshll.u32 (!%p179_p3), %s1634_s15, 6 }
   0xb   : > { %p217_p6 = scmp.lt.s32.totalorder (!%p179_p3), %s1638_s16, 1 }
   0xe   : > { %v1384_v0 = vld [vmem:[%s2313_s1 + $0x2] sm:$0x3]  ;;  %vm2322_vm0 = vcmask 1041408   ;;  %v298_v1 = vld [vmem:[%s2313_s1] sm:$0x3]  ;;  %v230_v2 = vlaneseq  ;;  %v1723_v6 = vstv %s1375_s27  ;;  %s2426_s26 = smov (!%p210_p5, %s1369_s26), 7 }
   0xf   : > { %1562 = vmatprep.subr.msk.bf16.mxu0 %vm2322_vm0, %v1384_v0  ;;  %v357_v3 = vsel %vm2322_vm0, %v1384_v0, 0  ;;  %1563 = vmatprep.subr.msk.bf16.mxu1 %vm2322_vm0, %v298_v1  ;;  %v425_v4 = vsel %vm2322_vm0, %v298_v1, 0  ;;  %v1726_v7 = vadd.s32 2, %v1723_v6  ;;  %vm268_vm1 = vcmp.ge.s32.totalorder %v1723_v6, 1  ;;  %v1733_v8 = vld [vmem:[%s2313_s1 + $0x4] sm:$0x3] }
  0x10   : > { %1509 = vmatpush3.bf16.msra.mxu0 %v357_v3  ;;  %1515 = vmatpush3.bf16.msra.mxu1 %v425_v4  ;;  %v231_v5 = vshrl.u32 %v230_v2, 7  ;;  %vm272_vm2 = vcmp.le.s32.totalorder %v1723_v6, 16  ;;  %v1742_v10 = vld [vmem:[%s2313_s1 + $0x6] sm:$0x3]  ;;  %s1571_s6 = smul.u32 144, %s2426_s26  ;;  %v1807_v29 = vadd.s32 4, %v1723_v6 }
  0x11   : > { %1564 = vmatprep.subr.msk.bf16.mxu0 %vm2322_vm0, %v1733_v8  ;;  %vm269_vm3 = vcmp.ge.s32.totalorder %v1726_v7, 1  ;;  %vm273_vm4 = vcmp.le.s32.totalorder %v1726_v7, 16  ;;  %1565 = vmatprep.subr.msk.bf16.mxu1 %vm2322_vm0, %v1742_v10  ;;  %vm1749_vm5 = vmand %vm268_vm1, %vm272_vm2  ;;  %v1762_v13 = vld [vmem:[%s2314_s2] ss:$0 sm:$0xff]  ;;  %v1810_v30 = vadd.s32 6, %v1723_v6  ;;  %vm348_vm14 = vcmask 31744  }
  0x12   : > { %v1735_v9 = vmul.u32 2, %v231_v5  ;;  %s214_s10 = scalar_lea.vmem %s2312_s0, %s1571_s6  ;;  %vm1764_vm6 = vmand %vm269_vm3, %vm273_vm4  ;;  %v1771_v15 = vld [vmem:[%s2315_s3] ss:$0 sm:$0xff]  ;;  %v942_v45 = vadd.s32 2, %v1726_v7  ;;  %v2339_v2 = vmov 0  ;;  %v603_v11 = vadd.s32 1, %v1723_v6 }
  0x13   : > { %s1773_s22 = scalar_lea.vmem %s214_s10, %s1460_s7  ;;  %v604_v14 = vadd.s32 1, %v1726_v7  ;;  %v605_v54 = vadd.s32 1, %v1807_v29  ;;  %s1371_s7 = sshll.u32 %s1634_s15, 2 }
  0x14   : > { %v1754_v12 = vadd.s32 1, %v1735_v9  ;;  %v1380_v16 = vld [vmem:[%s1773_s22 + $0x90] sm:$0xff]  ;;  %v1381_v17 = vld [vmem:[%s1773_s22 + $0xa0] sm:$0xff]  ;;  %vm2321_vm12 = vcmp.ge.s32.totalorder %v1735_v9, 1  ;;  %v1814_v34 = vadd.s32 2, %v1735_v9  ;;  %vm2317_vm1 = vcmp.le.s32.totalorder %v1735_v9, 16 }
  0x15   : > { %v305_v18 = vmul.f32 %v1380_v16, %v1762_v13  ;;  %v306_v19 = vmul.f32 %v1381_v17, %v1762_v13  ;;  %v240_v20 = vld [vmem:[%s1773_s22] sm:$0xff]  ;;  %v241_v21 = vld [vmem:[%s1773_s22 + $0x10] sm:$0xff]  ;;  %vm281_vm15 = vmand %vm1749_vm5, %vm2321_vm12  ;;  %p219_p7 = scmp.lt.s32.totalorder %s1371_s7, 7  ;;  %s2428_s16 = smov (!%p217_p6, %s1638_s16), 1 }
  0x16   : > { %vm2320_vm7 = vcmp.ge.s32.totalorder %v1754_v12, 1  ;;  %vm2318_vm9 = vcmp.le.s32.totalorder %v1754_v12, 16  ;;  %v250_v22 = vmul.f32 %v1762_v13, %v240_v20  ;;  %v1441_v26 = vld [vmem:[%s1773_s22 + $0xb0] sm:$0xff]  ;;  %v251_v27 = vmul.f32 %v1762_v13, %v241_v21  ;;  %v1383_v31 = vld [vmem:[%s1773_s22 + $0xc0] sm:$0xff]  ;;  %vm282_vm2 = vmand %vm1764_vm6, %vm2321_vm12  ;;  %s1372_s15 = sshll.u32 %s2428_s16, 3 }
  0x17   : > { %vm319_vm8 = vmand %vm1749_vm5, %vm2320_vm7  ;;  %v309_v23 = vadd.f32 %v1771_v15, %v305_v18  ;;  %v310_v24 = vadd.f32 %v1771_v15, %v306_v19  ;;  %v1049_v36 = vmul.f32 %v1441_v26, %v1762_v13  ;;  %v1430_v41 = vld [vmem:[%s1773_s22 + $0x20] sm:$0xff]  ;;  %v308_v42 = vmul.f32 %v1383_v31, %v1762_v13  ;;  %v243_v44 = vld [vmem:[%s1773_s22 + $0x30] sm:$0xff]  ;;  %s2430_s7 = smov (!%p219_p7, %s1371_s7), 7 }
  0x18   : > { %vm320_vm10 = vmand %vm1764_vm6, %vm2320_vm7  ;;  %v260_v28 = vadd.f32 %v1771_v15, %v250_v22  ;;  %v261_v35 = vadd.f32 %v1771_v15, %v251_v27  ;;  %vm2319_vm3 = vcmp.ge.s32.totalorder %v1814_v34, 1  ;;  %v476_v46 = vld [vmem:[%s1773_s22 + $0x1] sm:$0xff]  ;;  %v252_v49 = vmul.f32 %v1430_v41, %v1762_v13  ;;  %v477_v50 = vld [vmem:[%s1773_s22 + $0x11] sm:$0xff]  ;;  %s222_s8 = sadd.s32 %s1372_s15, %s2430_s7 }
  0x19   : > { %vm1796_vm11 = vmand %vm319_vm8, %vm2318_vm9  ;;  %v313_v32 = vmax.f32 %v309_v23, 0.0  ;;  %v314_v33 = vmax.f32 %v310_v24, 0.0  ;;  %vm270_vm8 = vcmp.ge.s32.totalorder %v1807_v29, 1  ;;  %v1844_v47 = vadd.f32 %v1771_v15, %v1049_v36  ;;  %v1399_v1 = vld [vmem:[%s1773_s22 + $0x120] sm:$0xff]  ;;  %v1400_v4 = vld [vmem:[%s1773_s22 + $0x130] sm:$0xff]  ;;  %s1373_s9 = sshll.u32 %s222_s8, 2 }
  0x1a   : > { %vm325_vm13 = vmand %vm320_vm10, %vm2318_vm9  ;;  %v264_v37 = vmax.f32 %v260_v28, 0.0  ;;  %v265_v40 = vmax.f32 %v261_v35, 0.0  ;;  %vm271_vm10 = vcmp.ge.s32.totalorder %v1810_v30, 1  ;;  %v1855_v52 = vadd.f32 %v1771_v15, %v308_v42  ;;  %v478_v7 = vld [vmem:[%s1773_s22 + $0x21] sm:$0xff]  ;;  %v479_v24 = vld [vmem:[%s1773_s22 + $0x31] sm:$0xff]  ;;  %s224_s11 = scalar_lea.vmem %s2316_s4, %s1373_s9 }
  0x1b   : > { %v328_v38 = vsel %vm1796_vm11, %v313_v32, 0.0  ;;  %v1825_v39 = vsel %vm325_vm13, %v314_v33, 0.0  ;;  %vm286_vm4 = vmand %vm281_vm15, %vm2317_vm1  ;;  %vm274_vm13 = vcmp.le.s32.totalorder %v1807_v29, 16  ;;  %vm275_vm15 = vcmp.le.s32.totalorder %v1810_v30, 16  ;;  %v1946_v26 = vld [vmem:[%s2313_s1 + $0x8] sm:$0x3] }
  0x1c   : > { %v1461_v43 = vpack.c.bf16 %v1825_v39, %v328_v38  ;;  %vm287_vm11 = vmand %vm282_vm2, %vm2317_vm1  ;;  %v290_v48 = vsel %vm286_vm4, %v264_v37, 0.0  ;;  %v253_v53 = vmul.f32 %v1762_v13, %v243_v44  ;;  %v480_v56 = vmul.f32 %v1762_v13, %v476_v46  ;;  %v1401_v38 = vld [vmem:[%s1773_s22 + $0x140] sm:$0xff]  ;;  %v1402_v46 = vld [vmem:[%s1773_s22 + $0x150] sm:$0xff] }
  0x1d   : > { %v1851_v51 = vsel %vm287_vm11, %v265_v40, 0.0  ;;  %vm1862_vm2 = vmand %vm1749_vm5, %vm2319_vm3  ;;  %vm945_vm11 = vcmp.ge.s32.totalorder %v942_v45, 1  ;;  %vm948_vm1 = vcmp.le.s32.totalorder %v942_v45, 16  ;;  %v481_v59 = vmul.f32 %v1762_v13, %v477_v50  ;;  %v1409_v57 = vld [vmem:[%s1773_s22 + $0x1b0] sm:$0xff] }
  0x1e   : > { %1510 = vmatprep.mubr.msk.bf16.mxu0 %vm348_vm14, %v1461_v43  ;;  %v1463_v55 = vpack.c.bf16 %v1851_v51, %v290_v48  ;;  %vm1872_vm4 = vmand %vm1764_vm6, %vm2319_vm3  ;;  %v1057_v60 = vmax.f32 %v1844_v47, 0.0  ;;  %v1892_v62 = vadd.f32 %v1771_v15, %v252_v49  ;;  %v316_v63 = vmax.f32 %v1855_v52, 0.0 }
  0x1f   : > { %vm1878_vm5 = vmand %vm270_vm8, %vm274_vm13  ;;  %v1900_v0 = vadd.f32 %v1771_v15, %v253_v53  ;;  %v484_v3 = vadd.f32 %v1771_v15, %v480_v56  ;;  %v485_v5 = vadd.f32 %v1771_v15, %v481_v59  ;;  %v591_v18 = vmul.f32 %v1399_v1, %v1762_v13 }
  0x20   : > { %1516 = vmatprep.mubr.msk.bf16.mxu1 %vm348_vm14, %v1463_v55  ;;  %vm1887_vm6 = vmand %vm271_vm10, %vm275_vm15  ;;  %v266_v17 = vmax.f32 %v1892_v62, 0.0  ;;  %v592_v6 = vmul.f32 %v1400_v4, %v1762_v13  ;;  %v530_v22 = vsel %vm2322_vm0, %v1733_v8, 0  ;;  %vm608_vm3 = vcmp.ge.s32.totalorder %v604_v14, 1  ;;  %v1410_v4 = vld [vmem:[%s1773_s22 + $0x1c0] sm:$0xff] }
  0x21   : > { %vm321_vm8 = vmand %vm1878_vm5, %vm2320_vm7  ;;  %v267_v20 = vmax.f32 %v1900_v0, 0.0  ;;  %v488_v23 = vmax.f32 %v484_v3, 0.0  ;;  %v489_v25 = vmax.f32 %v485_v5, 0.0  ;;  %v595_v27 = vadd.f32 %v1771_v15, %v591_v18 }
  0x22   : > { %vm1903_vm13 = vmand %vm945_vm11, %vm948_vm1  ;;  %v482_v28 = vmul.f32 %v1762_v13, %v478_v7  ;;  %v596_v32 = vadd.f32 %v1771_v15, %v592_v6  ;;  %v483_v33 = vmul.f32 %v1762_v13, %v479_v24  ;;  %v654_v36 = vsel %vm2322_vm0, %v1742_v10, 0  ;;  %v1983_v10 = vld [vmem:[%s2313_s1 + $0xa] sm:$0x3]  ;;  %v1418_v6 = vld [vmem:[%s1773_s22 + $0x121] sm:$0xff] }
  0x23   : > { %v2340_v2 = vsel %vm1903_vm13, 4294967295, %v2339_v2  ;;  %vm322_vm10 = vmand %vm1887_vm6, %vm2320_vm7  ;;  %v599_v43 = vmax.f32 %v595_v27, 0.0  ;;  %v593_v53 = vmul.f32 %v1401_v38, %v1762_v13  ;;  %v594_v55 = vmul.f32 %v1402_v46, %v1762_v13  ;;  %v1411_v38 = vld [vmem:[%s1773_s22 + $0x1d0] sm:$0xff] }
  0x24   : > { %vm326_vm15 = vmand %vm321_vm8, %vm2318_vm9  ;;  %v1993_v45 = vadd.f32 %v1771_v15, %v482_v28  ;;  %v600_v49 = vmax.f32 %v596_v32, 0.0  ;;  %v2009_v50 = vadd.f32 %v1771_v15, %v483_v33  ;;  %v606_v56 = vadd.s32 1, %v1810_v30 }
  0x25   : > { %vm327_vm1 = vmand %vm322_vm10, %vm2318_vm9  ;;  %v330_v16 = vsel %vm326_vm15, %v1057_v60, 0.0  ;;  %vm2324_vm10 = vcmp.le.s32.totalorder %v1814_v34, 16  ;;  %vm2341_vm15 = vcmp.le.s32.totalorder %v1735_v9, 16  ;;  %vm607_vm9 = vcmp.ge.s32.totalorder %v603_v11, 1 }
  0x26   : > { %v331_v19 = vsel %vm327_vm1, %v316_v63, 0.0  ;;  %vm283_vm11 = vmand %vm1878_vm5, %vm2321_vm12  ;;  %v490_v3 = vmax.f32 %v1993_v45, 0.0  ;;  %v598_v58 = vadd.f32 %v1771_v15, %v594_v55  ;;  %v716_v7 = vmul.f32 %v1410_v4, %v1762_v13  ;;  %v1420_v4 = vld [vmem:[%s1773_s22 + $0x141] sm:$0xff] }
  0x27   : > { %v1462_v21 = vpack.c.bf16 %v331_v19, %v330_v16  ;;  %vm284_vm8 = vmand %vm1887_vm6, %vm2321_vm12  ;;  %v1452_v16 = vld [vmem:[%s1773_s22 + $0x41] sm:$0xff]  ;;  %v715_v19 = vmul.f32 %v1409_v57, %v1762_v13  ;;  %v821_v27 = vmul.f32 %v1418_v6, %v1762_v13  ;;  %v823_v6 = vmul.f32 %v1420_v4, %v1762_v13 }
  0x28   : > { %vm288_vm1 = vmand %vm283_vm11, %vm2341_vm15  ;;  %vm611_vm11 = vcmp.le.s32.totalorder %v603_v11, 16  ;;  %v491_v11 = vmax.f32 %v2009_v50, 0.0  ;;  %v943_v62 = vadd.s32 2, %v1807_v29 }
  0x29   : > { %1511 = vmatmul.mubr.msk.bf16.vlgmr.msra.gmra.mxu0 %vm348_vm14, %v1462_v21  ;;  %vm2342_vm7 = vmmov %vm2341_vm15  ;;  %v292_v8 = vsel %vm288_vm1, %v266_v17, 0.0  ;;  %v1419_v21 = vld [vmem:[%s1773_s22 + $0x131] sm:$0xff]  ;;  %v719_v32 = vadd.f32 %v1771_v15, %v715_v19 }
  0x2a   : > { %vm289_vm12 = vmand %vm284_vm8, %vm2342_vm7  ;;  %1521 = vmatpush3.bf16.msra.mxu0 %v530_v22  ;;  %vm612_vm7 = vcmp.le.s32.totalorder %v604_v14, 16  ;;  %v597_v14 = vadd.f32 %v1771_v15, %v593_v53  ;;  %v1155_v22 = vmul.f32 %v1452_v16, %v1762_v13  ;;  %v717_v53 = vmul.f32 %v1411_v38, %v1762_v13  ;;  %v2141_v16 = vld [vmem:[%s2313_s1 + $0xe] sm:$0x3] }
  0x2b   : > { %v293_v31 = vsel %vm289_vm12, %v267_v20, 0.0  ;;  %vm499_vm15 = vmand %vm1862_vm2, %vm2324_vm10  ;;  %1566 = vmatprep.subr.msk.bf16.mxu0 %vm2322_vm0, %v1946_v26  ;;  %v723_v48 = vmax.f32 %v719_v32, 0.0 }
  0x2c   : > { %v1464_v35 = vpack.c.bf16 %v293_v31, %v292_v8  ;;  %vm500_vm12 = vmand %vm1872_vm4, %vm2324_vm10  ;;  %v503_v37 = vsel %vm499_vm15, %v488_v23, 0.0  ;;  %v601_v24 = vmax.f32 %v597_v14, 0.0  ;;  %v2078_v33 = vadd.f32 %v1771_v15, %v1155_v22  ;;  %v1421_v14 = vld [vmem:[%s1773_s22 + $0x151] sm:$0xff] }
  0x2d   : > { %v1972_v40 = vsel %vm500_vm12, %v489_v25, 0.0  ;;  %vm1976_vm2 = vmand %vm607_vm9, %vm611_vm11  ;;  %vm2347_vm9 = vcmp.ge.s32.totalorder %v1735_v9, 1  ;;  %v721_v19 = vadd.f32 %v1771_v15, %v717_v53 }
  0x2e   : > { %1517 = vmatmul.mubr.msk.bf16.vlgmr.msra.gmra.mxu1 %vm348_vm14, %v1464_v35  ;;  %v1465_v42 = vpack.c.bf16 %v1972_v40, %v503_v37  ;;  %vm1988_vm4 = vmand %vm608_vm3, %vm612_vm7  ;;  %vm2352_vm7 = vcmp.le.s32.totalorder %v1735_v9, 16  ;;  %v602_v35 = vmax.f32 %v598_v58, 0.0  ;;  %v2089_v37 = vld [vmem:[%s2313_s1 + $0xc] sm:$0x3] }
  0x2f   : > { %vm2000_vm8 = vmand %vm1903_vm13, %vm2347_vm9  ;;  %1527 = vmatpush3.bf16.msra.mxu1 %v654_v36  ;;  %v822_v36 = vmul.f32 %v1419_v21, %v1762_v13  ;;  %v824_v21 = vmul.f32 %v1421_v14, %v1762_v13 }
  0x30   : > { %vm2350_vm3 = vmmov %vm2347_vm9  ;;  %1522 = vmatprep.mubr.msk.bf16.mxu0 %vm348_vm14, %v1465_v42  ;;  %1567 = vmatprep.subr.msk.bf16.mxu1 %vm2322_vm0, %v1983_v10  ;;  %vm2353_vm9 = vcmp.ge.s32.totalorder %v1754_v12, 1 }
  0x31   : > { %vm619_vm1 = vmand %vm1976_vm2, %vm2350_vm3  ;;  %v826_v57 = vadd.f32 %v1771_v15, %v822_v36  ;;  %v828_v32 = vadd.f32 %v1771_v15, %v824_v21  ;;  %v944_v36 = vadd.s32 2, %v1810_v30 }
  0x32   : > { %vm2351_vm11 = vmmov %vm2350_vm3 }
  0x33   : > { %vm620_vm15 = vmand %vm1988_vm4, %vm2351_vm11 }
  0x34   : > { %vm623_vm12 = vmand %vm619_vm1, %vm2352_vm7  ;;  %vm2357_vm1 = vcmp.ge.s32.totalorder %v1814_v34, 1 }
  0x35   : > { %vm2029_vm3 = vmand %vm1903_vm13, %vm2353_vm9  ;;  %v627_v1 = vsel %vm623_vm12, %v599_v43, 0.0  ;;  %vm609_vm12 = vcmp.ge.s32.totalorder %v605_v54, 1  ;;  %v1412_v43 = vld [vmem:[%s1773_s22 + $0x1e0] sm:$0xff] }
  0x36   : > { %vm2356_vm11 = vmmov %vm2352_vm7 }
  0x37   : > { %vm624_vm0 = vmand %vm620_vm15, %vm2356_vm11  ;;  %vm613_vm11 = vcmp.le.s32.totalorder %v605_v54, 16 }
  0x38   : > { %v628_v5 = vsel %vm624_vm0, %v600_v49, 0.0  ;;  %vm496_vm7 = vmand %vm1878_vm5, %vm2357_vm1  ;;  %vm610_vm5 = vcmp.ge.s32.totalorder %v606_v56, 1  ;;  %v825_v49 = vadd.f32 %v1771_v15, %v821_v27 }
  0x39   : > { %v1467_v18 = vpack.c.bf16 %v628_v5, %v627_v1  ;;  %vm2358_vm9 = vmmov %vm2357_vm1  ;;  %vm614_vm1 = vcmp.le.s32.totalorder %v606_v56, 16  ;;  %v718_v1 = vmul.f32 %v1412_v43, %v1762_v13 }
  0x3a   : > { %vm497_vm15 = vmand %vm1887_vm6, %vm2358_vm9 }
  0x3b   : > { %vm501_vm0 = vmand %vm496_vm7, %vm2324_vm10  ;;  %1528 = vmatprep.mubr.msk.bf16.mxu1 %vm348_vm14, %v1467_v18  ;;  %vm2361_vm7 = vcmask 1041408   ;;  %v829_v18 = vmax.f32 %v825_v49, 0.0 }
  0x3c   : > { %vm502_vm13 = vmand %vm497_vm15, %vm2324_vm10  ;;  %v505_v61 = vsel %vm501_vm0, %v490_v3, 0.0  ;;  %v762_v8 = vsel %vm2361_vm7, %v1946_v26, 0  ;;  %v720_v26 = vadd.f32 %v1771_v15, %v716_v7  ;;  %v830_v7 = vmax.f32 %v826_v57, 0.0 }
  0x3d   : > { %v506_v23 = vsel %vm502_vm13, %v491_v11, 0.0  ;;  %vm2065_vm6 = vmand %vm609_vm12, %vm613_vm11  ;;  %vm2364_vm13 = vcmp.ge.s32.totalorder %v1735_v9, 1  ;;  %vm2365_vm12 = vcmp.le.s32.totalorder %v1735_v9, 16 }
  0x3e   : > { %v1466_v28 = vpack.c.bf16 %v506_v23, %v505_v61  ;;  %vm2072_vm9 = vmand %vm610_vm5, %vm614_vm1  ;;  %v724_v56 = vmax.f32 %v720_v26, 0.0  ;;  %v722_v61 = vadd.f32 %v1771_v15, %v718_v1  ;;  %v725_v23 = vmax.f32 %v721_v19, 0.0  ;;  %v1443_v26 = vld [vmem:[%s1773_s22 + $0xd0] sm:$0xff] }
  0x3f   : > { %vm621_vm15 = vmand %vm2065_vm6, %vm2364_vm13  ;;  %v1051_v47 = vmul.f32 %v1443_v26, %v1762_v13 }
  0x40   : > { %vm2096_vm11 = vmand %vm2000_vm8, %vm2365_vm12  ;;  %1523 = vmatmul.mubr.msk.bf16.vlgmr.msra.gmra.mxu0 %vm348_vm14, %v1466_v28  ;;  %vm2371_vm8 = vcmask 1041408   ;;  %v726_v28 = vmax.f32 %v722_v61, 0.0 }
  0x41   : > { %vm2368_vm0 = vmmov %vm2364_vm13  ;;  %1533 = vmatpush3.bf16.msra.mxu0 %v762_v8  ;;  %v1432_v8 = vld [vmem:[%s1773_s22 + $0x40] sm:$0xff]  ;;  %v961_v44 = vsel %vm2096_vm11, %v266_v17, 0.0  ;;  %vm2387_vm11 = vcmp.le.s32.totalorder %v1754_v12, 16 }
  0x42   : > { %vm622_vm5 = vmand %vm2072_vm9, %vm2368_vm0  ;;  %1568 = vmatprep.subr.msk.bf16.mxu0 %vm2371_vm8, %v2089_v37  ;;  %v933_v17 = vmul.f32 %v1432_v8, %v1762_v13  ;;  %v1474_v42 = vpack.c.bf16 %v961_v44, %v1851_v51 }
  0x43   : > { %vm2369_vm1 = vmmov %vm2365_vm12  ;;  %vm2372_vm12 = vcmp.le.s32.totalorder %v1754_v12, 16 }
  0x44   : > { %vm625_vm7 = vmand %vm621_vm15, %vm2369_vm1  ;;  %vm2375_vm15 = vcmp.ge.s32.totalorder %v1754_v12, 1  ;;  %v937_v25 = vadd.f32 %v1771_v15, %v933_v17 }
  0x45   : > { %vm2370_vm13 = vmmov %vm2369_vm1  ;;  %v629_v46 = vsel %vm625_vm7, %v601_v24, 0.0  ;;  %v827_v24 = vadd.f32 %v1771_v15, %v823_v6 }
  0x46   : > { %vm626_vm10 = vmand %vm622_vm5, %vm2370_vm13 }
  0x47   : > { %vm2118_vm0 = vmand %vm2029_vm3, %vm2372_vm12  ;;  %v630_v55 = vsel %vm626_vm10, %v602_v35, 0.0  ;;  %v831_v43 = vmax.f32 %v827_v24, 0.0 }
  0x48   : > { %vm727_vm5 = vmand %vm1976_vm2, %vm2375_vm15  ;;  %v1468_v5 = vpack.c.bf16 %v630_v55, %v629_v46  ;;  %v1067_v38 = vsel %vm2118_vm0, %v1057_v60, 0.0  ;;  %v1453_v60 = vld [vmem:[%s2313_s1 + $0x10] sm:$0x3] }
  0x49   : > { %vm2376_vm1 = vmmov %vm2371_vm8  ;;  %v1477_v31 = vpack.c.bf16 %v1067_v38, %v1825_v39  ;;  %v1055_v39 = vadd.f32 %v1771_v15, %v1051_v47 }
  0x4a   : > { %v868_v59 = vsel %vm2376_vm1, %v1983_v10, 0  ;;  %vm2377_vm3 = vmmov %vm2375_vm15  ;;  %1529 = vmatmul.mubr.msk.bf16.vlgmr.msra.gmra.mxu1 %vm348_vm14, %v1468_v5  ;;  %vm2380_vm15 = vcmp.ge.s32.totalorder %v1814_v34, 1 }
  0x4b   : > { %vm728_vm10 = vmand %vm1988_vm4, %vm2377_vm3  ;;  %1539 = vmatpush3.bf16.msra.mxu1 %v868_v59  ;;  %v1059_v1 = vmax.f32 %v1055_v39, 0.0 }
  0x4c   : > { %vm2378_vm7 = vmmov %vm2372_vm12 }
  0x4d   : > { %vm731_vm13 = vmand %vm727_vm5, %vm2378_vm7 }
  0x4e   : > { %vm2379_vm8 = vmmov %vm2378_vm7  ;;  %v735_v10 = vsel %vm731_vm13, %v723_v48, 0.0  ;;  %vm2383_vm7 = vcmp.le.s32.totalorder %v1814_v34, 16  ;;  %v832_v48 = vmax.f32 %v828_v32, 0.0 }
  0x4f   : > { %vm732_vm12 = vmand %vm728_vm10, %vm2379_vm8  ;;  %vm2382_vm10 = vcmask 1041408  }
  0x50   : > { %v736_v58 = vsel %vm732_vm12, %v724_v56, 0.0  ;;  %vm833_vm5 = vmand %vm1976_vm2, %vm2380_vm15  ;;  %1569 = vmatprep.subr.msk.bf16.mxu1 %vm2382_vm10, %v2141_v16  ;;  %v941_v56 = vmax.f32 %v937_v25, 0.0 }
  0x51   : > { %v1469_v22 = vpack.c.bf16 %v736_v58, %v735_v10  ;;  %vm2381_vm1 = vmmov %vm2380_vm15 }
  0x52   : > { %vm834_vm3 = vmand %vm1988_vm4, %vm2381_vm1  ;;  %vm2385_vm4 = vcmp.ge.s32.totalorder %v1754_v12, 1 }
  0x53   : > { %vm837_vm13 = vmand %vm833_vm5, %vm2383_vm7  ;;  %1534 = vmatprep.mubr.msk.bf16.mxu0 %vm348_vm14, %v1469_v22 }
  0x54   : > { %vm2384_vm2 = vmmov %vm2383_vm7  ;;  %v841_v41 = vsel %vm837_vm13, %v829_v18, 0.0  ;;  %vm2389_vm7 = vcmp.ge.s32.totalorder %v1814_v34, 1 }
  0x55   : > { %vm838_vm8 = vmand %vm834_vm3, %vm2384_vm2  ;;  %vm2390_vm2 = vcmask 1041408  }
  0x56   : > { %v842_v27 = vsel %vm838_vm8, %v830_v7, 0.0  ;;  %vm729_vm12 = vmand %vm2065_vm6, %vm2385_vm4  ;;  %v987_v30 = vsel %vm2390_vm2, %v2089_v37, 0 }
  0x57   : > { %v1471_v35 = vpack.c.bf16 %v842_v27, %v841_v41  ;;  %vm2386_vm15 = vmmov %vm2385_vm4  ;;  %vm946_vm4 = vcmp.ge.s32.totalorder %v943_v62, 1 }
  0x58   : > { %vm730_vm5 = vmand %vm2072_vm9, %vm2386_vm15  ;;  %vm2392_vm15 = vcmp.le.s32.totalorder %v1814_v34, 16 }
  0x59   : > { %vm733_vm1 = vmand %vm729_vm12, %vm2387_vm11  ;;  %1540 = vmatprep.mubr.msk.bf16.mxu1 %vm348_vm14, %v1471_v35  ;;  %vm949_vm12 = vcmp.le.s32.totalorder %v943_v62, 16 }
  0x5a   : > { %vm2388_vm3 = vmmov %vm2387_vm11  ;;  %v737_v29 = vsel %vm733_vm1, %v725_v23, 0.0  ;;  %vm950_vm11 = vcmp.le.s32.totalorder %v944_v36, 16 }
  0x5b   : > { %vm734_vm10 = vmand %vm730_vm5, %vm2388_vm3 }
  0x5c   : > { %v738_v46 = vsel %vm734_vm10, %v726_v28, 0.0  ;;  %vm835_vm13 = vmand %vm2065_vm6, %vm2389_vm7  ;;  %vm947_vm6 = vcmp.ge.s32.totalorder %v944_v36, 1 }
  0x5d   : > { %v1470_v51 = vpack.c.bf16 %v738_v46, %v737_v29  ;;  %vm2391_vm0 = vmmov %vm2389_vm7 }
  0x5e   : > { %vm836_vm8 = vmand %vm2072_vm9, %vm2391_vm0 }
  0x5f   : > { %vm839_vm5 = vmand %vm835_vm13, %vm2392_vm15  ;;  %1535 = vmatmul.mubr.msk.bf16.vlgmr.msra.gmra.mxu0 %vm348_vm14, %v1470_v51 }
  0x60   : > { %vm2393_vm1 = vmmov %vm2392_vm15  ;;  %v843_v13 = vsel %vm839_vm5, %v831_v43, 0.0  ;;  %1545 = vmatpush3.bf16.msra.mxu0 %v987_v30  ;;  %1546 = vmatprep.mubr.msk.bf16.mxu0 %vm348_vm14, %v1474_v42 }
  0x61   : > { %vm840_vm3 = vmand %vm836_vm8, %vm2393_vm1 }
  0x62   : > { %v844_v37 = vsel %vm840_vm3, %v832_v48, 0.0  ;;  %vm2216_vm9 = vmand %vm946_vm4, %vm949_vm12  ;;  %vm2402_vm12 = vcmp.le.s32.totalorder %v1735_v9, 16 }
  0x63   : > { %v1472_v53 = vpack.c.bf16 %v844_v37, %v843_v13  ;;  %vm2396_vm10 = vmmov %vm2390_vm2 }
  0x64   : > { %v1093_v54 = vsel %vm2396_vm10, %v2141_v16, 0  ;;  %vm2397_vm7 = vmmov %vm2390_vm2  ;;  %vm2400_vm2 = vcmp.ge.s32.totalorder %v1735_v9, 1 }
  0x65   : > { %1570 = vmatprep.subr.msk.bf16.mxu0 %vm2397_vm7, %v1453_v60  ;;  %vm2223_vm13 = vmand %vm947_vm6, %vm950_vm11  ;;  %1541 = vmatmul.mubr.msk.bf16.vlgmr.msra.gmra.mxu1 %vm348_vm14, %v1472_v53  ;;  %vm2404_vm11 = vcmp.ge.s32.totalorder %v1754_v12, 1  ;;  %v1197_v5 = vsel %vm2397_vm7, %v1453_v60, 0 }
  0x66   : > { %vm955_vm0 = vmand %vm2216_vm9, %vm2400_vm2  ;;  %1551 = vmatpush3.bf16.msra.mxu1 %v1093_v54  ;;  %1552 = vmatprep.mubr.msk.bf16.mxu1 %vm348_vm14, %v1477_v31 }
  0x67   : > { %vm2401_vm8 = vmmov %vm2400_vm2  ;;  %vm2406_vm2 = vcmp.le.s32.totalorder %v1754_v12, 16  ;;  %v1163_v12 = vmax.f32 %v2078_v33, 0.0 }
  0x68   : > { %vm956_vm4 = vmand %vm2223_vm13, %vm2401_vm8 }
  0x69   : > { %vm958_vm15 = vmand %vm955_vm0, %vm2402_vm12 }
  0x6a   : > { %vm2403_vm5 = vmmov %vm2402_vm12  ;;  %v962_v57 = vsel %vm958_vm15, %v267_v20, 0.0  ;;  %vm2408_vm12 = vcmp.ge.s32.totalorder %v1814_v34, 1  ;;  %vm2409_vm15 = vnez %v2340_v2 }
  0x6b   : > { %vm959_vm6 = vmand %vm956_vm4, %vm2403_vm5 }
  0x6c   : > { %v963_v15 = vsel %vm959_vm6, %v941_v56, 0.0  ;;  %vm1061_vm1 = vmand %vm2216_vm9, %vm2404_vm11  ;;  %vm2410_vm6 = vcmp.le.s32.totalorder %v1814_v34, 16 }
  0x6d   : > { %v1475_v4 = vpack.c.bf16 %v963_v15, %v962_v57  ;;  %vm2405_vm3 = vmmov %vm2404_vm11 }
  0x6e   : > { %vm1062_vm10 = vmand %vm2223_vm13, %vm2405_vm3 }
  0x6f   : > { %vm1064_vm0 = vmand %vm1061_vm1, %vm2406_vm2  ;;  %1547 = vmatmul.mubr.msk.bf16.vlgmr.msra.gmra.mxu0 %vm348_vm14, %v1475_v4 }
  0x70   : > { %vm2407_vm8 = vmmov %vm2406_vm2  ;;  %v1068_v9 = vsel %vm1064_vm0, %v316_v63, 0.0  ;;  %1557 = vmatpush3.bf16.msra.mxu0 %v1197_v5 }
  0x71   : > { %vm1065_vm4 = vmand %vm1062_vm10, %vm2407_vm8 }
  0x72   : > { %v1069_v0 = vsel %vm1065_vm4, %v1059_v1, 0.0  ;;  %vm1164_vm5 = vmand %vm2409_vm15, %vm2408_vm12 }
  0x73   : > { %v1478_v20 = vpack.c.bf16 %v1069_v0, %v1068_v9  ;;  %vm1167_vm11 = vmand %vm1164_vm5, %vm2410_vm6 }
  0x74   : > { %v1171_v59 = vsel %vm1167_vm11, %v490_v3, 0.0  ;;  %vm2411_vm1 = vmmov %vm2408_vm12 }
  0x75   : > { %vm1165_vm3 = vmand %vm2216_vm9, %vm2411_vm1  ;;  %1553 = vmatmul.mubr.msk.bf16.vlgmr.msra.gmra.mxu1 %vm348_vm14, %v1478_v20  ;;  %v1479_v52 = vpack.c.bf16 %v1171_v59, %v1972_v40 }
  0x76   : > { %vm2412_vm10 = vmmov %vm2411_vm1 }
  0x77   : > { %vm1166_vm7 = vmand %vm2223_vm13, %vm2412_vm10  ;;  %1558 = vmatprep.mubr.msk.bf16.mxu0 %vm348_vm14, %v1479_v52 }
  0x78   : > { %vm2413_vm2 = vmmov %vm2410_vm6 }
  0x79   : > { %vm1168_vm0 = vmand %vm1165_vm3, %vm2413_vm2 }
  0x7a   : > { %vm2414_vm8 = vmmov %vm2413_vm2  ;;  %v1172_v63 = vsel %vm1168_vm0, %v491_v11, 0.0 }
  0x7b   : > { %vm1169_vm4 = vmand %vm1166_vm7, %vm2414_vm8 }
  0x7c   : > { %v1173_v2 = vsel %vm1169_vm4, %v1163_v12, 0.0 }
  0x7d   : > { %v1480_v45 = vpack.c.bf16 %v1173_v2, %v1172_v63 }
  0x7f   : > { %1559 = vmatmul.mubr.msk.bf16.vlgmr.msra.gmra.mxu0 %vm348_vm14, %v1480_v45  ;;  %vm1256_vm14 = vcmask 60416  }
  0xe9   : > { %v1512_v40 = vpop.f32.mrf.mxu0 }
  0xeb   : > { %v393_v33 = vpop.f32.mrf.mxu0 }
  0xed   : > { %v1513_v16 = vpop.f32.mrf.mxu0 }
  0xee   : > { %v1518_v3 = vpop.f32.mrf.mxu1 }
  0xef   : > { %v396_v18 = vpop.f32.mrf.mxu0  ;;  %v470_v41 = vadd.f32 %v1518_v3, %v1512_v40 }
  0xf0   : > { %v461_v14 = vpop.f32.mrf.mxu1 }
  0xf1   : > { %v462_v24 = vadd.f32 %v461_v14, %v393_v33 }
  0xf2   : > { %v1519_v10 = vpop.f32.mrf.mxu1 }
  0xf3   : > { %v473_v28 = vadd.f32 %v1519_v10, %v1513_v16 }
  0xf4   : > { %v464_v19 = vpop.f32.mrf.mxu1 }
  0xf5   : > { %v465_v26 = vadd.f32 %v464_v19, %v396_v18 }
 0x100   : > { %v1524_v6 = vpop.f32.mrf.mxu0 }
 0x101   : > { %v583_v8 = vadd.f32 %v1524_v6, %v470_v41 }
 0x102   : > { %v566_v34 = vpop.f32.mrf.mxu0 }
 0x103   : > { %v581_v32 = vadd.f32 %v566_v34, %v462_v24 }
 0x104   : > { %v1525_v50 = vpop.f32.mrf.mxu0 }
 0x105   : > { %v584_v36 = vadd.f32 %v1525_v50, %v473_v28 }
 0x106   : > { %v569_v61 = vpop.f32.mrf.mxu0 }
 0x107   : > { %v582_v29 = vadd.f32 %v569_v61, %v465_v26 }
 0x10a   : > { %v1530_v58 = vpop.f32.mrf.mxu1 }
 0x10b   : > { %v707_v17 = vadd.f32 %v1530_v58, %v583_v8 }
 0x10c   : > { %v690_v7 = vpop.f32.mrf.mxu1 }
 0x10d   : > { %v705_v42 = vadd.f32 %v690_v7, %v581_v32 }
 0x10e   : > { %v1531_v11 = vpop.f32.mrf.mxu1 }
 0x10f   : > { %v708_v30 = vadd.f32 %v1531_v11, %v584_v36 }
 0x110   : > { %v693_v21 = vpop.f32.mrf.mxu1 }
 0x111   : > { %v706_v60 = vadd.f32 %v693_v21, %v582_v29 }
 0x11f   : > { %v1536_v22 = vpop.f32.mrf.mxu0 }
 0x120   : > { %v815_v43 = vadd.f32 %v1536_v22, %v707_v17 }
 0x121   : > { %v798_v23 = vpop.f32.mrf.mxu0 }
 0x122   : > { %v813_v47 = vadd.f32 %v798_v23, %v705_v42 }
 0x123   : > { %v1537_v27 = vpop.f32.mrf.mxu0 }
 0x124   : > { %v816_v13 = vadd.f32 %v1537_v27, %v708_v30 }
 0x125   : > { %v1542_v44 = vpop.f32.mrf.mxu1  ;;  %v801_v62 = vpop.f32.mrf.mxu0 }
 0x126   : > { %v921_v25 = vadd.f32 %v1542_v44, %v815_v43  ;;  %v814_v53 = vadd.f32 %v801_v62, %v706_v60 }
 0x127   : > { %v904_v35 = vpop.f32.mrf.mxu1 }
 0x128   : > { %v919_v49 = vadd.f32 %v904_v35, %v813_v47 }
 0x129   : > { %v1543_v38 = vpop.f32.mrf.mxu1 }
 0x12a   : > { %v922_v39 = vadd.f32 %v1543_v38, %v816_v13 }
 0x12b   : > { %v907_v46 = vpop.f32.mrf.mxu1 }
 0x12c   : > { %v920_v15 = vadd.f32 %v907_v46, %v814_v53 }
 0x12f   : > { %v1548_v48 = vpop.f32.mrf.mxu0 }
 0x130   : > { %v1040_v54 = vadd.f32 %v1548_v48, %v921_v25 }
 0x131   : > { %v1023_v51 = vpop.f32.mrf.mxu0 }
 0x132   : > { %v1038_v57 = vadd.f32 %v1023_v51, %v919_v49 }
 0x133   : > { %v1549_v37 = vpop.f32.mrf.mxu0 }
 0x134   : > { %v1041_v4 = vadd.f32 %v1549_v37, %v922_v39 }
 0x135   : > { %v1554_v31 = vpop.f32.mrf.mxu1  ;;  %v1026_v56 = vpop.f32.mrf.mxu0 }
 0x136   : > { %v1146_v1 = vadd.f32 %v1554_v31, %v1040_v54  ;;  %v1039_v20 = vadd.f32 %v1026_v56, %v920_v15 }
 0x137   : > { %v1129_v55 = vpop.f32.mrf.mxu1 }
 0x138   : > { %v1144_v0 = vadd.f32 %v1129_v55, %v1038_v57 }
 0x139   : > { %v1555_v5 = vpop.f32.mrf.mxu1 }
 0x13a   : > { %v1147_v52 = vadd.f32 %v1555_v5, %v1041_v4 }
 0x13b   : > { %v1132_v45 = vpop.f32.mrf.mxu1 }
 0x13c   : > { %v1145_v3 = vadd.f32 %v1132_v45, %v1039_v20 }
 0x13f   : > { %v1560_v9 = vpop.f32.mrf.mxu0 }
 0x140   : > { %v1250_v59 = vadd.f32 %v1560_v9, %v1146_v1 }
 0x141   : > { %v1233_v12 = vpop.f32.mrf.mxu0 }
 0x142   : > { %v1254_v63 = vpack.c.bf16 %v1250_v59, %v1250_v59  ;;  %v1248_v2 = vadd.f32 %v1233_v12, %v1144_v0 }
 0x143   : > { %v1561_v40 = vpop.f32.mrf.mxu0 }
 0x144   : > { %1259 = vst.msk [vmem:[%s224_s11 + $0x8] sm:$0xf] %vm1256_vm14, %v1254_v63  ;;  %v1252_v33 = vpack.c.bf16 %v1248_v2, %v1248_v2  ;;  %v1251_v14 = vadd.f32 %v1561_v40, %v1147_v52 }
 0x145   : > { %v1236_v16 = vpop.f32.mrf.mxu0 }
 0x146   : > { %1257 = vst.msk [vmem:[%s224_s11] sm:$0xf] %vm1256_vm14, %v1252_v33  ;;  %v1255_v10 = vpack.c.bf16 %v1251_v14, %v1251_v14  ;;  %v1249_v18 = vadd.f32 %v1236_v16, %v1145_v3 }
 0x148   : > { %1260 = vst.msk [vmem:[%s224_s11 + $0xc] sm:$0xf] %vm1256_vm14, %v1255_v10  ;;  %v1253_v19 = vpack.c.bf16 %v1249_v18, %v1249_v18 }
 0x14a   : > { %1258 = vst.msk [vmem:[%s224_s11 + $0x4] sm:$0xf] %vm1256_vm14, %v1253_v19 }
 0x14b PF: > { %s14_s19 = sadd.s32 1, %s1650_s19   ;;  %s2415_s15 = smov %s1642_s17 }
 0x14c   : > { %p11_p8 = scmp.ge.s32.totalorder %s14_s19, 6   ;;  %s2416_s16 = smov %s1646_s18 }
 0x14d   : > { %s2417_s17 = smov %s2420_s20  ;;  %s2418_s18 = smov %s2424_s21 }
 0x14e   :  { %13 = sbr.rel (!%p11_p8) target bundleno = 3 (0x3), region = 80 }

// kernel: conv2x_forward.3
= control target key start
LH: loop header
LB: loop body
LE: loop exit
PB: predicated region body
PF: predicated region fallthrough
CT: control target
= control target key end

     0   :  { %s3122_s27 = smov 0   ;;  %s3124_s28 = smov 0   ;;  %s4127_s0 = inlined_call_operand.vmem [shape: bf16[2,10,10,8], index: 0, kind: input, shape index: {}]   ;;  %s4128_s1 = inlined_call_operand.vmem [shape: f32[2,10,10,8], index: 1, kind: input, shape index: {}]   ;;  %s4129_s2 = inlined_call_operand.vmem [shape: bf16[9,8,8], index: 2, kind: input, shape index: {}]   ;;  %s4130_s3 = inlined_call_operand.vmem [shape: bf16[9,8,8], index: 3, kind: input, shape index: {}]   ;;  %s4131_s4 = inlined_call_operand.vmem [shape: f32[1,8], index: 4, kind: input, shape index: {}]   ;;  %s4132_s5 = inlined_call_operand.vmem [shape: f32[1,8], index: 5, kind: input, shape index: {}]   ;;  %s4133_s6 = inlined_call_operand.vmem [shape: f32[1,8], index: 6, kind: input, shape index: {}]   ;;  %s4134_s7 = inlined_call_operand.vmem [shape: f32[1,8], index: 7, kind: input, shape index: {}]   ;;  %s4135_s8 = inlined_call_operand.vmem [shape: bf16[2,8,8,8], index: 8, kind: output, shape index: {}]  }
   0x1   :  { %s3126_s29 = smov 0   ;;  %s3128_s30 = smov 0  }
   0x2   :  { %s3130_s9 = smov 0  }
   0x3 LB: > { %s27_s10 = sadd.s32 1, %s3067_s29  ;;  %s30_s11 = sadd.s32 1, %s3071_s30  ;;  %s3075_s9 = sphi %s3130_s9, %s18_s9   ;;  %s3071_s30 = sphi %s3128_s30, %s4322_s30   ;;  %s3067_s29 = sphi %s3126_s29, %s4321_s29   ;;  %s3063_s28 = sphi %s3124_s28, %s4320_s28   ;;  %s3059_s27 = sphi %s3122_s27, %s4319_s27  }
   0x4   : > { %p28_p0 = scmp.ge.s32.totalorder %s27_s10, 2  ;;  %p2601_p1 = scmp.ge.s32.totalorder %s3075_s9, 1 }
   0x5   : > { %p286_p2 = scmp.lt.s32.totalorder %s3075_s9, 5 }
   0x6   : > { %s4324_s10 = smov (%p28_p0, %s27_s10), 0  ;;  %s4326_s11 = smov (!%p28_p0, %s30_s11), %s3071_s30 }
   0x7   : > { %p287_p3 = pnand %p2601_p1, %p286_p2  ;;  %p32_p4 = scmp.ge.s32.totalorder %s4326_s11, 2 }
   0x8   : > { %p329_p5 = scmp.lt.s32.totalorder (!%p287_p3), %s3063_s28, 1  ;;  %s3165_s16 = sshll.u32 (!%p287_p3), %s3059_s27, 2 }
   0x9   : > { %s4328_s11 = smov (%p32_p4, %s4326_s11), 0  ;;  %290 = sbr.rel (%p287_p3) target bundleno = 372 (0x174), region = 52 }
   0xa   : > { %s2770_s18 = sshll.u32 (!%p287_p3), %s3059_s27, 5  ;;  %s2791_s22 = sshll.u32 (!%p287_p3), %s3059_s27, 6 }
   0xb   : > { %p342_p6 = scmp.lt.s32.totalorder (!%p287_p3), %s3165_s16, 7 }
   0xe   : > { %v424_v0 = vld [vmem:[%s4129_s2] sm:$0xf]  ;;  %vm4138_vm0 = vcmask 1043456   ;;  %v2612_v1 = vld [vmem:[%s4129_s2 + $0x4] sm:$0xf]  ;;  %v353_v2 = vlaneseq  ;;  %s4330_s28 = smov (!%p329_p5, %s3063_s28), 1  ;;  %v355_v6 = vstv %s3165_s16 }
   0xf   : > { %2975 = vmatprep.subr.msk.bf16.mxu1 %vm4138_vm0, %v424_v0  ;;  %v578_v3 = vsel %vm4138_vm0, %v424_v0, 0  ;;  %2974 = vmatprep.subr.msk.bf16.mxu0 %vm4138_vm0, %v2612_v1  ;;  %v510_v4 = vsel %vm4138_vm0, %v2612_v1, 0  ;;  %v3172_v7 = vadd.s32 1, %v355_v6  ;;  %v3174_v8 = vadd.s32 2, %v355_v6  ;;  %s2992_s17 = smul.u32 80, %s4330_s28  ;;  %s4332_s16 = smov (!%p342_p6, %s3165_s16), 7 }
  0x10   : > { %2873 = vmatpush3.bf16.msra.mxu1 %v578_v3  ;;  %2867 = vmatpush3.bf16.msra.mxu0 %v510_v4  ;;  %v3169_v5 = vshrl.u32 %v353_v2, 7  ;;  %v3176_v9 = vadd.s32 3, %v355_v6  ;;  %vm394_vm1 = vcmp.ge.s32.totalorder %v355_v6, 1  ;;  %vm398_vm2 = vcmp.le.s32.totalorder %v355_v6, 8  ;;  %s2993_s19 = smul.u32 160, %s4330_s28 }
  0x11   : > { %v3185_v10 = vld [vmem:[%s4132_s5] ss:$0 sm:$0xff]  ;;  %s333_s25 = scalar_lea.vmem %s4127_s0, %s2992_s17  ;;  %vm395_vm4 = vcmp.ge.s32.totalorder %v3172_v7, 1  ;;  %vm399_vm5 = vcmp.le.s32.totalorder %v3172_v7, 8  ;;  %vm396_vm6 = vcmp.ge.s32.totalorder %v3174_v8, 1  ;;  %vm3211_vm7 = vmand %vm394_vm1, %vm398_vm2  ;;  %vm400_vm9 = vcmp.le.s32.totalorder %v3174_v8, 8 }
  0x12   : > { %vm4137_vm3 = vcmp.ge.s32.totalorder %v3169_v5, 1  ;;  %v3194_v11 = vld [vmem:[%s4131_s4] ss:$0 sm:$0xff]  ;;  %v3199_v12 = vadd.s32 2, %v3169_v5  ;;  %v2621_v13 = vld [vmem:[%s4129_s2 + $0x8] sm:$0xf]  ;;  %s338_s17 = scalar_lea.vmem %s4128_s1, %s2993_s19  ;;  %s3208_s20 = scalar_lea.vmem %s333_s25, %s2770_s18  ;;  %vm3250_vm11 = vmand %vm395_vm4, %vm399_vm5 }
  0x13   : > { %v3218_v15 = vld [vmem:[%s4134_s7] ss:$0 sm:$0xff]  ;;  %vm397_vm8 = vcmp.ge.s32.totalorder %v3176_v9, 1  ;;  %vm401_vm10 = vcmp.le.s32.totalorder %v3176_v9, 8  ;;  %2976 = vmatprep.subr.msk.bf16.mxu0 %vm4138_vm0, %v2621_v13  ;;  %v2632_v16 = vld [vmem:[%s4129_s2 + $0xc] sm:$0xf]  ;;  %s3236_s26 = scalar_lea.vmem %s338_s17, %s2791_s22  ;;  %vm3260_vm13 = vmand %vm3211_vm7, %vm4137_vm3 }
  0x14   : > { %v3228_v17 = vadd.s32 1, %v3172_v7  ;;  %v3233_v18 = vld [vmem:[%s4133_s6] ss:$0 sm:$0xff]  ;;  %v364_v20 = vld [vmem:[%s3208_s20 + $0x10] ss:$8 sps:$4 sm:$0xff]   ;;  %v3240_v21 = vsel %vm4138_vm0, %v2621_v13, 0  ;;  %2977 = vmatprep.subr.msk.bf16.mxu1 %vm4138_vm0, %v2632_v16  ;;  %vm3282_vm14 = vmand %vm396_vm6, %vm400_vm9 }
  0x15   : > { %v362_v19 = vld [vmem:[%s3208_s20] ss:$8 sps:$4 sm:$0xff]   ;;  %v3244_v22 = vadd.s32 1, %v3174_v8  ;;  %vm4139_vm12 = vcmask 64512   ;;  %v1576_v27 = vld [vmem:[%s3236_s26 + $0x10] sm:$0xff]  ;;  %v368_v28 = vunpack.c.l.bf16 %v364_v20  ;;  %v369_v29 = vunpack.c.h.bf16 %v364_v20  ;;  %vm3292_vm15 = vmand %vm397_vm8, %vm401_vm10 }
  0x16   : > { %v366_v23 = vunpack.c.l.bf16 %v362_v19  ;;  %v367_v24 = vunpack.c.h.bf16 %v362_v19  ;;  %v1575_v26 = vld [vmem:[%s3236_s26] sm:$0xff]  ;;  %v1586_v32 = vmul.f32 %v3185_v10, %v1576_v27  ;;  %v1578_v34 = vld [vmem:[%s3236_s26 + $0x30] sm:$0xff]  ;;  %v3269_v35 = vsel %vm4138_vm0, %v2632_v16, 0  ;;  %vm3304_vm1 = vmand %vm3250_vm11, %vm4137_vm3 }
  0x17   : > { %v1585_v31 = vmul.f32 %v3185_v10, %v1575_v26  ;;  %v1577_v33 = vld [vmem:[%s3236_s26 + $0x20] sm:$0xff]  ;;  %v3272_v36 = vadd.s32 1, %v3176_v9  ;;  %v378_v39 = vmul.f32 %v3194_v11, %v368_v28  ;;  %v379_v40 = vmul.f32 %v3194_v11, %v369_v29  ;;  %vm3315_vm4 = vmand %vm3282_vm14, %vm4137_vm3  ;;  %v426_v63 = vld [vmem:[%s3208_s20 + $0xc] sm:$0x1] }
  0x18   : > { %v376_v37 = vmul.f32 %v3194_v11, %v366_v23  ;;  %v377_v38 = vmul.f32 %v3194_v11, %v367_v24  ;;  %v4162_v41 = vmov 0  ;;  %v1596_v43 = vadd.f32 %v3218_v15, %v1586_v32  ;;  %vm3325_vm5 = vmand %vm3292_vm15, %vm4137_vm3  ;;  %v425_v62 = vld [vmem:[%s3208_s20 + $0x4] sm:$0x1]  ;;  %v427_v3 = vld [vmem:[%s3208_s20 + $0x14] sm:$0x1] }
  0x19   : > { %v4163_v41 = vsel %vm3282_vm14, 4294967295, %v4162_v41  ;;  %v1595_v42 = vadd.f32 %v3218_v15, %v1585_v31  ;;  %v4164_v44 = vmov 0  ;;  %v1587_v45 = vmul.f32 %v3185_v10, %v1577_v33  ;;  %v428_v19 = vld [vmem:[%s3208_s20 + $0x1c] sm:$0x1]  ;;  %v2628_v27 = vld [vmem:[%s3208_s20 + $0x8] ss:$8 sps:$4 sm:$0xff]  }
  0x1a   : > { %v4165_v44 = vsel %vm3292_vm15, 4294967295, %v4164_v44  ;;  %v1588_v46 = vmul.f32 %v3185_v10, %v1578_v34  ;;  %v386_v47 = vadd.f32 %v3233_v18, %v376_v37  ;;  %v387_v48 = vadd.f32 %v3233_v18, %v377_v38  ;;  %v2630_v32 = vld [vmem:[%s3208_s20 + $0x18] ss:$8 sps:$4 sm:$0xff]  }
  0x1b   : > { %v4166_v49 = vmov 0  ;;  %v388_v50 = vadd.f32 %v3233_v18, %v378_v39  ;;  %v389_v51 = vadd.f32 %v3233_v18, %v379_v40  ;;  %vm790_vm2 = vcmp.ge.s32.totalorder %v3228_v17, 1  ;;  %v3368_v39 = vld [vmem:[%s4129_s2 + $0x14] sm:$0xf] }
  0x1c   : > { %v4167_v49 = vsel %vm3304_vm1, 4294967295, %v4166_v49  ;;  %v1599_v52 = vmax.f32 %v1595_v42, 0.0  ;;  %v1600_v53 = vmax.f32 %v1596_v43, 0.0  ;;  %v4168_v54 = vmov 0 }
  0x1d   : > { %v4169_v54 = vsel %vm3315_vm4, 4294967295, %v4168_v54  ;;  %v1597_v55 = vadd.f32 %v3218_v15, %v1587_v45  ;;  %v1598_v56 = vadd.f32 %v3218_v15, %v1588_v46  ;;  %v390_v57 = vmax.f32 %v386_v47, 0.0 }
  0x1e   : > { %v391_v58 = vmax.f32 %v387_v48, 0.0  ;;  %v392_v59 = vmax.f32 %v388_v50, 0.0  ;;  %v393_v60 = vmax.f32 %v389_v51, 0.0  ;;  %v3333_v0 = vsel %vm3260_vm13, %v1599_v52, 0.0 }
  0x1f   : > { %v3337_v1 = vsel %vm3304_vm1, %v1600_v53, 0.0  ;;  %v1601_v2 = vmax.f32 %v1597_v55, 0.0  ;;  %vm793_vm6 = vcmp.le.s32.totalorder %v3228_v17, 8  ;;  %v416_v4 = vsel %vm3260_vm13, %v390_v57, 0.0 }
  0x20   : > { %v417_v6 = vsel %vm3304_vm1, %v391_v58, 0.0  ;;  %v3345_v13 = vrot.slane %v390_v57, 1  ;;  %v1602_v16 = vmax.f32 %v1598_v56, 0.0  ;;  %v468_v20 = vrot.slane %v391_v58, 1  ;;  %vm3391_vm9 = vmand %vm790_vm2, %vm793_vm6 }
  0x21   : > { %v2773_v23 = vpack.c.bf16 %v417_v6, %v416_v4  ;;  %v418_v24 = vsel %vm3315_vm4, %v392_v59, 0.0  ;;  %v419_v26 = vsel %vm3325_vm5, %v393_v60, 0.0  ;;  %v2792_v28 = vpack.c.bf16 %v3337_v1, %v3333_v0  ;;  %vm3408_vm13 = vmand %vm3391_vm9, %vm4137_vm3  ;;  %v3854_v0 = vld [vmem:[%s3236_s26 + $0x32] sm:$0xff] }
  0x22   : > { %v3355_v29 = vrot.slane %v392_v59, 1  ;;  %v3357_v30 = vrot.slane %v393_v60, 1  ;;  %v2774_v31 = vpack.c.bf16 %v419_v26, %v418_v24  ;;  %vm4136_vm8 = vcmask 1046528  }
  0x23   : > { %2874 = vmatprep.mubr.msk.bf16.mxu1 %vm4139_vm12, %v2773_v23  ;;  %v3363_v33 = vsel %vm3315_vm4, %v1601_v2, 0.0  ;;  %v429_v34 = vunpack.c.l.bf16 %v425_v62  ;;  %v430_v37 = vunpack.c.l.bf16 %v426_v63  ;;  %v431_v38 = vunpack.c.l.bf16 %v427_v3 }
  0x24   : > { %2875 = vmatmul.mubr.msk.bf16.vlgmr.msra.gmra.mxu1 %vm4139_vm12, %v2774_v31  ;;  %v3373_v40 = vsel %vm3325_vm5, %v1602_v16, 0.0  ;;  %v432_v42 = vunpack.c.l.bf16 %v428_v19  ;;  %v771_v43 = vunpack.c.l.bf16 %v2628_v27  ;;  %v772_v45 = vunpack.c.h.bf16 %v2628_v27 }
  0x25   : > { %v433_v46 = vmul.f32 %v3194_v11, %v429_v34  ;;  %v434_v47 = vmul.f32 %v3194_v11, %v430_v37  ;;  %v435_v48 = vmul.f32 %v3194_v11, %v431_v38  ;;  %2885 = vmatpush3.bf16.msra.mxu1 %v3269_v35  ;;  %v773_v50 = vunpack.c.l.bf16 %v2630_v32 }
  0x26   : > { %v436_v51 = vmul.f32 %v3194_v11, %v432_v42  ;;  %v775_v52 = vmul.f32 %v3194_v11, %v771_v43  ;;  %v776_v53 = vmul.f32 %v3194_v11, %v772_v45  ;;  %v774_v55 = vunpack.c.h.bf16 %v2630_v32  ;;  %2979 = vmatprep.subr.msk.bf16.mxu1 %vm4138_vm0, %v3368_v39 }
  0x27   : > { %v437_v56 = vadd.f32 %v3233_v18, %v433_v46  ;;  %v438_v57 = vadd.f32 %v3233_v18, %v434_v47  ;;  %v439_v58 = vadd.f32 %v3233_v18, %v435_v48  ;;  %v4172_v35 = vmov 0  ;;  %v629_v48 = vld [vmem:[%s3208_s20] sm:$0xe] }
  0x28   : > { %v4173_v35 = vsel %vm3391_vm9, 4294967295, %v4172_v35  ;;  %v777_v59 = vmul.f32 %v3194_v11, %v773_v50  ;;  %vm791_vm10 = vcmp.ge.s32.totalorder %v3244_v22, 1  ;;  %v440_v60 = vadd.f32 %v3233_v18, %v436_v51  ;;  %v630_v50 = vld [vmem:[%s3208_s20 + $0x8] sm:$0xe] }
  0x29   : > { %v779_v61 = vadd.f32 %v3233_v18, %v775_v52  ;;  %v780_v62 = vadd.f32 %v3233_v18, %v776_v53  ;;  %v778_v63 = vmul.f32 %v3194_v11, %v774_v55  ;;  %v441_v2 = vmax.f32 %v437_v56, 0.0  ;;  %v2645_v53 = vld [vmem:[%s4129_s2 + $0x10] sm:$0xf] }
  0x2a   : > { %v442_v3 = vmax.f32 %v438_v57, 0.0  ;;  %v443_v4 = vmax.f32 %v439_v58, 0.0  ;;  %v3402_v17 = vadd.f32 %v3233_v18, %v777_v59  ;;  %v444_v6 = vmax.f32 %v440_v60, 0.0  ;;  %v631_v55 = vld [vmem:[%s3208_s20 + $0x10] sm:$0xe] }
  0x2b   : > { %v783_v16 = vmax.f32 %v779_v61, 0.0  ;;  %v784_v19 = vmax.f32 %v780_v62, 0.0  ;;  %v4174_v23 = vmov 0  ;;  %v3413_v24 = vadd.f32 %v3233_v18, %v778_v63  ;;  %v632_v60 = vld [vmem:[%s3208_s20 + $0x18] sm:$0xe] }
  0x2c   : > { %v4175_v23 = vsel %vm3408_vm13, 4294967295, %v4174_v23  ;;  %v466_v26 = vrot.slane %v441_v2, 1  ;;  %v469_v27 = vrot.slane %v442_v3, 1  ;;  %v3415_v31 = vrot.slane %v441_v2, 2  ;;  %v2640_v63 = vld [vmem:[%s3208_s20 + $0x14] sm:$0x1] }
  0x2d   : > { %v3417_v32 = vrot.slane %v442_v3, 2  ;;  %v472_v34 = vrot.slane %v443_v4, 1  ;;  %v475_v37 = vrot.slane %v444_v6, 1  ;;  %v3420_v38 = vrot.slane %v443_v4, 2  ;;  %v2650_v4 = vld [vmem:[%s3208_s20 + $0x8] sm:$0xe] }
  0x2e   : > { %v3422_v42 = vrot.slane %v444_v6, 2  ;;  %v467_v43 = vsel %vm4136_vm8, %v3345_v13, %v466_v26  ;;  %v470_v45 = vsel %vm4136_vm8, %v468_v20, %v469_v27  ;;  %v805_v46 = vsel %vm3304_vm1, %v783_v16, 0.0  ;;  %v2651_v6 = vld [vmem:[%s3208_s20 + $0x10] sm:$0xe] }
  0x2f   : > { %v806_v47 = vsel %vm3408_vm13, %v784_v19, 0.0  ;;  %v481_v51 = vsel %vm3211_vm7, %v467_v43, 0.0  ;;  %v482_v52 = vsel %vm3250_vm11, %v470_v45, 0.0  ;;  %v473_v13 = vsel %vm4136_vm8, %v3355_v29, %v472_v34  ;;  %v2638_v29 = vld [vmem:[%s3208_s20 + $0xc] sm:$0x1] }
  0x30   : > { %v476_v20 = vsel %vm4136_vm8, %v3357_v30, %v475_v37  ;;  %v2771_v56 = vpack.c.bf16 %v482_v52, %v481_v51  ;;  %v483_v57 = vsel %vm3282_vm14, %v473_v13, 0.0  ;;  %v2778_v59 = vpack.c.bf16 %v806_v47, %v805_v46 }
  0x31   : > { %v484_v58 = vsel %vm3292_vm15, %v476_v20, 0.0  ;;  %v785_v30 = vmax.f32 %v3402_v17, 0.0  ;;  %v786_v62 = vmax.f32 %v3413_v24, 0.0  ;;  %vm792_vm5 = vcmp.ge.s32.totalorder %v3272_v36, 1 }
  0x32   : > { %v2772_v61 = vpack.c.bf16 %v484_v58, %v483_v57  ;;  %2868 = vmatprep.mubr.msk.bf16.mxu0 %vm4139_vm12, %v2771_v56  ;;  %2886 = vmatprep.mubr.msk.bf16.mxu1 %vm4139_vm12, %v2778_v59  ;;  %vm794_vm8 = vcmp.le.s32.totalorder %v3244_v22, 8  ;;  %vm795_vm2 = vcmp.le.s32.totalorder %v3272_v36, 8  ;;  %v633_v2 = vunpack.c.l.bf16 %v629_v48  ;;  %v1687_v59 = vld [vmem:[%s3236_s26 + $0x31] sm:$0xff] }
  0x33   : > { %v634_v3 = vunpack.c.l.bf16 %v630_v50  ;;  %vm3464_vm3 = vmand %vm791_vm10, %vm794_vm8  ;;  %v4176_v17 = vmov 0  ;;  %v635_v16 = vunpack.c.l.bf16 %v631_v55  ;;  %v636_v19 = vunpack.c.l.bf16 %v632_v60 }
  0x34   : > { %2869 = vmatmul.mubr.msk.bf16.vlgmr.msra.gmra.mxu0 %vm4139_vm12, %v2772_v61  ;;  %v4177_v17 = vsel %vm3464_vm3, 4294967295, %v4176_v17  ;;  %v3469_v24 = vsel %vm4138_vm0, %v2645_v53, 0  ;;  %v1112_v26 = vsel %vm4138_vm0, %v3368_v39, 0  ;;  %vm3476_vm6 = vmand %vm792_vm5, %vm795_vm2  ;;  %v4178_v27 = vmov 0 }
  0x35   : > { %2879 = vmatpush3.bf16.msra.mxu0 %v3240_v21  ;;  %v4179_v27 = vsel %vm3476_vm6, 4294967295, %v4178_v27  ;;  %v637_v22 = vmul.f32 %v3194_v11, %v633_v2  ;;  %v638_v34 = vmul.f32 %v3194_v11, %v634_v3  ;;  %v896_v37 = vunpack.c.l.bf16 %v2638_v29  ;;  %v3537_v2 = vld [vmem:[%s4129_s2 + $0x1c] sm:$0xf] }
  0x36   : > { %v898_v43 = vunpack.c.l.bf16 %v2640_v63  ;;  %vm4180_vm8 = vcmp.ge.s32.totalorder %v3169_v5, 1  ;;  %v4181_v39 = vmov 0  ;;  %2978 = vmatprep.subr.msk.bf16.mxu0 %vm4138_vm0, %v2645_v53  ;;  %v639_v21 = vmul.f32 %v3194_v11, %v635_v16 }
  0x37   : > { %vm3486_vm10 = vmand %vm3464_vm3, %vm4180_vm8  ;;  %v640_v36 = vmul.f32 %v3194_v11, %v636_v19  ;;  %v1043_v45 = vunpack.c.l.bf16 %v2650_v4  ;;  %v1044_v46 = vunpack.c.l.bf16 %v2651_v6  ;;  %v4184_v47 = vmov 0 }
  0x38   : > { %v4182_v39 = vsel %vm3486_vm10, 4294967295, %v4181_v39  ;;  %vm4183_vm2 = vmmov %vm4180_vm8  ;;  %v807_v48 = vsel %vm3486_vm10, %v785_v30, 0.0  ;;  %v641_v50 = vadd.f32 %v3233_v18, %v637_v22  ;;  %v642_v51 = vadd.f32 %v3233_v18, %v638_v34  ;;  %v3953_v22 = vld [vmem:[%s4134_s7] ss:$0 sm:$0xff] }
  0x39   : > { %vm3497_vm5 = vmand %vm3476_vm6, %vm4183_vm2  ;;  %v904_v52 = vmul.f32 %v3194_v11, %v896_v37  ;;  %v643_v20 = vadd.f32 %v3233_v18, %v639_v21  ;;  %v644_v53 = vadd.f32 %v3233_v18, %v640_v36  ;;  %v906_v55 = vmul.f32 %v3194_v11, %v898_v43 }
  0x3a   : > { %v4185_v47 = vsel %vm3497_vm5, 4294967295, %v4184_v47  ;;  %v808_v13 = vsel %vm3497_vm5, %v786_v62, 0.0  ;;  %v645_v57 = vmax.f32 %v641_v50, 0.0  ;;  %v646_v58 = vmax.f32 %v642_v51, 0.0  ;;  %v2642_v50 = vld [vmem:[%s3208_s20 + $0x1c] sm:$0x1] }
  0x3b   : > { %v2779_v56 = vpack.c.bf16 %v808_v13, %v807_v48  ;;  %vm4186_vm8 = vcmp.le.s32.totalorder %v3199_v12, 8  ;;  %v3520_v60 = vadd.f32 %v3233_v18, %v904_v52  ;;  %v647_v61 = vmax.f32 %v643_v20, 0.0  ;;  %v2644_v51 = vld [vmem:[%s3208_s20 + $0x24] sm:$0x1]  ;;  %v2652_v13 = vld [vmem:[%s3208_s20 + $0x18] sm:$0xe] }
  0x3c   : > { %vm3515_vm2 = vmand %vm3211_vm7, %vm4186_vm8  ;;  %v648_v30 = vmax.f32 %v644_v53, 0.0  ;;  %v3531_v62 = vadd.f32 %v3233_v18, %v906_v55  ;;  %v1047_v63 = vmul.f32 %v3194_v11, %v1043_v45  ;;  %v665_v3 = vrot.slane %v645_v57, 2  ;;  %v2653_v20 = vld [vmem:[%s3208_s20 + $0x20] sm:$0xe] }
  0x3d   : > { %vm4189_vm0 = vmmov %vm4186_vm8  ;;  %vm4192_vm8 = vcmask 64512   ;;  %v668_v4 = vrot.slane %v646_v58, 2  ;;  %v920_v16 = vmax.f32 %v3520_v60, 0.0  ;;  %v1048_v19 = vmul.f32 %v3194_v11, %v1044_v46  ;;  %v2637_v58 = vld [vmem:[%s3208_s20 + $0x8] ss:$8 sps:$4 sm:$0xff]  }
  0x3e   : > { %vm3526_vm12 = vmand %vm3250_vm11, %vm4189_vm0  ;;  %2887 = vmatmul.mubr.msk.bf16.vlgmr.msra.gmra.mxu1 %vm4192_vm8, %v2779_v56  ;;  %v671_v34 = vrot.slane %v647_v61, 2  ;;  %v674_v37 = vrot.slane %v648_v30, 2  ;;  %v922_v43 = vmax.f32 %v3531_v62, 0.0  ;;  %v1051_v21 = vadd.f32 %v3233_v18, %v1047_v63 }
  0x3f   : > { %vm3544_vm5 = vmand %vm3282_vm14, %vm4189_vm0  ;;  %2897 = vmatpush3.bf16.msra.mxu1 %v1112_v26  ;;  %v1052_v46 = vadd.f32 %v3233_v18, %v1048_v19  ;;  %v1070_v48 = vrot.slane %v920_v16, 2  ;;  %v1046_v19 = vunpack.c.l.bf16 %v2653_v20 }
  0x40   : > { %vm4195_vm10 = vmmov %vm4189_vm0  ;;  %vm4198_vm0 = vcmask 1045504   ;;  %v1055_v57 = vmax.f32 %v1051_v21, 0.0  ;;  %v1073_v63 = vrot.slane %v922_v43, 2  ;;  %v945_v60 = vrot.slane %v922_v43, 1 }
  0x41   : > { %vm3554_vm8 = vmand %vm3292_vm15, %vm4195_vm10  ;;  %v667_v36 = vsel %vm4198_vm0, %v665_v3, %v3415_v31  ;;  %vm4200_vm10 = vcmask 1043456   ;;  %v1056_v30 = vmax.f32 %v1052_v46, 0.0  ;;  %v902_v3 = vunpack.c.l.bf16 %v2644_v51 }
  0x42   : > { %vm4199_vm13 = vmmov %vm4198_vm0  ;;  %2981 = vmatprep.subr.msk.bf16.mxu1 %vm4200_vm10, %v3537_v2  ;;  %v681_v26 = vsel %vm3515_vm2, %v667_v36, 0.0  ;;  %vm4202_vm10 = vcmask 64512   ;;  %v897_v46 = vunpack.c.h.bf16 %v2637_v58 }
  0x43   : > { %v670_v45 = vsel %vm4199_vm13, %v668_v4, %v3417_v32  ;;  %v673_v32 = vsel %vm4198_vm0, %v671_v34, %v3420_v38  ;;  %vm4201_vm13 = vmmov %vm4198_vm0  ;;  %v900_v38 = vunpack.c.l.bf16 %v2642_v50  ;;  %v1045_v4 = vunpack.c.l.bf16 %v2652_v13  ;;  %v3592_v34 = vld [vmem:[%s4129_s2 + $0x18] sm:$0xf] }
  0x44   : > { %v682_v31 = vsel %vm3526_vm12, %v670_v45, 0.0  ;;  %v676_v52 = vsel %vm4201_vm13, %v674_v37, %v3422_v42  ;;  %v683_v55 = vsel %vm3544_vm5, %v673_v32, 0.0  ;;  %v1069_v42 = vrot.slane %v1055_v57, 2  ;;  %vm4203_vm0 = vmmov %vm4202_vm10 }
  0x45   : > { %v2775_v53 = vpack.c.bf16 %v682_v31, %v681_v26  ;;  %v684_v56 = vsel %vm3554_vm8, %v676_v52, 0.0  ;;  %vm4204_vm13 = vcmp.le.s32.totalorder %v3199_v12, 8  ;;  %v4205_v37 = vmov 0 }
  0x46   : > { %v2776_v61 = vpack.c.bf16 %v684_v56, %v683_v55  ;;  %vm3599_vm1 = vmand %vm3391_vm9, %vm4204_vm13  ;;  %v1072_v21 = vrot.slane %v1056_v30, 2  ;;  %v908_v36 = vmul.f32 %v3194_v11, %v900_v38  ;;  %v895_v45 = vunpack.c.l.bf16 %v2637_v58  ;;  %v2641_v30 = vld [vmem:[%s3208_s20 + $0x18] ss:$8 sps:$4 sm:$0xff]  }
  0x47   : > { %2880 = vmatprep.mubr.msk.bf16.mxu0 %vm4202_vm10, %v2775_v53  ;;  %v4206_v37 = vsel %vm3599_vm1, 4294967295, %v4205_v37  ;;  %vm4207_vm10 = vcmask 1045504   ;;  %v910_v51 = vmul.f32 %v3194_v11, %v902_v3  ;;  %v1049_v26 = vmul.f32 %v3194_v11, %v1045_v4 }
  0x48   : > { %2881 = vmatmul.mubr.msk.bf16.vlgmr.msra.gmra.mxu0 %vm4203_vm0, %v2776_v61  ;;  %v1071_v50 = vsel %vm4207_vm10, %v1069_v42, %v1070_v48  ;;  %v1050_v31 = vmul.f32 %v3194_v11, %v1046_v19  ;;  %vm4208_vm0 = vmmov %vm4207_vm10  ;;  %v916_v13 = vadd.f32 %v3233_v18, %v908_v36  ;;  %v903_v20 = vmul.f32 %v3194_v11, %v895_v45 }
  0x49   : > { %2891 = vmatpush3.bf16.msra.mxu0 %v3469_v24  ;;  %v1074_v32 = vsel %vm4208_vm0, %v1072_v21, %v1073_v63  ;;  %v1085_v52 = vsel %vm3526_vm12, %v1071_v50, 0.0  ;;  %vm4209_vm13 = vcmask 1043456   ;;  %v918_v48 = vadd.f32 %v3233_v18, %v910_v51 }
  0x4a   : > { %2980 = vmatprep.subr.msk.bf16.mxu0 %vm4209_vm13, %v3592_v34  ;;  %v1086_v24 = vsel %vm3599_vm1, %v1074_v32, 0.0  ;;  %v1053_v53 = vadd.f32 %v3233_v18, %v1049_v26  ;;  %v1054_v55 = vadd.f32 %v3233_v18, %v1050_v31  ;;  %v924_v57 = vmax.f32 %v916_v13, 0.0 }
  0x4b   : > { %v2782_v56 = vpack.c.bf16 %v1086_v24, %v1085_v52  ;;  %v905_v58 = vmul.f32 %v3194_v11, %v897_v46  ;;  %v911_v61 = vadd.f32 %v3233_v18, %v903_v20  ;;  %v2793_v63 = vpack.c.bf16 %v3373_v40, %v3363_v33 }
  0x4c   : > { %v926_v38 = vmax.f32 %v918_v48, 0.0  ;;  %v1057_v42 = vmax.f32 %v1053_v53, 0.0  ;;  %v1058_v3 = vmax.f32 %v1054_v55, 0.0  ;;  %vm4210_vm10 = vcmask 64512  }
  0x4d   : > { %2898 = vmatprep.mubr.msk.bf16.mxu1 %vm4210_vm10, %v2782_v56  ;;  %vm4211_vm0 = vcmp.le.s32.totalorder %v3199_v12, 8  ;;  %v4212_v4 = vmov 0  ;;  %v1076_v19 = vrot.slane %v924_v57, 2  ;;  %v913_v21 = vadd.f32 %v3233_v18, %v905_v58  ;;  %v2670_v58 = vld [vmem:[%s3208_s20 + $0x10] ss:$8 sps:$4 sm:$0xff]  }
  0x4e   : > { %vm3631_vm13 = vmand %vm3464_vm3, %vm4211_vm0  ;;  %v919_v36 = vmax.f32 %v911_v61, 0.0  ;;  %v942_v45 = vrot.slane %v920_v16, 1  ;;  %v4215_v46 = vmov 0  ;;  %v1075_v50 = vrot.slane %v1057_v42, 2 }
  0x4f   : > { %v4213_v4 = vsel %vm3631_vm13, 4294967295, %v4212_v4  ;;  %vm4214_vm1 = vmmov %vm4211_vm0  ;;  %v1078_v51 = vrot.slane %v1058_v3, 2  ;;  %v1079_v26 = vrot.slane %v926_v38, 2  ;;  %v899_v31 = vunpack.c.l.bf16 %v2641_v30  ;;  %v2671_v3 = vld [vmem:[%s3208_s20 + $0x14] sm:$0x1] }
  0x50   : > { %vm3642_vm10 = vmand %vm3476_vm6, %vm4214_vm1  ;;  %v921_v32 = vmax.f32 %v913_v21, 0.0  ;;  %v941_v52 = vrot.slane %v919_v36, 1  ;;  %v901_v16 = vunpack.c.h.bf16 %v2641_v30  ;;  %vm4217_vm0 = vcmask 1045504  }
  0x51   : > { %v4216_v46 = vsel %vm3642_vm10, 4294967295, %v4215_v46  ;;  %v1077_v13 = vsel %vm4217_vm0, %v1075_v50, %v1076_v19  ;;  %vm4218_vm15 = vmmov %vm4217_vm0  ;;  %v907_v24 = vmul.f32 %v3194_v11, %v899_v31  ;;  %v948_v48 = vrot.slane %v924_v57, 1  ;;  %v2673_v57 = vld [vmem:[%s3208_s20 + $0x1c] sm:$0x1]  ;;  %v3670_v50 = vld [vmem:[%s4130_s3] sm:$0xf] }
  0x52   : > { %v1080_v20 = vsel %vm4218_vm15, %v1078_v51, %v1079_v26  ;;  %v1087_v53 = vsel %vm3631_vm13, %v1077_v13, 0.0  ;;  %vm4219_vm1 = vcmask 1046528   ;;  %v944_v62 = vrot.slane %v921_v32, 1 }
  0x53   : > { %v1088_v55 = vsel %vm3642_vm10, %v1080_v20, 0.0  ;;  %v943_v56 = vsel %vm4219_vm1, %v941_v52, %v942_v45  ;;  %v909_v30 = vmul.f32 %v3194_v11, %v901_v16  ;;  %v915_v42 = vadd.f32 %v3233_v18, %v907_v24  ;;  %vm4220_vm15 = vmmov %vm4219_vm1 }
  0x54   : > { %v2783_v43 = vpack.c.bf16 %v1088_v55, %v1087_v53  ;;  %v957_v61 = vsel %vm3250_vm11, %v943_v56, 0.0  ;;  %v946_v19 = vsel %vm4220_vm15, %v944_v62, %v945_v60  ;;  %v951_v21 = vrot.slane %v926_v38, 1 }
  0x55   : > { %vm4221_vm0 = vcmask 1043456   ;;  %v1191_v45 = vadd.s32 2, %v3172_v7  ;;  %vm4222_vm1 = vcmask 64512   ;;  %v958_v51 = vsel %vm3391_vm9, %v946_v19, 0.0 }
  0x56   : > { %v1388_v36 = vsel %vm4221_vm0, %v3537_v2, 0  ;;  %2899 = vmatmul.mubr.msk.bf16.vlgmr.msra.gmra.mxu1 %vm4222_vm1, %v2783_v43  ;;  %v917_v26 = vadd.f32 %v3233_v18, %v909_v30  ;;  %v923_v31 = vmax.f32 %v915_v42, 0.0  ;;  %v1299_v32 = vunpack.c.l.bf16 %v2670_v58  ;;  %vm4223_vm15 = vmmov %vm4221_vm0  ;;  %v2674_v42 = vld [vmem:[%s3208_s20 + $0x20] ss:$8 sps:$4 sm:$0xff]  }
  0x57   : > { %v2780_v38 = vpack.c.bf16 %v958_v51, %v957_v61  ;;  %v1236_v2 = vsel %vm4223_vm15, %v3592_v34, 0  ;;  %2909 = vmatpush3.bf16.msra.mxu1 %v1388_v36  ;;  %v1300_v7 = vunpack.c.l.bf16 %v2671_v3  ;;  %v1301_v16 = vunpack.c.h.bf16 %v2670_v58  ;;  %vm4224_vm1 = vmmov %vm4221_vm0  ;;  %v2675_v3 = vld [vmem:[%s3208_s20 + $0x24] sm:$0x1] }
  0x58   : > { %v925_v52 = vmax.f32 %v917_v26, 0.0  ;;  %v947_v60 = vrot.slane %v923_v31, 1  ;;  %v1302_v13 = vunpack.c.l.bf16 %v2673_v57  ;;  %2983 = vmatprep.subr.msk.bf16.mxu1 %vm4224_vm1, %v3670_v50  ;;  %vm4225_vm10 = vcmask 64512  }
  0x59   : > { %2892 = vmatprep.mubr.msk.bf16.mxu0 %vm4225_vm10, %v2780_v38  ;;  %v1307_v20 = vmul.f32 %v3194_v11, %v1299_v32  ;;  %v1308_v24 = vmul.f32 %v3194_v11, %v1300_v7  ;;  %v3684_v34 = vadd.s32 2, %v3174_v8  ;;  %v3687_v53 = vadd.s32 2, %v3176_v9  ;;  %v2661_v32 = vld [vmem:[%s3208_s20 + $0x10] ss:$8 sps:$4 sm:$0xff]   ;;  %vm4228_vm0 = vmmov %vm4225_vm10 }
  0x5a   : > { %vm4226_vm15 = vcmask 1046528   ;;  %v950_v56 = vrot.slane %v925_v52, 1  ;;  %v1309_v62 = vmul.f32 %v3194_v11, %v1301_v16  ;;  %v1310_v58 = vmul.f32 %v3194_v11, %v1302_v13  ;;  %v2687_v16 = vld [vmem:[%s4129_s2 + $0x20] sm:$0xf] }
  0x5b   : > { %v949_v55 = vsel %vm4226_vm15, %v947_v60, %v948_v48  ;;  %v1315_v61 = vadd.f32 %v3233_v18, %v1307_v20  ;;  %v3696_v8 = vadd.f32 %v3233_v18, %v1308_v24  ;;  %vm4227_vm1 = vmmov %vm4226_vm15  ;;  %v1303_v52 = vunpack.c.l.bf16 %v2674_v42 }
  0x5c   : > { %v959_v43 = vsel %vm3464_vm3, %v949_v55, 0.0  ;;  %v952_v9 = vsel %vm4227_vm1, %v950_v56, %v951_v21  ;;  %v1317_v48 = vadd.f32 %v3233_v18, %v1309_v62  ;;  %v3701_v30 = vadd.f32 %v3233_v18, %v1310_v58  ;;  %v2677_v21 = vld [vmem:[%s3208_s20 + $0x2c] sm:$0x1] }
  0x5d   : > { %v960_v57 = vsel %vm3476_vm6, %v952_v9, 0.0  ;;  %v1323_v19 = vmax.f32 %v1315_v61, 0.0  ;;  %v1324_v36 = vmax.f32 %v3696_v8, 0.0  ;;  %v1304_v60 = vunpack.c.l.bf16 %v2675_v3 }
  0x5e   : > { %v2781_v51 = vpack.c.bf16 %v960_v57, %v959_v43  ;;  %v1325_v26 = vmax.f32 %v1317_v48, 0.0  ;;  %v1326_v31 = vmax.f32 %v3701_v30, 0.0  ;;  %vm4229_vm15 = vcmp.le.s32.totalorder %v1191_v45, 8  ;;  %v3836_v30 = vld [vmem:[%s3236_s26 + $0x12] sm:$0xff] }
  0x5f   : > { %v1345_v38 = vrot.slane %v1323_v19, 1  ;;  %v1346_v7 = vrot.slane %v1324_v36, 1  ;;  %vm4230_vm1 = vcmp.ge.s32.totalorder %v1191_v45, 1  ;;  %v4231_v13 = vmov 0 }
  0x60   : > { %2893 = vmatmul.mubr.msk.bf16.vlgmr.msra.gmra.mxu0 %vm4228_vm0, %v2781_v51  ;;  %vm3723_vm13 = vmand %vm4230_vm1, %vm4229_vm15  ;;  %v1348_v20 = vrot.slane %v1325_v26, 1  ;;  %v1349_v24 = vrot.slane %v1326_v31, 1  ;;  %v1305_v55 = vunpack.c.h.bf16 %v2674_v42  ;;  %v1306_v56 = vunpack.c.l.bf16 %v2677_v21  ;;  %v2663_v42 = vld [vmem:[%s3208_s20 + $0x20] ss:$8 sps:$4 sm:$0xff]  }
  0x61   : > { %v4232_v13 = vsel %vm3723_vm13, 4294967295, %v4231_v13  ;;  %2903 = vmatpush3.bf16.msra.mxu0 %v1236_v2  ;;  %vm4233_vm10 = vcmask 1046528   ;;  %v1311_v58 = vmul.f32 %v3194_v11, %v1303_v52  ;;  %v1312_v43 = vmul.f32 %v3194_v11, %v1304_v60 }
  0x62   : > { %v1347_v62 = vsel %vm4233_vm10, %v1345_v38, %v1346_v7  ;;  %v1175_v61 = vunpack.c.l.bf16 %v2661_v32  ;;  %vm4234_vm0 = vmmov %vm4233_vm10  ;;  %v1313_v48 = vmul.f32 %v3194_v11, %v1305_v55  ;;  %v1314_v3 = vmul.f32 %v3194_v11, %v1306_v56 }
  0x63   : > { %v1350_v45 = vsel %vm4234_vm0, %v1348_v20, %v1349_v24  ;;  %v1361_v9 = vsel %vm3282_vm14, %v1347_v62, 0.0  ;;  %vm4235_vm15 = vcmask 1043456   ;;  %v1319_v57 = vadd.f32 %v3233_v18, %v1311_v58 }
  0x64   : > { %2982 = vmatprep.subr.msk.bf16.mxu0 %vm4235_vm15, %v2687_v16  ;;  %v1362_v2 = vsel %vm3723_vm13, %v1350_v45, 0.0  ;;  %v3743_v19 = vadd.f32 %v3233_v18, %v1312_v43  ;;  %v1176_v21 = vunpack.c.h.bf16 %v2661_v32  ;;  %v1321_v26 = vadd.f32 %v3233_v18, %v1313_v48 }
  0x65   : > { %v2787_v51 = vpack.c.bf16 %v1362_v2, %v1361_v9  ;;  %v3747_v38 = vadd.f32 %v3233_v18, %v1314_v3  ;;  %v1179_v7 = vmul.f32 %v3194_v11, %v1175_v61  ;;  %v1327_v52 = vmax.f32 %v1319_v57, 0.0 }
  0x66   : > { %v1328_v60 = vmax.f32 %v3743_v19, 0.0  ;;  %v1180_v20 = vmul.f32 %v3194_v11, %v1176_v21  ;;  %v1177_v24 = vunpack.c.l.bf16 %v2663_v42  ;;  %vm4236_vm10 = vcmask 64512  }
  0x67   : > { %2910 = vmatprep.mubr.msk.bf16.mxu1 %vm4236_vm10, %v2787_v51  ;;  %v1329_v55 = vmax.f32 %v1321_v26, 0.0  ;;  %v1330_v56 = vmax.f32 %v3747_v38, 0.0  ;;  %v1183_v32 = vadd.f32 %v3233_v18, %v1179_v7  ;;  %vm4237_vm1 = vcmp.ge.s32.totalorder %v3169_v5, 1 }
  0x68   : > { %vm3759_vm0 = vmand %vm3723_vm13, %vm4237_vm1  ;;  %v1178_v58 = vunpack.c.h.bf16 %v2663_v42  ;;  %vm4240_vm15 = vcmp.le.s32.totalorder %v3684_v34, 8  ;;  %vm4241_vm6 = vcmp.ge.s32.totalorder %v3684_v34, 1  ;;  %v4242_v43 = vmov 0 }
  0x69   : > { %vm3767_vm10 = vmand %vm4241_vm6, %vm4240_vm15  ;;  %v1351_v61 = vrot.slane %v1327_v52, 1  ;;  %v1352_v45 = vrot.slane %v1328_v60, 1  ;;  %v1184_v9 = vadd.f32 %v3233_v18, %v1180_v20  ;;  %v1181_v48 = vmul.f32 %v3194_v11, %v1177_v24 }
  0x6a   : > { %v4243_v43 = vsel %vm3767_vm10, 4294967295, %v4242_v43  ;;  %vm4244_vm1 = vcmp.le.s32.totalorder %v3687_v53, 8  ;;  %vm4245_vm3 = vcmp.ge.s32.totalorder %v3687_v53, 1  ;;  %v1354_v34 = vrot.slane %v1329_v55, 1  ;;  %v2683_v53 = vld [vmem:[%s3208_s20 + $0x10] sm:$0xe] }
  0x6b   : > { %vm3777_vm9 = vmand %vm4245_vm3, %vm4244_vm1  ;;  %v1355_v42 = vrot.slane %v1330_v56, 1  ;;  %v1187_v2 = vmax.f32 %v1183_v32, 0.0  ;;  %v1182_v57 = vmul.f32 %v3194_v11, %v1178_v58  ;;  %vm4248_vm6 = vcmask 1046528   ;;  %v2685_v55 = vld [vmem:[%s3208_s20 + $0x20] sm:$0xe] }
  0x6c   : > { %v1353_v19 = vsel %vm4248_vm6, %v1351_v61, %v1352_v45  ;;  %v1188_v21 = vmax.f32 %v1184_v9, 0.0  ;;  %v1185_v51 = vadd.f32 %v3233_v18, %v1181_v48  ;;  %vm4249_vm15 = vcmask 1043456   ;;  %vm4250_vm14 = vmmov %vm4248_vm6  ;;  %v2686_v48 = vld [vmem:[%s3208_s20 + $0x28] sm:$0xe] }
  0x6d   : > { %v1516_v26 = vsel %vm4249_vm15, %v2687_v16, 0  ;;  %v1356_v38 = vsel %vm4250_vm14, %v1354_v34, %v1355_v42  ;;  %v1363_v7 = vsel %vm3767_vm10, %v1353_v19, 0.0  ;;  %v1209_v52 = vsel %vm3315_vm4, %v1187_v2, 0.0  ;;  %v2684_v16 = vld [vmem:[%s3208_s20 + $0x18] sm:$0xe] }
  0x6e   : > { %v1186_v20 = vadd.f32 %v3233_v18, %v1182_v57  ;;  %vm4251_vm3 = vcmp.ge.s32.totalorder %v3169_v5, 1  ;;  %v1364_v32 = vsel %vm3777_vm9, %v1356_v38, 0.0  ;;  %v1210_v58 = vsel %vm3759_vm0, %v1188_v21, 0.0  ;;  %v2699_v5 = vld [vmem:[%s4130_s3 + $0x4] sm:$0xf] }
  0x6f   : > { %vm3796_vm1 = vmand %vm3767_vm10, %vm4251_vm3  ;;  %v1189_v61 = vmax.f32 %v1185_v51, 0.0  ;;  %v4255_v45 = vmov 0  ;;  %v1629_v9 = vsel %vm4249_vm15, %v3670_v50, 0  ;;  %v2788_v34 = vpack.c.bf16 %v1364_v32, %v1363_v7  ;;  %v2704_v38 = vld [vmem:[%s4130_s3 + $0x8] sm:$0xf] }
  0x70   : > { %vm4254_vm14 = vmmov %vm4251_vm3  ;;  %v2785_v42 = vpack.c.bf16 %v1210_v58, %v1209_v52  ;;  %v1190_v2 = vmax.f32 %v1186_v20, 0.0  ;;  %v1447_v57 = vunpack.c.l.bf16 %v2683_v53  ;;  %v1448_v21 = vunpack.c.l.bf16 %v2684_v16  ;;  %v3844_v58 = vld [vmem:[%s3236_s26 + $0x22] sm:$0xff] }
  0x71   : > { %vm3810_vm6 = vmand %vm3777_vm9, %vm4254_vm14  ;;  %v1211_v19 = vsel %vm3796_vm1, %v1189_v61, 0.0  ;;  %v1474_v51 = vrot.slane %v1324_v36, 2  ;;  %v1477_v50 = vrot.slane %v1326_v31, 2  ;;  %vm4257_vm3 = vcmask 64512   ;;  %v1782_v36 = vld [vmem:[%s3236_s26 + $0x2] sm:$0xff] }
  0x72   : > { %v4256_v45 = vsel %vm3810_vm6, 4294967295, %v4255_v45  ;;  %2911 = vmatmul.mubr.msk.bf16.vlgmr.msra.gmra.mxu1 %vm4257_vm3, %v2788_v34  ;;  %vm4258_vm14 = vmmov %vm4257_vm3  ;;  %v1212_v53 = vsel %vm3810_vm6, %v1190_v2, 0.0  ;;  %v1451_v7 = vmul.f32 %v3194_v11, %v1447_v57  ;;  %v1449_v52 = vunpack.c.l.bf16 %v2685_v55 }
  0x73   : > { %2904 = vmatprep.mubr.msk.bf16.mxu0 %vm4258_vm14, %v2785_v42  ;;  %v1450_v8 = vunpack.c.l.bf16 %v2686_v48  ;;  %v2786_v31 = vpack.c.bf16 %v1212_v53, %v1211_v19  ;;  %2921 = vmatpush3.bf16.msra.mxu1 %v1629_v9  ;;  %vm4259_vm15 = vmmov %vm4257_vm3  ;;  %v1452_v20 = vmul.f32 %v3194_v11, %v1448_v21  ;;  %v1480_v16 = vrot.slane %v1328_v60, 2 }
  0x74   : > { %2922 = vmatprep.mubr.msk.bf16.mxu1 %vm4259_vm15, %v2792_v28  ;;  %v1483_v32 = vrot.slane %v1330_v56, 2  ;;  %v1455_v55 = vadd.f32 %v3233_v18, %v1451_v7  ;;  %v1453_v61 = vmul.f32 %v3194_v11, %v1449_v52  ;;  %vm4260_vm3 = vcmask 1043456  }
  0x75   : > { %v1454_v48 = vmul.f32 %v3194_v11, %v1450_v8  ;;  %v3850_v34 = vsel %vm4260_vm3, %v2699_v5, 0  ;;  %vm4261_vm14 = vmmov %vm4260_vm3  ;;  %2905 = vmatmul.mubr.msk.bf16.vlgmr.msra.gmra.mxu0 %vm4259_vm15, %v2786_v31  ;;  %v1456_v1 = vadd.f32 %v3233_v18, %v1452_v20  ;;  %v1786_v60 = vmul.f32 %v3185_v10, %v1782_v36 }
  0x76   : > { %2985 = vmatprep.subr.msk.bf16.mxu1 %vm4261_vm14, %v2704_v38  ;;  %vm4262_vm6 = vmmov %vm4260_vm3  ;;  %v1787_v56 = vmul.f32 %v3185_v10, %v3836_v30  ;;  %2915 = vmatpush3.bf16.msra.mxu0 %v1516_v26  ;;  %v1459_v11 = vmax.f32 %v1455_v55, 0.0  ;;  %v1457_v9 = vadd.f32 %v3233_v18, %v1453_v61  ;;  %v1788_v2 = vmul.f32 %v3185_v10, %v3844_v58  ;;  %v2724_v55 = vld [vmem:[%s4130_s3 + $0x10] sm:$0xf] }
  0x77   : > { %v1825_v28 = vsel %vm4262_vm6, %v2704_v38, 0  ;;  %v1458_v42 = vadd.f32 %v3233_v18, %v1454_v48  ;;  %v1460_v57 = vmax.f32 %v1456_v1, 0.0  ;;  %2984 = vmatprep.subr.msk.bf16.mxu0 %vm4260_vm3, %v2699_v5  ;;  %v1790_v19 = vadd.f32 %v3218_v15, %v1786_v60 }
  0x78   : > { %v1791_v21 = vadd.f32 %v3218_v15, %v1787_v56  ;;  %v1789_v38 = vmul.f32 %v3185_v10, %v3854_v0  ;;  %vm4263_vm6 = vcmp.le.s32.totalorder %v3199_v12, 8  ;;  %v1473_v18 = vrot.slane %v1459_v11, 2 }
  0x79   : > { %vm3875_vm14 = vmand %vm3723_vm13, %vm4263_vm6  ;;  %v1461_v53 = vmax.f32 %v1457_v9, 0.0  ;;  %v1462_v7 = vmax.f32 %v1458_v42, 0.0  ;;  %v1792_v5 = vadd.f32 %v3218_v15, %v1788_v2  ;;  %v1476_v52 = vrot.slane %v1460_v57, 2  ;;  %v1686_v57 = vld [vmem:[%s3236_s26 + $0x21] sm:$0xff] }
  0x7a   : > { %vm4266_vm15 = vmmov %vm4263_vm6  ;;  %v1794_v36 = vmax.f32 %v1790_v19, 0.0  ;;  %v1795_v31 = vmax.f32 %v1791_v21, 0.0  ;;  %v1793_v20 = vadd.f32 %v3218_v15, %v1789_v38  ;;  %vm4269_vm6 = vcmask 64512  }
  0x7b   : > { %vm3884_vm3 = vmand %vm3767_vm10, %vm4266_vm15  ;;  %2923 = vmatmul.mubr.msk.bf16.vlgmr.msra.gmra.mxu1 %vm4269_vm6, %v2793_v63  ;;  %vm4270_vm13 = vcmask 1045504   ;;  %v1479_v1 = vrot.slane %v1461_v53, 2  ;;  %v1482_v60 = vrot.slane %v1462_v7, 2  ;;  %v1796_v56 = vmax.f32 %v1792_v5, 0.0  ;;  %v1684_v63 = vld [vmem:[%s3236_s26 + $0x1] sm:$0xff] }
  0x7c   : > { %v1475_v61 = vsel %vm4270_vm13, %v1473_v18, %v1474_v51  ;;  %vm3901_vm10 = vmand %vm3777_vm9, %vm4266_vm15  ;;  %2933 = vmatpush3.bf16.msra.mxu1 %v1825_v28  ;;  %v1798_v12 = vsel %vm3515_vm2, %v1794_v36, 0.0  ;;  %v1799_v40 = vsel %vm3526_vm12, %v1795_v31, 0.0  ;;  %v1685_v51 = vld [vmem:[%s3236_s26 + $0x11] sm:$0xff]  ;;  %v2715_v28 = vld [vmem:[%s4130_s3 + $0xc] sm:$0xf]  ;;  %vm4277_vm2 = vcmask 64512  }
  0x7d   : > { %vm4273_vm4 = vmmov %vm4270_vm13  ;;  %v1489_v33 = vsel %vm3544_vm5, %v1475_v61, 0.0  ;;  %v1688_v53 = vmul.f32 %v3185_v10, %v1684_v63  ;;  %v3935_v7 = vld [vmem:[%s4132_s5] ss:$0 sm:$0xff]  ;;  %v2723_v61 = vld [vmem:[%s3236_s26 + $0x41] sm:$0xff] }
  0x7e   : > { %v1478_v11 = vsel %vm4273_vm4, %v1476_v52, %v1477_v50  ;;  %vm4274_vm13 = vmmov %vm4273_vm4  ;;  %v2796_v50 = vpack.c.bf16 %v1799_v40, %v1798_v12  ;;  %v1689_v5 = vmul.f32 %v3935_v7, %v1685_v51  ;;  %v1690_v36 = vmul.f32 %v3935_v7, %v1686_v57  ;;  %v2744_v12 = vld [vmem:[%s4130_s3 + $0x18] sm:$0xf] }
  0x7f   : > { %v1490_v9 = vsel %vm3875_vm14, %v1478_v11, 0.0  ;;  %v1481_v42 = vsel %vm4274_vm13, %v1479_v1, %v1480_v16  ;;  %vm4275_vm6 = vmmov %vm4273_vm4  ;;  %vm4276_vm4 = vcmask 1043456   ;;  %v1797_v16 = vmax.f32 %v1793_v20, 0.0 }
  0x80   : > { %v1484_v2 = vsel %vm4275_vm6, %v1482_v60, %v1483_v32  ;;  %2987 = vmatprep.subr.msk.bf16.mxu1 %vm4276_vm4, %v2724_v55  ;;  %v2789_v19 = vpack.c.bf16 %v1490_v9, %v1489_v33  ;;  %v1491_v21 = vsel %vm3884_vm3, %v1481_v42, 0.0  ;;  %2934 = vmatprep.mubr.msk.bf16.mxu1 %vm4277_vm2, %v2796_v50  ;;  %v1800_v32 = vsel %vm3544_vm5, %v1796_v56, 0.0  ;;  %vm4278_vm15 = vmmov %vm4277_vm2  ;;  %v2711_v50 = vld [vmem:[%s3236_s26 + $0x10] sm:$0xff] }
  0x81   : > { %v1492_v38 = vsel %vm3901_vm10, %v1484_v2, 0.0  ;;  %v1801_v52 = vsel %vm3554_vm8, %v1797_v16, 0.0  ;;  %v1691_v31 = vmul.f32 %v3935_v7, %v1687_v59  ;;  %vm4279_vm13 = vmmov %vm4276_vm4  ;;  %v1692_v1 = vadd.f32 %v3218_v15, %v1688_v53 }
  0x82   : > { %v2790_v18 = vpack.c.bf16 %v1492_v38, %v1491_v21  ;;  %2916 = vmatprep.mubr.msk.bf16.mxu0 %vm4278_vm15, %v2789_v19  ;;  %v1925_v20 = vsel %vm4279_vm13, %v2715_v28, 0  ;;  %vm4280_vm6 = vmmov %vm4277_vm2  ;;  %v2797_v10 = vpack.c.bf16 %v1801_v52, %v1800_v32  ;;  %v1693_v60 = vadd.f32 %v3218_v15, %v1689_v5  ;;  %v2714_v21 = vld [vmem:[%s3236_s26 + $0x40] sm:$0xff] }
  0x83   : > { %v2023_v56 = vsel %vm4276_vm4, %v2724_v55, 0  ;;  %v1694_v11 = vadd.f32 %v3953_v22, %v1690_v36  ;;  %v1695_v33 = vadd.f32 %v3953_v22, %v1691_v31  ;;  %vm4281_vm8 = vmmov %vm4277_vm2  ;;  %v1696_v15 = vmax.f32 %v1692_v1, 0.0  ;;  %v3036_v32 = vld [vmem:[%s3236_s26 + $0x20] sm:$0xff] }
  0x84   : > { %2917 = vmatmul.mubr.msk.bf16.vlgmr.msra.gmra.mxu0 %vm4280_vm6, %v2790_v18  ;;  %2935 = vmatmul.mubr.msk.bf16.vlgmr.msra.gmra.mxu1 %vm4281_vm8, %v2797_v10  ;;  %v1697_v55 = vmax.f32 %v1693_v60, 0.0  ;;  %vm4282_vm2 = vmmov %vm4276_vm4  ;;  %v1988_v51 = vadd.f32 %v3953_v22, %v1689_v5  ;;  %vm4284_vm13 = vnez %v4163_v41  ;;  %vm4285_vm6 = vnez %v4165_v44  ;;  %v2733_v44 = vld [vmem:[%s4130_s3 + $0x14] sm:$0xf] }
  0x85   : > { %2927 = vmatpush3.bf16.msra.mxu0 %v3850_v34  ;;  %v1987_v34 = vmul.f32 %v3935_v7, %v2723_v61  ;;  %v1698_v40 = vmax.f32 %v1694_v11, 0.0  ;;  %v3963_v63 = vmax.f32 %v1695_v33, 0.0  ;;  %2945 = vmatpush3.bf16.msra.mxu1 %v2023_v56  ;;  %v1700_v9 = vsel %vm3211_vm7, %v1696_v15, 0.0  ;;  %vm4283_vm15 = vmmov %vm4282_vm2  ;;  %v2740_v61 = vld [vmem:[%s3236_s26 + $0x20] sm:$0xff]  ;;  %v2743_v10 = vld [vmem:[%s3236_s26 + $0x50] sm:$0xff] }
  0x86   : > { %2986 = vmatprep.subr.msk.bf16.mxu0 %vm4282_vm2, %v2715_v28  ;;  %v1701_v42 = vsel %vm3250_vm11, %v1697_v55, 0.0  ;;  %v2713_v28 = vld [vmem:[%s3236_s26 + $0x30] sm:$0xff]  ;;  %2989 = vmatprep.subr.msk.bf16.mxu1 %vm4283_vm15, %v2744_v12  ;;  %v1992_v19 = vmax.f32 %v1988_v51, 0.0  ;;  %vm4286_vm7 = vmmov %vm4281_vm8  ;;  %v1886_v41 = vmul.f32 %v3935_v7, %v2711_v50  ;;  %v1887_v53 = vmul.f32 %v3036_v32, %v3935_v7 }
  0x87   : > { %v3971_v2 = vadd.f32 %v3953_v22, %v1987_v34  ;;  %v2794_v57 = vpack.c.bf16 %v1701_v42, %v1700_v9  ;;  %v3978_v59 = vsel %vm4284_vm13, %v1698_v40, 0.0  ;;  %v1703_v14 = vsel %vm4285_vm6, %v3963_v63, 0.0  ;;  %vm4287_vm4 = vmmov %vm4286_vm7 }
  0x88   : > { %v2795_v38 = vpack.c.bf16 %v1703_v14, %v3978_v59  ;;  %v1996_v18 = vsel %vm3250_vm11, %v1992_v19, 0.0  ;;  %v1888_v5 = vmul.f32 %v3935_v7, %v2713_v28  ;;  %vm4288_vm8 = vnez %v4173_v35  ;;  %vm4291_vm13 = vmmov %vm4283_vm15  ;;  %v2732_v19 = vld [vmem:[%s3236_s26 + $0x42] sm:$0xff] }
  0x89   : > { %v1995_v16 = vmax.f32 %v3971_v2, 0.0  ;;  %2928 = vmatprep.mubr.msk.bf16.mxu0 %vm4286_vm7, %v2794_v57  ;;  %v1997_v52 = vsel %vm4288_vm8, %v1698_v40, 0.0  ;;  %vm4289_vm2 = vnez %v4177_v17  ;;  %vm4290_vm11 = vnez %v4179_v27  ;;  %vm4292_vm6 = vmmov %vm4291_vm13  ;;  %v2762_v40 = vld [vmem:[%s4130_s3 + $0x20] sm:$0xf] }
  0x8a   : > { %v1998_v25 = vsel %vm4289_vm2, %v3963_v63, 0.0  ;;  %v1889_v31 = vmul.f32 %v3935_v7, %v2714_v21  ;;  %v2801_v1 = vpack.c.bf16 %v1997_v52, %v1996_v18  ;;  %v1890_v56 = vadd.f32 %v3953_v22, %v1886_v41  ;;  %vm4293_vm7 = vmmov %vm4287_vm4 }
  0x8b   : > { %v1999_v36 = vsel %vm4290_vm11, %v1995_v16, 0.0  ;;  %v1891_v35 = vadd.f32 %v3953_v22, %v1887_v53  ;;  %v1892_v17 = vadd.f32 %v3953_v22, %v1888_v5  ;;  %v2121_v27 = vsel %vm4291_vm13, %v2733_v44, 0  ;;  %vm4298_vm13 = vmmov %vm4292_vm6 }
  0x8c   : > { %2929 = vmatmul.mubr.msk.bf16.vlgmr.msra.gmra.mxu0 %vm4287_vm4, %v2795_v38  ;;  %v2802_v60 = vpack.c.bf16 %v1999_v36, %v1998_v25  ;;  %v1893_v11 = vadd.f32 %v3953_v22, %v1889_v31  ;;  %v2221_v33 = vsel %vm4292_vm6, %v2744_v12, 0  ;;  %2946 = vmatprep.mubr.msk.bf16.mxu1 %vm4293_vm7, %v2801_v1  ;;  %v2182_v55 = vmul.f32 %v3935_v7, %v2740_v61  ;;  %vm4299_vm6 = vmmov %vm4287_vm4 }
  0x8d   : > { %2939 = vmatpush3.bf16.msra.mxu0 %v1925_v20  ;;  %v1894_v20 = vmax.f32 %v1890_v56, 0.0  ;;  %v1895_v15 = vmax.f32 %v1891_v35, 0.0  ;;  %v2185_v34 = vmul.f32 %v3935_v7, %v2743_v10  ;;  %v1896_v51 = vmax.f32 %v1892_v17, 0.0 }
  0x8e   : > { %2988 = vmatprep.subr.msk.bf16.mxu0 %vm4283_vm15, %v2733_v44  ;;  %2947 = vmatmul.mubr.msk.bf16.vlgmr.msra.gmra.mxu1 %vm4287_vm4, %v2802_v60  ;;  %v1897_v9 = vmax.f32 %v1893_v11, 0.0  ;;  %v2082_v12 = vmul.f32 %v3935_v7, %v3836_v30  ;;  %v2083_v42 = vmul.f32 %v3935_v7, %v3844_v58  ;;  %vm4294_vm8 = vnez %v4167_v49  ;;  %v2761_v44 = vld [vmem:[%s3236_s26 + $0x52] sm:$0xff] }
  0x8f   : > { %v1898_v50 = vsel %vm4294_vm8, %v1894_v20, 0.0  ;;  %vm4295_vm2 = vnez %v4175_v23  ;;  %2957 = vmatpush3.bf16.msra.mxu1 %v2221_v33  ;;  %v2186_v57 = vadd.f32 %v3953_v22, %v2182_v55  ;;  %v2189_v14 = vadd.f32 %v3953_v22, %v2185_v34 }
  0x90   : > { %v1899_v28 = vsel %vm4295_vm2, %v1895_v15, 0.0  ;;  %vm4296_vm11 = vnez %v4182_v39  ;;  %vm4297_vm15 = vnez %v4185_v47  ;;  %v2195_v49 = vsel %vm3759_vm0, %v1896_v51, 0.0  ;;  %2991 = vmatprep.subr.msk.bf16.mxu1 %vm4298_vm13, %v2762_v40  ;;  %v2753_v47 = vld [vmem:[%s4130_s3 + $0x1c] sm:$0xf]  ;;  %vm4300_vm0 = vmmov %vm4287_vm4 }
  0x91   : > { %v2799_v21 = vpack.c.bf16 %v1899_v28, %v1898_v50  ;;  %v1900_v30 = vsel %vm4296_vm11, %v1896_v51, 0.0  ;;  %v1901_v58 = vsel %vm4297_vm15, %v1897_v9, 0.0  ;;  %v2190_v38 = vmax.f32 %v2186_v57, 0.0  ;;  %vm4303_vm4 = vmmov %vm4298_vm13 }
  0x92   : > { %v2800_v23 = vpack.c.bf16 %v1901_v58, %v1900_v30  ;;  %v2193_v18 = vmax.f32 %v2189_v14, 0.0  ;;  %v2196_v41 = vsel %vm3796_vm1, %v1897_v9, 0.0  ;;  %v2086_v32 = vadd.f32 %v3953_v22, %v2082_v12  ;;  %vm4304_vm8 = vmmov %vm4303_vm4 }
  0x93   : > { %2940 = vmatprep.mubr.msk.bf16.mxu0 %vm4299_vm6, %v2799_v21  ;;  %v2087_v39 = vadd.f32 %v3953_v22, %v2083_v42  ;;  %v2084_v62 = vmul.f32 %v3935_v7, %v3854_v0  ;;  %v2085_v53 = vmul.f32 %v3935_v7, %v2732_v19  ;;  %vm4301_vm1 = vnez %v4169_v54  ;;  %v2752_v54 = vld [vmem:[%s3236_s26 + $0x51] sm:$0xff]  ;;  %vm4305_vm2 = vmmov %vm4300_vm0  ;;  %s2605_s26 = sshll.u32 %s4330_s28, 3 }
  0x94   : > { %2941 = vmatmul.mubr.msk.bf16.vlgmr.msra.gmra.mxu0 %vm4300_vm0, %v2800_v23  ;;  %v2194_v24 = vsel %vm4301_vm1, %v2190_v38, 0.0  ;;  %vm4302_vm7 = vnez %v4256_v45  ;;  %v2417_v52 = vsel %vm4303_vm4, %v2762_v40, 0  ;;  %v2090_v31 = vmax.f32 %v2086_v32, 0.0  ;;  %vm4308_vm13 = vmmov %vm4300_vm0  ;;  %s345_s14 = sadd.s32 %s2605_s26, %s4332_s16 }
  0x95   : > { %v2197_v5 = vsel %vm4302_vm7, %v2193_v18, 0.0  ;;  %2951 = vmatpush3.bf16.msra.mxu0 %v2121_v27  ;;  %v2806_v25 = vpack.c.bf16 %v2195_v49, %v2194_v24  ;;  %v2091_v61 = vmax.f32 %v2087_v39, 0.0  ;;  %v2088_v0 = vadd.f32 %v3953_v22, %v2084_v62  ;;  %vm4309_vm6 = vmmov %vm4303_vm4  ;;  %s2606_s15 = sshll.u32 %s345_s14, 2 }
  0x96   : > { %v2807_v36 = vpack.c.bf16 %v2197_v5, %v2196_v41  ;;  %2990 = vmatprep.subr.msk.bf16.mxu0 %vm4304_vm8, %v2753_v47  ;;  %v2089_v10 = vadd.f32 %v3953_v22, %v2085_v53  ;;  %v2381_v1 = vmul.f32 %v3935_v7, %v2761_v44  ;;  %v2094_v45 = vsel %vm3526_vm12, %v2090_v31, 0.0  ;;  %vm4310_vm12 = vmmov %vm4300_vm0  ;;  %s347_s21 = scalar_lea.vmem %s4135_s8, %s2606_s15 }
  0x97   : > { %2958 = vmatprep.mubr.msk.bf16.mxu1 %vm4305_vm2, %v2806_v25  ;;  %vm4306_vm11 = vnez %v4206_v37  ;;  %v2390_v56 = vsel %vm3544_vm5, %v2091_v61, 0.0  ;;  %vm4307_vm15 = vnez %v4232_v13  ;;  %v2092_v11 = vmax.f32 %v2088_v0, 0.0  ;;  %vm4313_vm1 = vmmov %vm4305_vm2 }
  0x98   : > { %v2095_v60 = vsel %vm4306_vm11, %v2091_v61, 0.0  ;;  %v2293_v35 = vsel %vm4307_vm15, %v3963_v63, 0.0  ;;  %2959 = vmatmul.mubr.msk.bf16.vlgmr.msra.gmra.mxu1 %vm4308_vm13, %v2807_v36  ;;  %v2093_v27 = vmax.f32 %v2089_v10, 0.0  ;;  %v2385_v33 = vadd.f32 %v3953_v22, %v2381_v1  ;;  %vm4314_vm7 = vmmov %vm4313_vm1 }
  0x99   : > { %v2803_v17 = vpack.c.bf16 %v2095_v60, %v2094_v45  ;;  %v2319_v29 = vsel %vm4309_vm6, %v2753_v47, 0  ;;  %2969 = vmatpush3.bf16.msra.mxu1 %v2417_v52  ;;  %v2808_v37 = vpack.c.bf16 %v2293_v35, %v3978_v59  ;;  %v2283_v20 = vmul.f32 %v3935_v7, %v2752_v54  ;;  %vm4316_vm4 = vmmov %vm4313_vm1 }
  0x9a   : > { %vm4311_vm5 = vnez %v4213_v4  ;;  %vm4312_vm0 = vnez %v4216_v46  ;;  %v2391_v63 = vsel %vm3875_vm14, %v2092_v11, 0.0  ;;  %v2389_v15 = vmax.f32 %v2385_v33, 0.0 }
  0x9b   : > { %2952 = vmatprep.mubr.msk.bf16.mxu0 %vm4310_vm12, %v2803_v17  ;;  %v2096_v6 = vsel %vm4311_vm5, %v2092_v11, 0.0  ;;  %v2097_v13 = vsel %vm4312_vm0, %v2093_v27, 0.0  ;;  %v2810_v34 = vpack.c.bf16 %v2391_v63, %v2390_v56  ;;  %v2392_v40 = vsel %vm3884_vm3, %v2093_v27, 0.0  ;;  %vm4317_vm3 = vmmov %vm4313_vm1 }
  0x9c   : > { %v2804_v55 = vpack.c.bf16 %v2097_v13, %v2096_v6  ;;  %v2287_v59 = vadd.f32 %v3953_v22, %v2283_v20  ;;  %v2393_v7 = vsel %vm3901_vm10, %v2389_v15, 0.0  ;;  %vm4315_vm14 = vnez %v4243_v43  ;;  %vm4318_vm10 = vmmov %vm4313_vm1 }
  0x9d   : > { %2970 = vmatprep.mubr.msk.bf16.mxu1 %vm4314_vm7, %v2810_v34  ;;  %v2811_v4 = vpack.c.bf16 %v2393_v7, %v2392_v40  ;;  %v2294_v26 = vsel %vm4315_vm14, %v1995_v16, 0.0 }
  0x9e   : > { %2953 = vmatmul.mubr.msk.bf16.vlgmr.msra.gmra.mxu0 %vm4313_vm1, %v2804_v55  ;;  %v2291_v46 = vmax.f32 %v2287_v59, 0.0 }
  0x9f   : > { %2963 = vmatpush3.bf16.msra.mxu0 %v2319_v29  ;;  %2964 = vmatprep.mubr.msk.bf16.mxu0 %vm4316_vm4, %v2808_v37 }
  0xa0   : > { %v2295_v8 = vsel %vm3777_vm9, %v2291_v46, 0.0  ;;  %2971 = vmatmul.mubr.msk.bf16.vlgmr.msra.gmra.mxu1 %vm4317_vm3, %v2811_v4  ;;  %vm2476_vm9 = vcmask 60416  }
  0xa1   : > { %v2809_v48 = vpack.c.bf16 %v2295_v8, %v2294_v26 }
  0xa6   : > { %2965 = vmatmul.mubr.msk.bf16.vlgmr.msra.gmra.mxu0 %vm4318_vm10, %v2809_v48 }
  0xe4   : > { %v2876_v22 = vpop.f32.mrf.mxu1 }
  0xe6   : > { %v614_v9 = vpop.f32.mrf.mxu1 }
  0xe8   : > { %v2877_v42 = vpop.f32.mrf.mxu1 }
  0xea   : > { %v617_v50 = vpop.f32.mrf.mxu1 }
  0xf4   : > { %v2870_v51 = vpop.f32.mrf.mxu0 }
  0xf5   : > { %v623_v24 = vadd.f32 %v2876_v22, %v2870_v51 }
  0xf6   : > { %v546_v12 = vpop.f32.mrf.mxu0 }
  0xf7   : > { %v615_v25 = vadd.f32 %v614_v9, %v546_v12 }
  0xf8   : > { %v2871_v2 = vpop.f32.mrf.mxu0 }
  0xf9   : > { %v626_v0 = vadd.f32 %v2877_v42, %v2871_v2 }
  0xfa   : > { %v549_v43 = vpop.f32.mrf.mxu0 }
  0xfb   : > { %v618_v45 = vadd.f32 %v617_v50, %v549_v43 }
  0xfe   : > { %v2888_v16 = vpop.f32.mrf.mxu1 }
 0x100   : > { %v868_v57 = vpop.f32.mrf.mxu1 }
 0x102   : > { %v2889_v19 = vpop.f32.mrf.mxu1 }
 0x104   : > { %v871_v21 = vpop.f32.mrf.mxu1 }
 0x108   : > { %v2882_v28 = vpop.f32.mrf.mxu0 }
 0x109   : > { %v761_v36 = vadd.f32 %v2882_v28, %v623_v24 }
 0x10a   : > { %v744_v14 = vpop.f32.mrf.mxu0 }
 0x10b   : > { %v759_v10 = vadd.f32 %v744_v14, %v615_v25  ;;  %v885_v56 = vadd.f32 %v2888_v16, %v761_v36 }
 0x10c   : > { %v2883_v3 = vpop.f32.mrf.mxu0 }
 0x10d   : > { %v762_v60 = vadd.f32 %v2883_v3, %v626_v0  ;;  %v883_v27 = vadd.f32 %v868_v57, %v759_v10 }
 0x10e   : > { %v747_v30 = vpop.f32.mrf.mxu0 }
 0x10f   : > { %v760_v17 = vadd.f32 %v747_v30, %v618_v45  ;;  %v886_v20 = vadd.f32 %v2889_v19, %v762_v60 }
 0x111   : > { %v884_v15 = vadd.f32 %v871_v21, %v760_v17 }
 0x116   : > { %v2900_v58 = vpop.f32.mrf.mxu1 }
 0x118   : > { %v1148_v23 = vpop.f32.mrf.mxu1 }
 0x11a   : > { %v2901_v18 = vpop.f32.mrf.mxu1 }
 0x11c   : > { %v1151_v32 = vpop.f32.mrf.mxu1 }
 0x120   : > { %v2894_v49 = vpop.f32.mrf.mxu0 }
 0x121   : > { %v1037_v11 = vadd.f32 %v2894_v49, %v885_v56 }
 0x122   : > { %v1020_v38 = vpop.f32.mrf.mxu0 }
 0x123   : > { %v1035_v37 = vadd.f32 %v1020_v38, %v883_v27  ;;  %v1165_v55 = vadd.f32 %v2900_v58, %v1037_v11 }
 0x124   : > { %v2895_v41 = vpop.f32.mrf.mxu0 }
 0x125   : > { %v1038_v63 = vadd.f32 %v2895_v41, %v886_v20  ;;  %v1163_v4 = vadd.f32 %v1148_v23, %v1035_v37 }
 0x126   : > { %v1023_v39 = vpop.f32.mrf.mxu0 }
 0x127   : > { %v1036_v59 = vadd.f32 %v1023_v39, %v884_v15  ;;  %v1166_v48 = vadd.f32 %v2901_v18, %v1038_v63 }
 0x129   : > { %v1164_v12 = vadd.f32 %v1151_v32, %v1036_v59 }
 0x132   : > { %v2912_v47 = vpop.f32.mrf.mxu1 }
 0x134   : > { %v1424_v62 = vpop.f32.mrf.mxu1 }
 0x135   : > { %v2906_v53 = vpop.f32.mrf.mxu0 }
 0x136   : > { %v2913_v44 = vpop.f32.mrf.mxu1  ;;  %v1289_v7 = vadd.f32 %v2906_v53, %v1165_v55 }
 0x137   : > { %v1272_v5 = vpop.f32.mrf.mxu0 }
 0x138   : > { %v1427_v52 = vpop.f32.mrf.mxu1  ;;  %v1287_v8 = vadd.f32 %v1272_v5, %v1163_v4  ;;  %v1441_v42 = vadd.f32 %v2912_v47, %v1289_v7 }
 0x139   : > { %v2907_v31 = vpop.f32.mrf.mxu0 }
 0x13a   : > { %v1290_v9 = vadd.f32 %v2907_v31, %v1166_v48  ;;  %v1439_v16 = vadd.f32 %v1424_v62, %v1287_v8 }
 0x13b   : > { %v2924_v61 = vpop.f32.mrf.mxu1  ;;  %v1275_v1 = vpop.f32.mrf.mxu0 }
 0x13c   : > { %v1288_v50 = vadd.f32 %v1275_v1, %v1164_v12  ;;  %v1442_v19 = vadd.f32 %v2913_v44, %v1290_v9 }
 0x13d   : > { %v1665_v54 = vpop.f32.mrf.mxu1 }
 0x13e   : > { %v1440_v58 = vadd.f32 %v1427_v52, %v1288_v50 }
 0x13f   : > { %v2925_v35 = vpop.f32.mrf.mxu1 }
 0x141   : > { %v1668_v29 = vpop.f32.mrf.mxu1 }
 0x144   : > { %v2918_v33 = vpop.f32.mrf.mxu0  ;;  %v2936_v13 = vpop.f32.mrf.mxu1 }
 0x145   : > { %v1569_v43 = vadd.f32 %v2918_v33, %v1441_v42 }
 0x146   : > { %v1552_v6 = vpop.f32.mrf.mxu0  ;;  %v1861_v40 = vpop.f32.mrf.mxu1 }
 0x147   : > { %v1567_v14 = vadd.f32 %v1552_v6, %v1439_v16  ;;  %v1682_v49 = vadd.f32 %v2924_v61, %v1569_v43 }
 0x148   : > { %v2919_v34 = vpop.f32.mrf.mxu0  ;;  %v2937_v26 = vpop.f32.mrf.mxu1 }
 0x149   : > { %v1570_v30 = vadd.f32 %v2919_v34, %v1442_v19  ;;  %v1680_v41 = vadd.f32 %v1665_v54, %v1567_v14 }
 0x14a   : > { %v1555_v46 = vpop.f32.mrf.mxu0  ;;  %v1864_v51 = vpop.f32.mrf.mxu1 }
 0x14b   : > { %v1568_v38 = vadd.f32 %v1555_v46, %v1440_v58  ;;  %v1683_v53 = vadd.f32 %v2925_v35, %v1570_v30 }
 0x14c   : > { %v2930_v22 = vpop.f32.mrf.mxu0 }
 0x14d   : > { %v1780_v18 = vadd.f32 %v2930_v22, %v1682_v49  ;;  %v1681_v5 = vadd.f32 %v1668_v29, %v1568_v38 }
 0x14e   : > { %v1763_v2 = vpop.f32.mrf.mxu0  ;;  %v2948_v57 = vpop.f32.mrf.mxu1 }
 0x14f   : > { %v1778_v47 = vadd.f32 %v1763_v2, %v1680_v41  ;;  %v1878_v25 = vadd.f32 %v2936_v13, %v1780_v18 }
 0x150   : > { %v2931_v28 = vpop.f32.mrf.mxu0  ;;  %v2059_v21 = vpop.f32.mrf.mxu1 }
 0x151   : > { %v1781_v62 = vadd.f32 %v2931_v28, %v1683_v53  ;;  %v1876_v52 = vadd.f32 %v1861_v40, %v1778_v47 }
 0x152   : > { %v1766_v3 = vpop.f32.mrf.mxu0  ;;  %v2949_v23 = vpop.f32.mrf.mxu1 }
 0x153   : > { %v1779_v31 = vadd.f32 %v1766_v3, %v1681_v5  ;;  %v1879_v54 = vadd.f32 %v2937_v26, %v1781_v62 }
 0x154   : > { %v2942_v32 = vpop.f32.mrf.mxu0  ;;  %v2062_v39 = vpop.f32.mrf.mxu1 }
 0x155   : > { %v1978_v0 = vadd.f32 %v2942_v32, %v1878_v25  ;;  %v1877_v35 = vadd.f32 %v1864_v51, %v1779_v31 }
 0x156   : > { %v1961_v24 = vpop.f32.mrf.mxu0 }
 0x157   : > { %v1976_v1 = vadd.f32 %v1961_v24, %v1876_v52  ;;  %v2076_v17 = vadd.f32 %v2948_v57, %v1978_v0 }
 0x158   : > { %v2943_v36 = vpop.f32.mrf.mxu0  ;;  %v2960_v44 = vpop.f32.mrf.mxu1 }
 0x159   : > { %v1979_v56 = vadd.f32 %v2943_v36, %v1879_v54  ;;  %v2074_v37 = vadd.f32 %v2059_v21, %v1976_v1 }
 0x15a   : > { %v1964_v61 = vpop.f32.mrf.mxu0  ;;  %v2257_v10 = vpop.f32.mrf.mxu1 }
 0x15b   : > { %v1977_v33 = vadd.f32 %v1964_v61, %v1877_v35  ;;  %v2077_v63 = vadd.f32 %v2949_v23, %v1979_v56 }
 0x15c   : > { %v2961_v45 = vpop.f32.mrf.mxu1 }
 0x15d   : > { %v2075_v34 = vadd.f32 %v2062_v39, %v1977_v33 }
 0x15e   : > { %v2954_v60 = vpop.f32.mrf.mxu0  ;;  %v2260_v11 = vpop.f32.mrf.mxu1 }
 0x15f   : > { %v2174_v29 = vadd.f32 %v2954_v60, %v2076_v17 }
 0x160   : > { %v2157_v27 = vpop.f32.mrf.mxu0  ;;  %v2972_v6 = vpop.f32.mrf.mxu1 }
 0x161   : > { %v2172_v13 = vadd.f32 %v2157_v27, %v2074_v37  ;;  %v2274_v40 = vadd.f32 %v2960_v44, %v2174_v29 }
 0x162   : > { %v2955_v20 = vpop.f32.mrf.mxu0  ;;  %v2453_v59 = vpop.f32.mrf.mxu1 }
 0x163   : > { %v2175_v55 = vadd.f32 %v2955_v20, %v2077_v63  ;;  %v2272_v26 = vadd.f32 %v2257_v10, %v2172_v13 }
 0x164   : > { %v2160_v15 = vpop.f32.mrf.mxu0  ;;  %v2973_v9 = vpop.f32.mrf.mxu1 }
 0x165   : > { %v2173_v4 = vadd.f32 %v2160_v15, %v2075_v34  ;;  %v2275_v51 = vadd.f32 %v2961_v45, %v2175_v55 }
 0x166   : > { %v2966_v7 = vpop.f32.mrf.mxu0  ;;  %v2456_v19 = vpop.f32.mrf.mxu1 }
 0x167   : > { %v2372_v46 = vadd.f32 %v2966_v7, %v2274_v40  ;;  %v2273_v43 = vadd.f32 %v2260_v11, %v2173_v4 }
 0x168   : > { %v2355_v8 = vpop.f32.mrf.mxu0 }
 0x169   : > { %v2470_v48 = vadd.f32 %v2972_v6, %v2372_v46  ;;  %v2370_v22 = vadd.f32 %v2355_v8, %v2272_v26 }
 0x16a   : > { %v2967_v12 = vpop.f32.mrf.mxu0 }
 0x16b   : > { %v2474_v42 = vpack.c.bf16 %v2470_v48, %v2470_v48  ;;  %v2468_v2 = vadd.f32 %v2453_v59, %v2370_v22  ;;  %v2373_v50 = vadd.f32 %v2967_v12, %v2275_v51 }
 0x16c   : > { %v2358_v16 = vpop.f32.mrf.mxu0 }
 0x16d   : > { %2479 = vst.msk [vmem:[%s347_s21 + $0x8] sm:$0xf] %vm2476_vm9, %v2474_v42  ;;  %v2472_v28 = vpack.c.bf16 %v2468_v2, %v2468_v2  ;;  %v2471_v57 = vadd.f32 %v2973_v9, %v2373_v50  ;;  %v2371_v14 = vadd.f32 %v2358_v16, %v2273_v43 }
 0x16f   : > { %2477 = vst.msk [vmem:[%s347_s21] sm:$0xf] %vm2476_vm9, %v2472_v28  ;;  %v2475_v3 = vpack.c.bf16 %v2471_v57, %v2471_v57  ;;  %v2469_v21 = vadd.f32 %v2456_v19, %v2371_v14 }
 0x171   : > { %2480 = vst.msk [vmem:[%s347_s21 + $0xc] sm:$0xf] %vm2476_vm9, %v2475_v3  ;;  %v2473_v30 = vpack.c.bf16 %v2469_v21, %v2469_v21 }
 0x173   : > { %2478 = vst.msk [vmem:[%s347_s21 + $0x4] sm:$0xf] %vm2476_vm9, %v2473_v30 }
 0x174 PF: > { %s18_s9 = sadd.s32 1, %s3075_s9   ;;  %s4319_s27 = smov %s3067_s29 }
 0x175   : > { %p15_p7 = scmp.ge.s32.totalorder %s18_s9, 6   ;;  %s4320_s28 = smov %s3071_s30 }
 0x176   : > { %s4321_s29 = smov %s4324_s10  ;;  %s4322_s30 = smov %s4328_s11 }
 0x177   :  { %17 = sbr.rel (!%p15_p7) target bundleno = 3 (0x3), region = 107 }

</bundles_post_ra>
